<compile_context>
chip_gen: v7x
topology: tpu7x:2x2x1
jax: 0.10.0
libtpu: 0.0.40
codegen_flags: <defaults>
</compile_context>

<pallas_src>
import functools

import jax
import jax.numpy as jnp
from jax.experimental import pallas as pl
from jax.experimental.pallas import tpu as pltpu

LANE = 128


# ----------------------------------------------------------------------------
# Hardware-aware knobs
# ----------------------------------------------------------------------------
@functools.lru_cache(maxsize=None)
def _vmem_limit_bytes():
    # v5e/v6e: 128 MiB physical VMEM -> allow up to 96 MiB.
    # v7x:      64 MiB physical VMEM -> cap at 48 MiB.
    try:
        cap = int(pltpu.get_tpu_info().vmem_capacity_bytes)
    except Exception:
        cap = 64 * 1024 * 1024
    return int(min(cap * 3 // 4, 96 * 1024 * 1024))


def _row_tile(nf_per):
    """Row (M) tile of the Â stream: 256 fills the 2x256^2 MXU on v6e/v7x,
    128 is the floor (and fills v5e's 4x128^2 MXU)."""
    return 256 if nf_per >= 256 else 128


def _pad_rows_to(nf_per):
    t = _row_tile(nf_per)
    return ((nf_per + t - 1) // t) * t


def _tile_for_padded(nfp):
    """nfp is already padded to a multiple of the row tile (never < 128)."""
    if nfp >= 256 and nfp % 256 == 0:
        return 256
    assert nfp % 128 == 0, nfp
    return 128


# ----------------------------------------------------------------------------
# Pallas kernels
# ----------------------------------------------------------------------------
def gcn_kernel(a_ref, x_ref, w_ref, b_ref, o_ref, xw_ref, *, apply_relu: bool):
    """Fused GCNConv on one per-graph Â row tile.

    a_ref:  (1, TM, NF)  bf16 row tile of graph-b's Â
    x_ref:  (1, NF, Cin) bf16 full per-graph activations (revisited per batch)
    w_ref:  (Cin, Cout)  bf16, b_ref: (1, Cout) f32
    xw_ref: (NF, Cout)   bf16 scratch -- X@W computed ONCE per graph at the
                          first row tile and reused by all later row tiles.
    """
    @pl.when(pl.program_id(1) == 0)
    def _():
        xw_ref[...] = jnp.dot(
            x_ref[0], w_ref[...], preferred_element_type=jnp.float32
        ).astype(jnp.bfloat16)

    y = jnp.dot(a_ref[0], xw_ref[...], preferred_element_type=jnp.float32)
    y = y + b_ref[...]
    if apply_relu:
        y = jnp.maximum(y, 0.0)
    o_ref[0] = y.astype(o_ref.dtype)


def gcn_concat_kernel(a_ref, x1_ref, x2_ref, w1_ref, w2_ref, b_ref, o_ref,
                      xw_ref, *, apply_relu: bool):
    """First end-conv with concat fused: Â @ (x1@W1 + x2@W2) + b.
    The two projections are hoisted into scratch at the first row tile."""
    @pl.when(pl.program_id(1) == 0)
    def _():
        xw = jnp.dot(x1_ref[0], w1_ref[...], preferred_element_type=jnp.float32)
        xw = xw + jnp.dot(x2_ref[0], w2_ref[...],
                          preferred_element_type=jnp.float32)
        xw_ref[...] = xw.astype(jnp.bfloat16)

    y = jnp.dot(a_ref[0], xw_ref[...], preferred_element_type=jnp.float32)
    y = y + b_ref[...]
    if apply_relu:
        y = jnp.maximum(y, 0.0)
    o_ref[0] = y.astype(o_ref.dtype)


def gcn_layer(a_hat, x, w, b, *, relu, out_dtype=jnp.bfloat16):
    """a_hat: (B, NF, NF) bf16; x: (B, NF, Cin) bf16; w: (Cin, Cout) bf16."""
    bsz, nfp, cin = x.shape
    cout = w.shape[1]
    tm = _tile_for_padded(nfp)
    return pl.pallas_call(
        functools.partial(gcn_kernel, apply_relu=relu),
        out_shape=jax.ShapeDtypeStruct((bsz, nfp, cout), out_dtype),
        grid=(bsz, nfp // tm),
        in_specs=[
            pl.BlockSpec((1, tm, nfp), lambda bi, i: (bi, i, 0)),   # Â row tile
            pl.BlockSpec((1, nfp, cin), lambda bi, i: (bi, 0, 0)),  # X per graph
            pl.BlockSpec((cin, cout), lambda bi, i: (0, 0)),        # W resident
            pl.BlockSpec((1, cout), lambda bi, i: (0, 0)),          # b resident
        ],
        out_specs=pl.BlockSpec((1, tm, cout), lambda bi, i: (bi, i, 0)),
        scratch_shapes=[pltpu.VMEM((nfp, cout), jnp.bfloat16)],     # X@W cache
        compiler_params=pltpu.CompilerParams(
            dimension_semantics=("parallel", "arbitrary"),
            vmem_limit_bytes=_vmem_limit_bytes()),
    )(a_hat, x, w, b)


def gcn_concat_layer(a_hat, x1, x2, w1, w2, b, *, relu,
                     out_dtype=jnp.bfloat16):
    bsz, nfp, c1 = x1.shape
    c2 = x2.shape[2]
    cout = w1.shape[1]
    tm = _tile_for_padded(nfp)
    return pl.pallas_call(
        functools.partial(gcn_concat_kernel, apply_relu=relu),
        out_shape=jax.ShapeDtypeStruct((bsz, nfp, cout), out_dtype),
        grid=(bsz, nfp // tm),
        in_specs=[
            pl.BlockSpec((1, tm, nfp), lambda bi, i: (bi, i, 0)),
            pl.BlockSpec((1, nfp, c1), lambda bi, i: (bi, 0, 0)),
            pl.BlockSpec((1, nfp, c2), lambda bi, i: (bi, 0, 0)),
            pl.BlockSpec((c1, cout), lambda bi, i: (0, 0)),
            pl.BlockSpec((c2, cout), lambda bi, i: (0, 0)),
            pl.BlockSpec((1, cout), lambda bi, i: (0, 0)),
        ],
        out_specs=pl.BlockSpec((1, tm, cout), lambda bi, i: (bi, i, 0)),
        scratch_shapes=[pltpu.VMEM((nfp, cout), jnp.bfloat16)],
        compiler_params=pltpu.CompilerParams(
            dimension_semantics=("parallel", "arbitrary"),
            vmem_limit_bytes=_vmem_limit_bytes()),
    )(a_hat, x1, x2, w1, w2, b)


def knn_interp_kernel(fine_pos_ref, coarse_pos_t_ref, coarse_y_ref, o_ref):
    """k=3 nearest-neighbour interpolation (torch_geometric.knn_interpolate).

    weights = 1 / clamp(d^2, 1e-16); out = sum(w*y)/sum(w).  Distances are
    computed as (f-c)^2 directly (no cancellation).  The selection matrix is
    normalized by sum(w) via an approx reciprocal (EUP), cast to bf16, and a
    single bf16 MXU dot with f32 accumulation gathers the coarse field.
    """
    fp = fine_pos_ref[0]              # (TF, 2)  f32
    cpt = coarse_pos_t_ref[...]       # (2, NC)  f32
    cy = coarse_y_ref[0]              # (NC, Cp) bf16

    tf_ = fp.shape[0]
    nc = cpt.shape[1]

    dx = fp[:, 0:1] - cpt[0:1, :]     # (TF, NC)
    dy = fp[:, 1:2] - cpt[1:2, :]
    dist = dx * dx + dy * dy

    lane = jax.lax.broadcasted_iota(jnp.int32, (tf_, nc), 1)

    remaining = dist
    sel = jnp.zeros((tf_, nc), jnp.float32)
    den = jnp.zeros((tf_, 1), jnp.float32)
    for _ in range(3):  # k = 3
        m = jnp.min(remaining, axis=1, keepdims=True)            # (TF, 1)
        is_min = remaining == m
        first = jnp.min(jnp.where(is_min, lane, nc), axis=1, keepdims=True)
        onehot = lane == first                                    # (TF, NC)
        w = 1.0 / jnp.maximum(m, 1e-16)                           # (TF, 1)
        sel = sel + w * onehot.astype(jnp.float32)
        den = den + w
        remaining = jnp.where(onehot, jnp.inf, remaining)

    # Normalize first (weights end up in [0,1]) so the gather dot is bf16-safe.
    sel = (sel * pl.reciprocal(den, approx=True)).astype(jnp.bfloat16)
    out = jnp.dot(sel, cy, preferred_element_type=jnp.float32)    # (TF, Cp)
    o_ref[0] = out.astype(o_ref.dtype)


def knn_interpolate3(coarse_y, coarse_pos_t, fine_pos):
    """coarse_y: (B, NC, Cp) bf16; coarse_pos_t: (2, NC); fine_pos: (B, NF, 2)."""
    b, nc, cp = coarse_y.shape
    _, nf, _ = fine_pos.shape
    tf_ = 64 if nc > 256 else 128     # guard vreg pressure for large coarse meshes
    tf_ = min(tf_, nf)
    assert nf % tf_ == 0
    return pl.pallas_call(
        knn_interp_kernel,
        out_shape=jax.ShapeDtypeStruct((b, nf, cp), jnp.bfloat16),
        grid=(b, nf // tf_),
        in_specs=[
            pl.BlockSpec((1, tf_, 2), lambda i, j: (i, j, 0)),
            pl.BlockSpec((2, nc), lambda i, j: (0, 0)),
            pl.BlockSpec((1, nc, cp), lambda i, j: (i, 0, 0)),
        ],
        out_specs=pl.BlockSpec((1, tf_, cp), lambda i, j: (i, j, 0)),
        compiler_params=pltpu.CompilerParams(
            dimension_semantics=("parallel", "parallel"),
            vmem_limit_bytes=_vmem_limit_bytes()),
    )(fine_pos, coarse_pos_t, coarse_y)


# ----------------------------------------------------------------------------
# Glue (plain JAX)
# ----------------------------------------------------------------------------
def pad_to(x, axis, target):
    size = x.shape[axis]
    if target <= size:
        return x
    widths = [(0, 0)] * x.ndim
    widths[axis] = (0, target - size)
    return jnp.pad(x, widths)


def pad_lanes(x, mult=LANE):
    size = x.shape[-1]
    return pad_to(x, -1, ((size + mult - 1) // mult) * mult)


def build_norm_adj_batched(edge_index, batch_size, nf_per, nf_pad):
    """Per-graph dense GCN adjacency  D^{-1/2}(A+I)D^{-1/2}  of the batched
    (block-diagonal) graph, stored as (B, nf_pad, nf_pad) -- the batched
    normalization equals the per-graph one because edges never cross graphs.
    Precomputed ONCE per mesh outside the jitted forward (edge_index static)."""
    src, dst = edge_index[0], edge_index[1]
    g = src // nf_per
    ls, ld = src % nf_per, dst % nf_per
    a = jnp.zeros((batch_size, nf_per, nf_per), jnp.float32)
    a = a.at[g, ls, ld].set(1.0)
    a = a.at[g, ld, ls].set(1.0)
    a = a + jnp.eye(nf_per, dtype=jnp.float32)[None]
    deg = jnp.sum(a, axis=2)
    dinv = 1.0 / jnp.sqrt(deg)
    a = a * dinv[:, :, None] * dinv[:, None, :]
    pad = nf_pad - nf_per
    a = jnp.pad(a, ((0, 0), (0, pad), (0, pad)))   # zero rows/cols: inert
    return a.astype(jnp.bfloat16)


def glorot(key, cin, cout):
    lim = (6.0 / (cin + cout)) ** 0.5
    return jax.random.uniform(key, (cin, cout), jnp.float32, -lim, lim)


def _make_wb(key, cin, cout):
    """Glorot weight + zero bias, lane-padded to 128, weight in bf16."""
    w = glorot(key, cin, cout)
    w = jnp.pad(w, ((0, (-cin) % LANE), (0, (-cout) % LANE))).astype(jnp.bfloat16)
    b = jnp.zeros((1, cout + (-cout) % LANE), jnp.float32)
    return w, b


def _make_concat_wb(key, c_up, c_x, cout):
    """Single Glorot fan over the concatenated input (matches GCNConv init),
    then split into the two fused-concat weight halves."""
    w = glorot(key, c_up + c_x, cout)
    w_up = jnp.pad(w[:c_up], ((0, (-c_up) % LANE), (0, (-cout) % LANE)))
    w_x = jnp.pad(w[c_up:], ((0, (-c_x) % LANE), (0, (-cout) % LANE)))
    b = jnp.zeros((1, cout + (-cout) % LANE), jnp.float32)
    return w_up.astype(jnp.bfloat16), w_x.astype(jnp.bfloat16), b


def init_params(key, initial_channels, hidden, out_channels,
                num_convs=6, num_end_convs=3):
    assert num_end_convs >= 2
    num_pre = num_convs - num_end_convs
    keys = jax.random.split(key, num_convs)
    params = {"pre_convs": [], "convs_rest": []}
    cin = initial_channels
    for i in range(num_pre):
        params["pre_convs"].append(_make_wb(keys[i], cin, hidden))
        cin = hidden
    # first end conv acts on concat([fine_up(out), x(hidden)]) -> split weights
    params["conv_concat"] = _make_concat_wb(keys[num_pre], out_channels,
                                            hidden, hidden)
    cin = hidden
    for i in range(num_end_convs - 2):
        params["convs_rest"].append(_make_wb(keys[num_pre + 1 + i], cin, hidden))
        cin = hidden
    params["convs_rest"].append(_make_wb(keys[-1], cin, out_channels))
    return params


def synthetic_su2(coarse_pos, ts, out_channels):
    """Deterministic stand-in for the SU2 CFD solve on the coarse mesh."""
    # TODO(synk): SU2Module (external CFD solver) + mesh file writing/logging
    # have no Pallas/JAX equivalent; replaced by a deterministic analytic field.
    ch = jnp.arange(out_channels, dtype=jnp.float32)[None, None, :]
    x = coarse_pos[None, :, 0:1]
    y = coarse_pos[None, :, 1:2]
    t = ts[:, None, None]
    return jnp.sin((ch + 1.0) * x) + jnp.cos((ch + 2.0) * y) * t  # (B, NC, out)


def cfdgcn_forward(params, a_hat, fine_x, coarse_pos, ts,
                   *, batch_size, nf_per, out_channels=3):
    nf_pad = a_hat.shape[1]

    # ---- per-graph, row- and lane-padded activations (bf16) ----
    x = fine_x.reshape(batch_size, nf_per, -1)
    x = pad_to(x, 1, nf_pad)
    x = pad_lanes(x).astype(jnp.bfloat16)               # (B, NF_pad, 128)

    # ---- pre GCN convs on fine graph (all with ReLU) ----
    for w, b in params["pre_convs"]:
        x = gcn_layer(a_hat, x, w, b, relu=True)

    # ---- coarse solve (synthetic SU2) + kNN upsample to fine mesh ----
    coarse_y = synthetic_su2(coarse_pos, ts, out_channels)       # (B, NC, 3)
    coarse_y = pad_lanes(coarse_y).astype(jnp.bfloat16)          # (B, NC, 128)
    coarse_pos_t = coarse_pos.T                                   # (2, NC)
    fine_pos = fine_x[:, :2].reshape(batch_size, nf_per, 2)
    fine_pos = pad_to(fine_pos, 1, nf_pad)                        # (B, NF_pad, 2)
    fine_up = knn_interpolate3(coarse_y, coarse_pos_t, fine_pos)  # (B, NF_pad, 128)

    # ---- first end conv with the concat fused (ReLU) ----
    w_up, w_x, b0 = params["conv_concat"]
    y = gcn_concat_layer(a_hat, fine_up, x, w_up, w_x, b0, relu=True)

    # ---- remaining end GCN convs (ReLU on all but last) ----
    for w, b in params["convs_rest"][:-1]:
        y = gcn_layer(a_hat, y, w, b, relu=True)
    w, b = params["convs_rest"][-1]
    y = gcn_layer(a_hat, y, w, b, relu=False, out_dtype=jnp.float32)

    # slice row/lane padding back to the true output shape
    y = y[:, :nf_per, :out_channels]
    return y.reshape(batch_size * nf_per, out_channels)


# ----------------------------------------------------------------------------
# Main
# ----------------------------------------------------------------------------
if __name__ == "__main__":
    key = jax.random.PRNGKey(0)

    B = 2                 # batch size
    NF_PER = 128          # fine nodes per graph
    NC = 64               # coarse mesh nodes (shared across batch)
    C_INIT = 4            # initial fine channels (x, y, extra...)
    HIDDEN = 32           # hidden channels (small stand-in for 512)
    C_OUT = 3             # output channels
    NUM_FINE = B * NF_PER

    k_pos, k_feat, k_coarse, k_ts, k_param = jax.random.split(key, 5)

    # fine node features: first two channels are node positions
    fine_pos_flat = jax.random.uniform(k_pos, (NUM_FINE, 2), jnp.float32)
    fine_extra = jax.random.normal(k_feat, (NUM_FINE, C_INIT - 2), jnp.float32)
    fine_x = jnp.concatenate([fine_pos_flat, fine_extra], axis=1)

    # synthetic batched edge_index: ring graph inside each fine graph
    srcs, dsts = [], []
    for g in range(B):
        base = g * NF_PER
        idx = jnp.arange(NF_PER)
        srcs.append(base + idx)
        dsts.append(base + (idx + 1) % NF_PER)
    edge_index = jnp.stack([jnp.concatenate(srcs), jnp.concatenate(dsts)], axis=0)

    # coarse mesh node positions and per-sample time/condition input
    coarse_pos = jax.random.uniform(k_coarse, (NC, 2), jnp.float32)
    ts = jax.random.uniform(k_ts, (B,), jnp.float32)

    params = init_params(k_param, C_INIT, HIDDEN, C_OUT)

    # Â is static w.r.t. the forward loop -> precompute once, outside the jit,
    # as per-graph (block-diagonal) tiles padded to the row-tile multiple.
    NF_PAD = _pad_rows_to(NF_PER)
    a_hat = build_norm_adj_batched(edge_index, B, NF_PER, NF_PAD)  # (B,NFp,NFp)

    fwd = jax.jit(functools.partial(cfdgcn_forward, batch_size=B,
                                    nf_per=NF_PER, out_channels=C_OUT))
    out = fwd(params, a_hat, fine_x, coarse_pos, ts)
    out = jax.block_until_ready(out)

    assert out.shape == (NUM_FINE, C_OUT), out.shape
    assert bool(jnp.all(jnp.isfinite(out)))
    print("KERNEL_OK")
</pallas_src>

<mosaic_0001>
module attributes {stable_mosaic.version = 11 : i64} {
  func.func @knn_interp_kernel(%arg0: i32, %arg1: i32, %arg2: memref<1x128x2xf32, #tpu.memory_space<vmem>>, %arg3: memref<2x64xf32, #tpu.memory_space<vmem>>, %arg4: memref<1x64x128xbf16, #tpu.memory_space<vmem>>, %arg5: memref<1x128x128xbf16, #tpu.memory_space<vmem>>) attributes {dimension_semantics = [#tpu.dimension_semantics<parallel>, #tpu.dimension_semantics<parallel>], iteration_bounds = array<i64: 2, 1>, scalar_prefetch = 0 : i64, scratch_operands = 0 : i64, tpu.core_type = #tpu.core_type<tc>, window_params = [{transform_indices = @transform_0, window_bounds = array<i64: 1, 128, 2>}, {pipeline_mode = #tpu.pipeline_mode<synchronous>, transform_indices = @transform_1, window_bounds = array<i64: 2, 64>}, {transform_indices = @transform_2, window_bounds = array<i64: 1, 64, 128>}, {transform_indices = @transform_3, window_bounds = array<i64: 1, 128, 128>}]} {
    %c0 = arith.constant 0 : index
    %c0_0 = arith.constant 0 : index
    %c0_1 = arith.constant 0 : index
    %0 = vector.load %arg2[%c0, %c0_0, %c0_1] : memref<1x128x2xf32, #tpu.memory_space<vmem>>, vector<1x128x2xf32>
    %1 = vector.shape_cast %0 : vector<1x128x2xf32> to vector<128x2xf32>
    %c0_2 = arith.constant 0 : index
    %c0_3 = arith.constant 0 : index
    %2 = vector.load %arg3[%c0_2, %c0_3] : memref<2x64xf32, #tpu.memory_space<vmem>>, vector<2x64xf32>
    %c0_4 = arith.constant 0 : index
    %c0_5 = arith.constant 0 : index
    %c0_6 = arith.constant 0 : index
    %3 = vector.load %arg4[%c0_4, %c0_5, %c0_6] : memref<1x64x128xbf16, #tpu.memory_space<vmem>>, vector<1x64x128xbf16>
    %4 = vector.shape_cast %3 : vector<1x64x128xbf16> to vector<64x128xbf16>
    %5 = vector.extract_strided_slice %1 {offsets = [0, 0], sizes = [128, 1], strides = [1, 1]} : vector<128x2xf32> to vector<128x1xf32>
    %6 = vector.extract_strided_slice %2 {offsets = [0, 0], sizes = [1, 64], strides = [1, 1]} : vector<2x64xf32> to vector<1x64xf32>
    %7 = vector.broadcast %5 : vector<128x1xf32> to vector<128x64xf32>
    %8 = vector.broadcast %6 : vector<1x64xf32> to vector<128x64xf32>
    %9 = arith.subf %7, %8 : vector<128x64xf32>
    %10 = vector.extract_strided_slice %1 {offsets = [0, 1], sizes = [128, 1], strides = [1, 1]} : vector<128x2xf32> to vector<128x1xf32>
    %11 = vector.extract_strided_slice %2 {offsets = [1, 0], sizes = [1, 64], strides = [1, 1]} : vector<2x64xf32> to vector<1x64xf32>
    %12 = vector.broadcast %10 : vector<128x1xf32> to vector<128x64xf32>
    %13 = vector.broadcast %11 : vector<1x64xf32> to vector<128x64xf32>
    %14 = arith.subf %12, %13 : vector<128x64xf32>
    %15 = arith.mulf %9, %9 : vector<128x64xf32>
    %16 = arith.mulf %14, %14 : vector<128x64xf32>
    %17 = arith.addf %15, %16 : vector<128x64xf32>
    %18 = tpu.iota {dimensions = array<i32: 1>} : vector<128x64xi32>
    %cst = arith.constant 0.000000e+00 : f32
    %19 = vector.broadcast %cst : f32 to vector<128x64xf32>
    %cst_7 = arith.constant 0.000000e+00 : f32
    %20 = vector.broadcast %cst_7 : f32 to vector<128x1xf32>
    %cst_8 = arith.constant dense<0x7F800000> : vector<128xf32>
    %21 = vector.multi_reduction <minimumf>, %17, %cst_8 [1] : vector<128x64xf32> to vector<128xf32>
    %22 = vector.shape_cast %21 : vector<128xf32> to vector<128x1xf32>
    %23 = vector.broadcast %22 : vector<128x1xf32> to vector<128x64xf32>
    %24 = arith.cmpf oeq, %17, %23 : vector<128x64xf32>
    %c64_i32 = arith.constant 64 : i32
    %25 = vector.broadcast %c64_i32 : i32 to vector<128x64xi32>
    %26 = arith.select %24, %18, %25 : vector<128x64xi1>, vector<128x64xi32>
    %cst_9 = arith.constant dense<2147483647> : vector<128xi32>
    %27 = vector.multi_reduction <minsi>, %26, %cst_9 [1] : vector<128x64xi32> to vector<128xi32>
    %28 = vector.shape_cast %27 : vector<128xi32> to vector<128x1xi32>
    %29 = vector.broadcast %28 : vector<128x1xi32> to vector<128x64xi32>
    %30 = arith.cmpi eq, %18, %29 : vector<128x64xi32>
    %cst_10 = arith.constant 1.000000e-16 : f32
    %31 = vector.broadcast %cst_10 : f32 to vector<128x1xf32>
    %32 = arith.maximumf %22, %31 : vector<128x1xf32>
    %cst_11 = arith.constant 1.000000e+00 : f32
    %33 = vector.broadcast %cst_11 : f32 to vector<128x1xf32>
    %34 = arith.divf %33, %32 : vector<128x1xf32>
    %35 = arith.extui %30 : vector<128x64xi1> to vector<128x64xi32>
    %36 = arith.sitofp %35 : vector<128x64xi32> to vector<128x64xf32>
    %37 = vector.broadcast %34 : vector<128x1xf32> to vector<128x64xf32>
    %38 = arith.mulf %37, %36 : vector<128x64xf32>
    %39 = arith.addf %19, %38 : vector<128x64xf32>
    %40 = arith.addf %20, %34 : vector<128x1xf32>
    %cst_12 = arith.constant 0x7F800000 : f32
    %41 = vector.broadcast %cst_12 : f32 to vector<128x64xf32>
    %42 = arith.select %30, %41, %17 : vector<128x64xi1>, vector<128x64xf32>
    %cst_13 = arith.constant dense<0x7F800000> : vector<128xf32>
    %43 = vector.multi_reduction <minimumf>, %42, %cst_13 [1] : vector<128x64xf32> to vector<128xf32>
    %44 = vector.shape_cast %43 : vector<128xf32> to vector<128x1xf32>
    %45 = vector.broadcast %44 : vector<128x1xf32> to vector<128x64xf32>
    %46 = arith.cmpf oeq, %42, %45 : vector<128x64xf32>
    %c64_i32_14 = arith.constant 64 : i32
    %47 = vector.broadcast %c64_i32_14 : i32 to vector<128x64xi32>
    %48 = arith.select %46, %18, %47 : vector<128x64xi1>, vector<128x64xi32>
    %cst_15 = arith.constant dense<2147483647> : vector<128xi32>
    %49 = vector.multi_reduction <minsi>, %48, %cst_15 [1] : vector<128x64xi32> to vector<128xi32>
    %50 = vector.shape_cast %49 : vector<128xi32> to vector<128x1xi32>
    %51 = vector.broadcast %50 : vector<128x1xi32> to vector<128x64xi32>
    %52 = arith.cmpi eq, %18, %51 : vector<128x64xi32>
    %cst_16 = arith.constant 1.000000e-16 : f32
    %53 = vector.broadcast %cst_16 : f32 to vector<128x1xf32>
    %54 = arith.maximumf %44, %53 : vector<128x1xf32>
    %cst_17 = arith.constant 1.000000e+00 : f32
    %55 = vector.broadcast %cst_17 : f32 to vector<128x1xf32>
    %56 = arith.divf %55, %54 : vector<128x1xf32>
    %57 = arith.extui %52 : vector<128x64xi1> to vector<128x64xi32>
    %58 = arith.sitofp %57 : vector<128x64xi32> to vector<128x64xf32>
    %59 = vector.broadcast %56 : vector<128x1xf32> to vector<128x64xf32>
    %60 = arith.mulf %59, %58 : vector<128x64xf32>
    %61 = arith.addf %39, %60 : vector<128x64xf32>
    %62 = arith.addf %40, %56 : vector<128x1xf32>
    %cst_18 = arith.constant 0x7F800000 : f32
    %63 = vector.broadcast %cst_18 : f32 to vector<128x64xf32>
    %64 = arith.select %52, %63, %42 : vector<128x64xi1>, vector<128x64xf32>
    %cst_19 = arith.constant dense<0x7F800000> : vector<128xf32>
    %65 = vector.multi_reduction <minimumf>, %64, %cst_19 [1] : vector<128x64xf32> to vector<128xf32>
    %66 = vector.shape_cast %65 : vector<128xf32> to vector<128x1xf32>
    %67 = vector.broadcast %66 : vector<128x1xf32> to vector<128x64xf32>
    %68 = arith.cmpf oeq, %64, %67 : vector<128x64xf32>
    %c64_i32_20 = arith.constant 64 : i32
    %69 = vector.broadcast %c64_i32_20 : i32 to vector<128x64xi32>
    %70 = arith.select %68, %18, %69 : vector<128x64xi1>, vector<128x64xi32>
    %cst_21 = arith.constant dense<2147483647> : vector<128xi32>
    %71 = vector.multi_reduction <minsi>, %70, %cst_21 [1] : vector<128x64xi32> to vector<128xi32>
    %72 = vector.shape_cast %71 : vector<128xi32> to vector<128x1xi32>
    %73 = vector.broadcast %72 : vector<128x1xi32> to vector<128x64xi32>
    %74 = arith.cmpi eq, %18, %73 : vector<128x64xi32>
    %cst_22 = arith.constant 1.000000e-16 : f32
    %75 = vector.broadcast %cst_22 : f32 to vector<128x1xf32>
    %76 = arith.maximumf %66, %75 : vector<128x1xf32>
    %cst_23 = arith.constant 1.000000e+00 : f32
    %77 = vector.broadcast %cst_23 : f32 to vector<128x1xf32>
    %78 = arith.divf %77, %76 : vector<128x1xf32>
    %79 = arith.extui %74 : vector<128x64xi1> to vector<128x64xi32>
    %80 = arith.sitofp %79 : vector<128x64xi32> to vector<128x64xf32>
    %81 = vector.broadcast %78 : vector<128x1xf32> to vector<128x64xf32>
    %82 = arith.mulf %81, %80 : vector<128x64xf32>
    %83 = arith.addf %61, %82 : vector<128x64xf32>
    %84 = arith.addf %62, %78 : vector<128x1xf32>
    %85 = tpu.reciprocal %84 {approx = true} : vector<128x1xf32> -> vector<128x1xf32>
    %86 = vector.broadcast %85 : vector<128x1xf32> to vector<128x64xf32>
    %87 = arith.mulf %83, %86 : vector<128x64xf32>
    %88 = arith.truncf %87 : vector<128x64xf32> to vector<128x64xbf16>
    %cst_24 = arith.constant dense<0.000000e+00> : vector<128x128xf32>
    %89 = tpu.matmul %88, %4, %cst_24 {dimension_numbers = #tpu.dot_dimension_numbers<[1], [0], [0], [1], [0, 0, 1, 1], [], []>} : vector<128x64xbf16>, vector<64x128xbf16>, vector<128x128xf32> -> vector<128x128xf32>
    %90 = arith.truncf %89 : vector<128x128xf32> to vector<128x128xbf16>
    %c0_25 = arith.constant 0 : index
    %c0_26 = arith.constant 0 : index
    %c0_27 = arith.constant 0 : index
    %91 = vector.load %arg5[%c0_25, %c0_26, %c0_27] : memref<1x128x128xbf16, #tpu.memory_space<vmem>>, vector<1x128x128xbf16>
    %92 = vector.shape_cast %91 : vector<1x128x128xbf16> to vector<128x128xbf16>
    %93 = vector.shape_cast %90 : vector<128x128xbf16> to vector<1x128x128xbf16>
    tpu.vector_store %arg5[%c0_25, %c0_26, %c0_27], %93 {strides = array<i32>} : memref<1x128x128xbf16, #tpu.memory_space<vmem>>, vector<1x128x128xbf16>,
    return
  }
  func.func @transform_0(%arg0: i32, %arg1: i32) -> (i32, i32, i32) {
    %c0_i32 = arith.constant 0 : i32
    %c0_i32_0 = arith.constant 0 : i32
    return %arg0, %arg1, %c0_i32 : i32, i32, i32
  }
  func.func @transform_1(%arg0: i32, %arg1: i32) -> (i32, i32) {
    %c0_i32 = arith.constant 0 : i32
    %c0_i32_0 = arith.constant 0 : i32
    %c0_i32_1 = arith.constant 0 : i32
    return %c0_i32, %c0_i32_0 : i32, i32
  }
  func.func @transform_2(%arg0: i32, %arg1: i32) -> (i32, i32, i32) {
    %c0_i32 = arith.constant 0 : i32
    %c0_i32_0 = arith.constant 0 : i32
    %c0_i32_1 = arith.constant 0 : i32
    return %arg0, %c0_i32, %c0_i32_0 : i32, i32, i32
  }
  func.func @transform_3(%arg0: i32, %arg1: i32) -> (i32, i32, i32) {
    %c0_i32 = arith.constant 0 : i32
    %c0_i32_0 = arith.constant 0 : i32
    return %arg0, %arg1, %c0_i32 : i32, i32, i32
  }
}

module attributes {stable_mosaic.version = 11 : i64} {
  func.func @gcn_kernel(%arg0: i32, %arg1: i32, %arg2: memref<1x128x128xbf16, #tpu.memory_space<vmem>>, %arg3: memref<1x128x128xbf16, #tpu.memory_space<vmem>>, %arg4: memref<128x128xbf16, #tpu.memory_space<vmem>>, %arg5: memref<1x128xf32, #tpu.memory_space<vmem>>, %arg6: memref<1x128x128xbf16, #tpu.memory_space<vmem>>, %arg7: memref<128x128xbf16, #tpu.memory_space<vmem>>) attributes {dimension_semantics = [#tpu.dimension_semantics<parallel>, #tpu.dimension_semantics<arbitrary>], iteration_bounds = array<i64: 2, 1>, scalar_prefetch = 0 : i64, scratch_operands = 1 : i64, tpu.core_type = #tpu.core_type<tc>, window_params = [{transform_indices = @transform_0, window_bounds = array<i64: 1, 128, 128>}, {transform_indices = @transform_1, window_bounds = array<i64: 1, 128, 128>}, {pipeline_mode = #tpu.pipeline_mode<synchronous>, transform_indices = @transform_2, window_bounds = array<i64: 128, 128>}, {pipeline_mode = #tpu.pipeline_mode<synchronous>, transform_indices = @transform_3, window_bounds = array<i64: 1, 128>}, {transform_indices = @transform_4, window_bounds = array<i64: 1, 128, 128>}]} {
    %c0_i32 = arith.constant 0 : i32
    %0 = arith.cmpi eq, %arg1, %c0_i32 : i32
    %1 = arith.extui %0 : i1 to i32
    %c0_i32_0 = arith.constant 0 : i32
    %2 = arith.cmpi ne, %1, %c0_i32_0 : i32
    scf.if %2 {
      %c0_11 = arith.constant 0 : index
      %c0_12 = arith.constant 0 : index
      %c0_13 = arith.constant 0 : index
      %16 = vector.load %arg3[%c0_11, %c0_12, %c0_13] : memref<1x128x128xbf16, #tpu.memory_space<vmem>>, vector<1x128x128xbf16>
      %17 = vector.shape_cast %16 : vector<1x128x128xbf16> to vector<128x128xbf16>
      %c0_14 = arith.constant 0 : index
      %c0_15 = arith.constant 0 : index
      %18 = vector.load %arg4[%c0_14, %c0_15] : memref<128x128xbf16, #tpu.memory_space<vmem>>, vector<128x128xbf16>
      %cst_16 = arith.constant dense<0.000000e+00> : vector<128x128xf32>
      %19 = tpu.matmul %17, %18, %cst_16 {dimension_numbers = #tpu.dot_dimension_numbers<[1], [0], [0], [1], [0, 0, 1, 1], [], []>} : vector<128x128xbf16>, vector<128x128xbf16>, vector<128x128xf32> -> vector<128x128xf32>
      %20 = arith.truncf %19 : vector<128x128xf32> to vector<128x128xbf16>
      %c0_17 = arith.constant 0 : index
      %c0_18 = arith.constant 0 : index
      %21 = vector.load %arg7[%c0_17, %c0_18] : memref<128x128xbf16, #tpu.memory_space<vmem>>, vector<128x128xbf16>
      tpu.vector_store %arg7[%c0_17, %c0_18], %20 {strides = array<i32>} : memref<128x128xbf16, #tpu.memory_space<vmem>>, vector<128x128xbf16>,
    } else {
    }
    %c0 = arith.constant 0 : index
    %c0_1 = arith.constant 0 : index
    %c0_2 = arith.constant 0 : index
    %3 = vector.load %arg2[%c0, %c0_1, %c0_2] : memref<1x128x128xbf16, #tpu.memory_space<vmem>>, vector<1x128x128xbf16>
    %4 = vector.shape_cast %3 : vector<1x128x128xbf16> to vector<128x128xbf16>
    %c0_3 = arith.constant 0 : index
    %c0_4 = arith.constant 0 : index
    %5 = vector.load %arg7[%c0_3, %c0_4] : memref<128x128xbf16, #tpu.memory_space<vmem>>, vector<128x128xbf16>
    %cst = arith.constant dense<0.000000e+00> : vector<128x128xf32>
    %6 = tpu.matmul %4, %5, %cst {dimension_numbers = #tpu.dot_dimension_numbers<[1], [0], [0], [1], [0, 0, 1, 1], [], []>} : vector<128x128xbf16>, vector<128x128xbf16>, vector<128x128xf32> -> vector<128x128xf32>
    %c0_5 = arith.constant 0 : index
    %c0_6 = arith.constant 0 : index
    %7 = vector.load %arg5[%c0_5, %c0_6] : memref<1x128xf32, #tpu.memory_space<vmem>>, vector<1x128xf32>
    %8 = vector.broadcast %7 : vector<1x128xf32> to vector<128x128xf32>
    %9 = arith.addf %6, %8 : vector<128x128xf32>
    %cst_7 = arith.constant 0.000000e+00 : f32
    %10 = vector.broadcast %cst_7 : f32 to vector<128x128xf32>
    %11 = arith.maximumf %9, %10 : vector<128x128xf32>
    %12 = arith.truncf %11 : vector<128x128xf32> to vector<128x128xbf16>
    %c0_8 = arith.constant 0 : index
    %c0_9 = arith.constant 0 : index
    %c0_10 = arith.constant 0 : index
    %13 = vector.load %arg6[%c0_8, %c0_9, %c0_10] : memref<1x128x128xbf16, #tpu.memory_space<vmem>>, vector<1x128x128xbf16>
    %14 = vector.shape_cast %13 : vector<1x128x128xbf16> to vector<128x128xbf16>
    %15 = vector.shape_cast %12 : vector<128x128xbf16> to vector<1x128x128xbf16>
    tpu.vector_store %arg6[%c0_8, %c0_9, %c0_10], %15 {strides = array<i32>} : memref<1x128x128xbf16, #tpu.memory_space<vmem>>, vector<1x128x128xbf16>,
    return
  }
  func.func @transform_0(%arg0: i32, %arg1: i32) -> (i32, i32, i32) {
    %c0_i32 = arith.constant 0 : i32
    %c0_i32_0 = arith.constant 0 : i32
    return %arg0, %arg1, %c0_i32 : i32, i32, i32
  }
  func.func @transform_1(%arg0: i32, %arg1: i32) -> (i32, i32, i32) {
    %c0_i32 = arith.constant 0 : i32
    %c0_i32_0 = arith.constant 0 : i32
    %c0_i32_1 = arith.constant 0 : i32
    return %arg0, %c0_i32, %c0_i32_0 : i32, i32, i32
  }
  func.func @transform_2(%arg0: i32, %arg1: i32) -> (i32, i32) {
    %c0_i32 = arith.constant 0 : i32
    %c0_i32_0 = arith.constant 0 : i32
    %c0_i32_1 = arith.constant 0 : i32
    return %c0_i32, %c0_i32_0 : i32, i32
  }
  func.func @transform_3(%arg0: i32, %arg1: i32) -> (i32, i32) {
    %c0_i32 = arith.constant 0 : i32
    %c0_i32_0 = arith.constant 0 : i32
    %c0_i32_1 = arith.constant 0 : i32
    return %c0_i32, %c0_i32_0 : i32, i32
  }
  func.func @transform_4(%arg0: i32, %arg1: i32) -> (i32, i32, i32) {
    %c0_i32 = arith.constant 0 : i32
    %c0_i32_0 = arith.constant 0 : i32
    return %arg0, %arg1, %c0_i32 : i32, i32, i32
  }
}

module attributes {stable_mosaic.version = 11 : i64} {
  func.func @gcn_concat_kernel(%arg0: i32, %arg1: i32, %arg2: memref<1x128x128xbf16, #tpu.memory_space<vmem>>, %arg3: memref<1x128x128xbf16, #tpu.memory_space<vmem>>, %arg4: memref<1x128x128xbf16, #tpu.memory_space<vmem>>, %arg5: memref<128x128xbf16, #tpu.memory_space<vmem>>, %arg6: memref<128x128xbf16, #tpu.memory_space<vmem>>, %arg7: memref<1x128xf32, #tpu.memory_space<vmem>>, %arg8: memref<1x128x128xbf16, #tpu.memory_space<vmem>>, %arg9: memref<128x128xbf16, #tpu.memory_space<vmem>>) attributes {dimension_semantics = [#tpu.dimension_semantics<parallel>, #tpu.dimension_semantics<arbitrary>], iteration_bounds = array<i64: 2, 1>, scalar_prefetch = 0 : i64, scratch_operands = 1 : i64, tpu.core_type = #tpu.core_type<tc>, window_params = [{transform_indices = @transform_0, window_bounds = array<i64: 1, 128, 128>}, {transform_indices = @transform_1, window_bounds = array<i64: 1, 128, 128>}, {transform_indices = @transform_2, window_bounds = array<i64: 1, 128, 128>}, {pipeline_mode = #tpu.pipeline_mode<synchronous>, transform_indices = @transform_3, window_bounds = array<i64: 128, 128>}, {pipeline_mode = #tpu.pipeline_mode<synchronous>, transform_indices = @transform_4, window_bounds = array<i64: 128, 128>}, {pipeline_mode = #tpu.pipeline_mode<synchronous>, transform_indices = @transform_5, window_bounds = array<i64: 1, 128>}, {transform_indices = @transform_6, window_bounds = array<i64: 1, 128, 128>}]} {
    %c0_i32 = arith.constant 0 : i32
    %0 = arith.cmpi eq, %arg1, %c0_i32 : i32
    %1 = arith.extui %0 : i1 to i32
    %c0_i32_0 = arith.constant 0 : i32
    %2 = arith.cmpi ne, %1, %c0_i32_0 : i32
    scf.if %2 {
      %c0_11 = arith.constant 0 : index
      %c0_12 = arith.constant 0 : index
      %c0_13 = arith.constant 0 : index
      %16 = vector.load %arg3[%c0_11, %c0_12, %c0_13] : memref<1x128x128xbf16, #tpu.memory_space<vmem>>, vector<1x128x128xbf16>
      %17 = vector.shape_cast %16 : vector<1x128x128xbf16> to vector<128x128xbf16>
      %c0_14 = arith.constant 0 : index
      %c0_15 = arith.constant 0 : index
      %18 = vector.load %arg5[%c0_14, %c0_15] : memref<128x128xbf16, #tpu.memory_space<vmem>>, vector<128x128xbf16>
      %cst_16 = arith.constant dense<0.000000e+00> : vector<128x128xf32>
      %19 = tpu.matmul %17, %18, %cst_16 {dimension_numbers = #tpu.dot_dimension_numbers<[1], [0], [0], [1], [0, 0, 1, 1], [], []>} : vector<128x128xbf16>, vector<128x128xbf16>, vector<128x128xf32> -> vector<128x128xf32>
      %c0_17 = arith.constant 0 : index
      %c0_18 = arith.constant 0 : index
      %c0_19 = arith.constant 0 : index
      %20 = vector.load %arg4[%c0_17, %c0_18, %c0_19] : memref<1x128x128xbf16, #tpu.memory_space<vmem>>, vector<1x128x128xbf16>
      %21 = vector.shape_cast %20 : vector<1x128x128xbf16> to vector<128x128xbf16>
      %c0_20 = arith.constant 0 : index
      %c0_21 = arith.constant 0 : index
      %22 = vector.load %arg6[%c0_20, %c0_21] : memref<128x128xbf16, #tpu.memory_space<vmem>>, vector<128x128xbf16>
      %cst_22 = arith.constant dense<0.000000e+00> : vector<128x128xf32>
      %23 = tpu.matmul %21, %22, %cst_22 {dimension_numbers = #tpu.dot_dimension_numbers<[1], [0], [0], [1], [0, 0, 1, 1], [], []>} : vector<128x128xbf16>, vector<128x128xbf16>, vector<128x128xf32> -> vector<128x128xf32>
      %24 = arith.addf %19, %23 : vector<128x128xf32>
      %25 = arith.truncf %24 : vector<128x128xf32> to vector<128x128xbf16>
      %c0_23 = arith.constant 0 : index
      %c0_24 = arith.constant 0 : index
      %26 = vector.load %arg9[%c0_23, %c0_24] : memref<128x128xbf16, #tpu.memory_space<vmem>>, vector<128x128xbf16>
      tpu.vector_store %arg9[%c0_23, %c0_24], %25 {strides = array<i32>} : memref<128x128xbf16, #tpu.memory_space<vmem>>, vector<128x128xbf16>,
    } else {
    }
    %c0 = arith.constant 0 : index
    %c0_1 = arith.constant 0 : index
    %c0_2 = arith.constant 0 : index
    %3 = vector.load %arg2[%c0, %c0_1, %c0_2] : memref<1x128x128xbf16, #tpu.memory_space<vmem>>, vector<1x128x128xbf16>
    %4 = vector.shape_cast %3 : vector<1x128x128xbf16> to vector<128x128xbf16>
    %c0_3 = arith.constant 0 : index
    %c0_4 = arith.constant 0 : index
    %5 = vector.load %arg9[%c0_3, %c0_4] : memref<128x128xbf16, #tpu.memory_space<vmem>>, vector<128x128xbf16>
    %cst = arith.constant dense<0.000000e+00> : vector<128x128xf32>
    %6 = tpu.matmul %4, %5, %cst {dimension_numbers = #tpu.dot_dimension_numbers<[1], [0], [0], [1], [0, 0, 1, 1], [], []>} : vector<128x128xbf16>, vector<128x128xbf16>, vector<128x128xf32> -> vector<128x128xf32>
    %c0_5 = arith.constant 0 : index
    %c0_6 = arith.constant 0 : index
    %7 = vector.load %arg7[%c0_5, %c0_6] : memref<1x128xf32, #tpu.memory_space<vmem>>, vector<1x128xf32>
    %8 = vector.broadcast %7 : vector<1x128xf32> to vector<128x128xf32>
    %9 = arith.addf %6, %8 : vector<128x128xf32>
    %cst_7 = arith.constant 0.000000e+00 : f32
    %10 = vector.broadcast %cst_7 : f32 to vector<128x128xf32>
    %11 = arith.maximumf %9, %10 : vector<128x128xf32>
    %12 = arith.truncf %11 : vector<128x128xf32> to vector<128x128xbf16>
    %c0_8 = arith.constant 0 : index
    %c0_9 = arith.constant 0 : index
    %c0_10 = arith.constant 0 : index
    %13 = vector.load %arg8[%c0_8, %c0_9, %c0_10] : memref<1x128x128xbf16, #tpu.memory_space<vmem>>, vector<1x128x128xbf16>
    %14 = vector.shape_cast %13 : vector<1x128x128xbf16> to vector<128x128xbf16>
    %15 = vector.shape_cast %12 : vector<128x128xbf16> to vector<1x128x128xbf16>
    tpu.vector_store %arg8[%c0_8, %c0_9, %c0_10], %15 {strides = array<i32>} : memref<1x128x128xbf16, #tpu.memory_space<vmem>>, vector<1x128x128xbf16>,
    return
  }
  func.func @transform_0(%arg0: i32, %arg1: i32) -> (i32, i32, i32) {
    %c0_i32 = arith.constant 0 : i32
    %c0_i32_0 = arith.constant 0 : i32
    return %arg0, %arg1, %c0_i32 : i32, i32, i32
  }
  func.func @transform_1(%arg0: i32, %arg1: i32) -> (i32, i32, i32) {
    %c0_i32 = arith.constant 0 : i32
    %c0_i32_0 = arith.constant 0 : i32
    %c0_i32_1 = arith.constant 0 : i32
    return %arg0, %c0_i32, %c0_i32_0 : i32, i32, i32
  }
  func.func @transform_2(%arg0: i32, %arg1: i32) -> (i32, i32, i32) {
    %c0_i32 = arith.constant 0 : i32
    %c0_i32_0 = arith.constant 0 : i32
    %c0_i32_1 = arith.constant 0 : i32
    return %arg0, %c0_i32, %c0_i32_0 : i32, i32, i32
  }
  func.func @transform_3(%arg0: i32, %arg1: i32) -> (i32, i32) {
    %c0_i32 = arith.constant 0 : i32
    %c0_i32_0 = arith.constant 0 : i32
    %c0_i32_1 = arith.constant 0 : i32
    return %c0_i32, %c0_i32_0 : i32, i32
  }
  func.func @transform_4(%arg0: i32, %arg1: i32) -> (i32, i32) {
    %c0_i32 = arith.constant 0 : i32
    %c0_i32_0 = arith.constant 0 : i32
    %c0_i32_1 = arith.constant 0 : i32
    return %c0_i32, %c0_i32_0 : i32, i32
  }
  func.func @transform_5(%arg0: i32, %arg1: i32) -> (i32, i32) {
    %c0_i32 = arith.constant 0 : i32
    %c0_i32_0 = arith.constant 0 : i32
    %c0_i32_1 = arith.constant 0 : i32
    return %c0_i32, %c0_i32_0 : i32, i32
  }
  func.func @transform_6(%arg0: i32, %arg1: i32) -> (i32, i32, i32) {
    %c0_i32 = arith.constant 0 : i32
    %c0_i32_0 = arith.constant 0 : i32
    return %arg0, %arg1, %c0_i32 : i32, i32, i32
  }
}

module attributes {stable_mosaic.version = 11 : i64} {
  func.func @gcn_kernel(%arg0: i32, %arg1: i32, %arg2: memref<1x128x128xbf16, #tpu.memory_space<vmem>>, %arg3: memref<1x128x128xbf16, #tpu.memory_space<vmem>>, %arg4: memref<128x128xbf16, #tpu.memory_space<vmem>>, %arg5: memref<1x128xf32, #tpu.memory_space<vmem>>, %arg6: memref<1x128x128xf32, #tpu.memory_space<vmem>>, %arg7: memref<128x128xbf16, #tpu.memory_space<vmem>>) attributes {dimension_semantics = [#tpu.dimension_semantics<parallel>, #tpu.dimension_semantics<arbitrary>], iteration_bounds = array<i64: 2, 1>, scalar_prefetch = 0 : i64, scratch_operands = 1 : i64, tpu.core_type = #tpu.core_type<tc>, window_params = [{transform_indices = @transform_0, window_bounds = array<i64: 1, 128, 128>}, {transform_indices = @transform_1, window_bounds = array<i64: 1, 128, 128>}, {pipeline_mode = #tpu.pipeline_mode<synchronous>, transform_indices = @transform_2, window_bounds = array<i64: 128, 128>}, {pipeline_mode = #tpu.pipeline_mode<synchronous>, transform_indices = @transform_3, window_bounds = array<i64: 1, 128>}, {transform_indices = @transform_4, window_bounds = array<i64: 1, 128, 128>}]} {
    %c0_i32 = arith.constant 0 : i32
    %0 = arith.cmpi eq, %arg1, %c0_i32 : i32
    %1 = arith.extui %0 : i1 to i32
    %c0_i32_0 = arith.constant 0 : i32
    %2 = arith.cmpi ne, %1, %c0_i32_0 : i32
    scf.if %2 {
      %c0_10 = arith.constant 0 : index
      %c0_11 = arith.constant 0 : index
      %c0_12 = arith.constant 0 : index
      %13 = vector.load %arg3[%c0_10, %c0_11, %c0_12] : memref<1x128x128xbf16, #tpu.memory_space<vmem>>, vector<1x128x128xbf16>
      %14 = vector.shape_cast %13 : vector<1x128x128xbf16> to vector<128x128xbf16>
      %c0_13 = arith.constant 0 : index
      %c0_14 = arith.constant 0 : index
      %15 = vector.load %arg4[%c0_13, %c0_14] : memref<128x128xbf16, #tpu.memory_space<vmem>>, vector<128x128xbf16>
      %cst_15 = arith.constant dense<0.000000e+00> : vector<128x128xf32>
      %16 = tpu.matmul %14, %15, %cst_15 {dimension_numbers = #tpu.dot_dimension_numbers<[1], [0], [0], [1], [0, 0, 1, 1], [], []>} : vector<128x128xbf16>, vector<128x128xbf16>, vector<128x128xf32> -> vector<128x128xf32>
      %17 = arith.truncf %16 : vector<128x128xf32> to vector<128x128xbf16>
      %c0_16 = arith.constant 0 : index
      %c0_17 = arith.constant 0 : index
      %18 = vector.load %arg7[%c0_16, %c0_17] : memref<128x128xbf16, #tpu.memory_space<vmem>>, vector<128x128xbf16>
      tpu.vector_store %arg7[%c0_16, %c0_17], %17 {strides = array<i32>} : memref<128x128xbf16, #tpu.memory_space<vmem>>, vector<128x128xbf16>,
    } else {
    }
    %c0 = arith.constant 0 : index
    %c0_1 = arith.constant 0 : index
    %c0_2 = arith.constant 0 : index
    %3 = vector.load %arg2[%c0, %c0_1, %c0_2] : memref<1x128x128xbf16, #tpu.memory_space<vmem>>, vector<1x128x128xbf16>
    %4 = vector.shape_cast %3 : vector<1x128x128xbf16> to vector<128x128xbf16>
    %c0_3 = arith.constant 0 : index
    %c0_4 = arith.constant 0 : index
    %5 = vector.load %arg7[%c0_3, %c0_4] : memref<128x128xbf16, #tpu.memory_space<vmem>>, vector<128x128xbf16>
    %cst = arith.constant dense<0.000000e+00> : vector<128x128xf32>
    %6 = tpu.matmul %4, %5, %cst {dimension_numbers = #tpu.dot_dimension_numbers<[1], [0], [0], [1], [0, 0, 1, 1], [], []>} : vector<128x128xbf16>, vector<128x128xbf16>, vector<128x128xf32> -> vector<128x128xf32>
    %c0_5 = arith.constant 0 : index
    %c0_6 = arith.constant 0 : index
    %7 = vector.load %arg5[%c0_5, %c0_6] : memref<1x128xf32, #tpu.memory_space<vmem>>, vector<1x128xf32>
    %8 = vector.broadcast %7 : vector<1x128xf32> to vector<128x128xf32>
    %9 = arith.addf %6, %8 : vector<128x128xf32>
    %c0_7 = arith.constant 0 : index
    %c0_8 = arith.constant 0 : index
    %c0_9 = arith.constant 0 : index
    %10 = vector.load %arg6[%c0_7, %c0_8, %c0_9] : memref<1x128x128xf32, #tpu.memory_space<vmem>>, vector<1x128x128xf32>
    %11 = vector.shape_cast %10 : vector<1x128x128xf32> to vector<128x128xf32>
    %12 = vector.shape_cast %9 : vector<128x128xf32> to vector<1x128x128xf32>
    tpu.vector_store %arg6[%c0_7, %c0_8, %c0_9], %12 {strides = array<i32>} : memref<1x128x128xf32, #tpu.memory_space<vmem>>, vector<1x128x128xf32>,
    return
  }
  func.func @transform_0(%arg0: i32, %arg1: i32) -> (i32, i32, i32) {
    %c0_i32 = arith.constant 0 : i32
    %c0_i32_0 = arith.constant 0 : i32
    return %arg0, %arg1, %c0_i32 : i32, i32, i32
  }
  func.func @transform_1(%arg0: i32, %arg1: i32) -> (i32, i32, i32) {
    %c0_i32 = arith.constant 0 : i32
    %c0_i32_0 = arith.constant 0 : i32
    %c0_i32_1 = arith.constant 0 : i32
    return %arg0, %c0_i32, %c0_i32_0 : i32, i32, i32
  }
  func.func @transform_2(%arg0: i32, %arg1: i32) -> (i32, i32) {
    %c0_i32 = arith.constant 0 : i32
    %c0_i32_0 = arith.constant 0 : i32
    %c0_i32_1 = arith.constant 0 : i32
    return %c0_i32, %c0_i32_0 : i32, i32
  }
  func.func @transform_3(%arg0: i32, %arg1: i32) -> (i32, i32) {
    %c0_i32 = arith.constant 0 : i32
    %c0_i32_0 = arith.constant 0 : i32
    %c0_i32_1 = arith.constant 0 : i32
    return %c0_i32, %c0_i32_0 : i32, i32
  }
  func.func @transform_4(%arg0: i32, %arg1: i32) -> (i32, i32, i32) {
    %c0_i32 = arith.constant 0 : i32
    %c0_i32_0 = arith.constant 0 : i32
    return %arg0, %arg1, %c0_i32 : i32, i32, i32
  }
}

</mosaic_0001>

<bundles_post_ra>
// kernel: cfdgcn_forward.7
= control target key start
LH: loop header
LB: loop body
LE: loop exit
PB: predicated region body
PF: predicated region fallthrough
CT: control target
= control target key end

     0   :  { %s1187_s15 = smov 0   ;;  %s1189_s16 = smov 0   ;;  %s1285_s0 = inlined_call_operand.vmem [shape: bf16[2,128,128], index: 0, kind: input, shape index: {}]   ;;  %s1286_s1 = inlined_call_operand.vmem [shape: bf16[2,128,128], index: 1, kind: input, shape index: {}]   ;;  %s1287_s2 = inlined_call_operand.vmem [shape: bf16[128,128], index: 2, kind: input, shape index: {}]   ;;  %s1288_s3 = inlined_call_operand.vmem [shape: f32[1,128], index: 3, kind: input, shape index: {}]   ;;  %s1289_s4 = inlined_call_operand.vmem [shape: bf16[2,128,128], index: 4, kind: output, shape index: {}]  }
   0x1   :  { %s1191_s17 = smov 0  }
   0x2 LB: > { %s26_s18 = sadd.s32 1, %s1156_s16  ;;  %p878_p0 = scmp.ge.s32.totalorder %s1160_s17, 1  ;;  %s1160_s17 = sphi %s1191_s17, %s14_s17   ;;  %s1156_s16 = sphi %s1189_s16, %s1291_s16   ;;  %s1152_s15 = sphi %s1187_s15, %s1290_s15  }
   0x3   : > { %p28_p1 = scmp.ge.s32.totalorder %s26_s18, 2  ;;  %p193_p2 = scmp.lt.s32.totalorder %s1160_s17, 3 }
   0x5   : > { %s1293_s18 = smov (%p28_p1, %s26_s18), 0  ;;  %p194_p3 = pnand %p878_p0, %p193_p2 }
   0x6   : > { %v1114_v0 = vld [vmem:[%s1287_s2] sm:$0xff] (!%p194_p3)   ;;  %p233_p4 = scmp.lt.s32.totalorder (!%p194_p3), %s1152_s15, 1  ;;  %v1115_v1 = vld [vmem:[%s1287_s2 + $0x8] sm:$0xff] (!%p194_p3)   ;;  %v1116_v2 = vld [vmem:[%s1287_s2 + $0x10] sm:$0xff] (!%p194_p3)  }
   0x7   : > { %197 = sbr.rel (%p194_p3) target bundleno = 534 (0x216), region = 36  ;;  %1026 = vmatprep.subr.bf16.mxu0 (!%p194_p3), %v1114_v0  ;;  %v1117_v3 = vld [vmem:[%s1287_s2 + $0x18] sm:$0xff] (!%p194_p3)   ;;  %v1118_v5 = vld [vmem:[%s1287_s2 + $0x20] sm:$0xff] (!%p194_p3)   ;;  %v1119_v6 = vld [vmem:[%s1287_s2 + $0x28] sm:$0xff] (!%p194_p3)  }
   0x8   : > { %1027 = vmatpush3.bf16.msra.mxu0 (!%p194_p3), %v1114_v0  ;;  %v1120_v7 = vld [vmem:[%s1287_s2 + $0x30] sm:$0xff] (!%p194_p3)   ;;  %v1121_v8 = vld [vmem:[%s1287_s2 + $0x38] sm:$0xff] (!%p194_p3)   ;;  %v901_v48 = vld [vmem:[%s1288_s3] ss:$0 sm:$0xff] (!%p194_p3) }
   0x9   : > { %1028 = vmatprep.subr.bf16.mxu0 (!%p194_p3), %v1115_v1 }
   0xc   : > { %1029 = vmatpush3.bf16.msra.mxu0 (!%p194_p3), %v1115_v1 }
   0xd   : > { %1030 = vmatprep.subr.bf16.mxu0 (!%p194_p3), %v1116_v2 }
   0xe   : > { %s1295_s15 = smov (!%p233_p4, %s1152_s15), 1 }
   0xf   : > { %s1214_s25 = sshll.u32 %s1295_s15, 6 }
  0x10   : > { %s1220_s28 = scalar_lea.vmem %s1286_s1, %s1214_s25  ;;  %1031 = vmatpush3.bf16.msra.mxu0 %v1116_v2  ;;  %s1249_s15 = scalar_lea.vmem %s1285_s0, %s1214_s25 }
  0x11   : > { %v1122_v4 = vld [vmem:[%s1220_s28] sm:$0xff]   ;;  %1032 = vmatprep.subr.bf16.mxu0 %v1117_v3  ;;  %v1123_v9 = vld [vmem:[%s1220_s28 + $0x8] sm:$0xff]   ;;  %v1124_v10 = vld [vmem:[%s1220_s28 + $0x10] sm:$0xff]   ;;  %s1266_s23 = scalar_lea.vmem %s1289_s4, %s1214_s25 }
  0x12   : > { %1042 = vmatprep.mubr.bf16.mxu0 %v1122_v4  ;;  %v1125_v11 = vld [vmem:[%s1220_s28 + $0x18] sm:$0xff]   ;;  %v1126_v12 = vld [vmem:[%s1220_s28 + $0x20] sm:$0xff]   ;;  %v1127_v13 = vld [vmem:[%s1220_s28 + $0x28] sm:$0xff]  }
  0x13   : > { %v1128_v14 = vld [vmem:[%s1220_s28 + $0x30] sm:$0xff]   ;;  %v1129_v15 = vld [vmem:[%s1220_s28 + $0x38] sm:$0xff]   ;;  %v1130_v16 = vld [vmem:[%s1249_s15] sm:$0xff]  }
  0x14   : > { %1033 = vmatpush3.bf16.msra.mxu0 %v1117_v3  ;;  %1074 = vmatprep.mubr.bf16.mxu1 %v1130_v16  ;;  %v1131_v41 = vld [vmem:[%s1249_s15 + $0x8] sm:$0xff]   ;;  %v1132_v42 = vld [vmem:[%s1249_s15 + $0x10] sm:$0xff]   ;;  %v1133_v43 = vld [vmem:[%s1249_s15 + $0x18] sm:$0xff]  }
  0x15   : > { %1034 = vmatprep.subr.bf16.mxu0 %v1118_v5  ;;  %v1134_v44 = vld [vmem:[%s1249_s15 + $0x20] sm:$0xff]   ;;  %v1135_v45 = vld [vmem:[%s1249_s15 + $0x28] sm:$0xff]   ;;  %v1136_v46 = vld [vmem:[%s1249_s15 + $0x30] sm:$0xff]  }
  0x16   : > { %v1137_v47 = vld [vmem:[%s1249_s15 + $0x38] sm:$0xff]  }
  0x18   : > { %1035 = vmatpush3.bf16.msra.mxu0 %v1118_v5 }
  0x19   : > { %1036 = vmatprep.subr.bf16.mxu0 %v1119_v6 }
  0x1c   : > { %1037 = vmatpush3.bf16.msra.mxu0 %v1119_v6 }
  0x1d   : > { %1038 = vmatprep.subr.bf16.mxu0 %v1120_v7 }
  0x20   : > { %1039 = vmatpush3.bf16.msra.mxu0 %v1120_v7 }
  0x21   : > { %1040 = vmatprep.subr.bf16.mxu0 %v1121_v8 }
  0x24   : > { %1041 = vmatpush3.bf16.msra.mxu0 %v1121_v8 }
  0x27   : > { %1043 = vmatmul.mubr.bf16.vlgmr.msra.gmra.mrb[0].mxu0 %v1123_v9 }
  0x28   : > { %1046 = vmatprep.mubr.bf16.mxu0 %v1124_v10 }
  0x2f   : > { %1047 = vmatmul.mubr.bf16.gmra.mrb[4].mxu0 %v1125_v11 }
  0x30   : > { %1050 = vmatprep.mubr.bf16.mxu0 %v1126_v12 }
  0x37   : > { %1051 = vmatmul.mubr.bf16.gmra.mrb[8].mxu0 %v1127_v13 }
  0x38   : > { %1054 = vmatprep.mubr.bf16.mxu0 %v1128_v14 }
  0x3f   : > { %1055 = vmatmul.mubr.bf16.gmra.mrb[12].mxu0 %v1129_v15 }
  0xfa   : > { %v1044_v17 = vpop.f32.mrb[0].mxu0 }
  0xfb   : > { %v424_v18 = vpop.f32.mrb[1].mxu0 }
  0xfc   : > { %v1045_v19 = vpop.f32.mrb[2].mxu0 }
  0xfd   : > { %v488_v20 = vpack.c.bf16 %v1045_v19, %v1044_v17  ;;  %v427_v21 = vpop.f32.mrb[3].mxu0 }
  0xfe   : > { %v487_v22 = vpack.c.bf16 %v427_v21, %v424_v18 }
 0x100   : > { %1058 = vmatprep.subr.bf16.mxu1 %v487_v22 }
 0x101   : > { %1059 = vmatpush3.bf16.msra.mxu1 %v487_v22 }
 0x102   : > { %v1048_v23 = vpop.f32.mrb[4].mxu0  ;;  %1060 = vmatprep.subr.bf16.mxu1 %v488_v20 }
 0x103   : > { %v440_v24 = vpop.f32.mrb[5].mxu0 }
 0x104   : > { %v1049_v25 = vpop.f32.mrb[6].mxu0 }
 0x105   : > { %v490_v26 = vpack.c.bf16 %v1049_v25, %v1048_v23  ;;  %v443_v27 = vpop.f32.mrb[7].mxu0  ;;  %1061 = vmatpush3.bf16.msra.mxu1 %v488_v20 }
 0x106   : > { %v489_v28 = vpack.c.bf16 %v443_v27, %v440_v24 }
 0x108   : > { %1062 = vmatprep.subr.bf16.mxu1 %v489_v28 }
 0x109   : > { %1063 = vmatpush3.bf16.msra.mxu1 %v489_v28 }
 0x10a   : > { %v1052_v29 = vpop.f32.mrb[8].mxu0  ;;  %1064 = vmatprep.subr.bf16.mxu1 %v490_v26 }
 0x10b   : > { %v456_v30 = vpop.f32.mrb[9].mxu0 }
 0x10c   : > { %v1053_v31 = vpop.f32.mrb[10].mxu0 }
 0x10d   : > { %v492_v32 = vpack.c.bf16 %v1053_v31, %v1052_v29  ;;  %v459_v33 = vpop.f32.mrb[11].mxu0  ;;  %1065 = vmatpush3.bf16.msra.mxu1 %v490_v26 }
 0x10e   : > { %v491_v34 = vpack.c.bf16 %v459_v33, %v456_v30 }
 0x110   : > { %1066 = vmatprep.subr.bf16.mxu1 %v491_v34 }
 0x111   : > { %1067 = vmatpush3.bf16.msra.mxu1 %v491_v34 }
 0x112   : > { %v1056_v35 = vpop.f32.mrb[12].mxu0  ;;  %1068 = vmatprep.subr.bf16.mxu1 %v492_v32 }
 0x113   : > { %v472_v36 = vpop.f32.mrb[13].mxu0 }
 0x114   : > { %v1057_v37 = vpop.f32.mrb[14].mxu0 }
 0x115   : > { %v494_v38 = vpack.c.bf16 %v1057_v37, %v1056_v35  ;;  %v475_v39 = vpop.f32.mrb[15].mxu0  ;;  %1069 = vmatpush3.bf16.msra.mxu1 %v492_v32 }
 0x116   : > { %v493_v40 = vpack.c.bf16 %v475_v39, %v472_v36 }
 0x118   : > { %1070 = vmatprep.subr.bf16.mxu1 %v493_v40 }
 0x119   : > { %1071 = vmatpush3.bf16.msra.mxu1 %v493_v40 }
 0x11a   : > { %1072 = vmatprep.subr.bf16.mxu1 %v494_v38 }
 0x11d   : > { %1073 = vmatpush3.bf16.msra.mxu1 %v494_v38 }
 0x120   : > { %1075 = vmatmul.mubr.bf16.vlgmr.msra.gmra.mrb[0].mxu1 %v1131_v41 }
 0x121   : > { %1078 = vmatprep.mubr.bf16.mxu1 %v1132_v42 }
 0x128   : > { %1079 = vmatmul.mubr.bf16.gmra.mrb[4].mxu1 %v1133_v43 }
 0x129   : > { %1082 = vmatprep.mubr.bf16.mxu1 %v1134_v44 }
 0x130   : > { %1083 = vmatmul.mubr.bf16.gmra.mrb[8].mxu1 %v1135_v45 }
 0x131   : > { %1086 = vmatprep.mubr.bf16.mxu1 %v1136_v46 }
 0x138   : > { %1087 = vmatmul.mubr.bf16.gmra.mrb[12].mxu1 %v1137_v47 }
 0x1f3   : > { %v1076_v49 = vpop.f32.mrb[0].mxu1 }
 0x1f4   : > { %v625_v50 = vadd.f32 %v1076_v49, %v901_v48  ;;  %v616_v51 = vpop.f32.mrb[1].mxu1 }
 0x1f5   : > { %v617_v52 = vadd.f32 %v901_v48, %v616_v51  ;;  %v1077_v53 = vpop.f32.mrb[2].mxu1 }
 0x1f6   : > { %v628_v54 = vadd.f32 %v1077_v53, %v901_v48  ;;  %v619_v55 = vpop.f32.mrb[3].mxu1  ;;  %v681_v57 = vmax.f32 %v625_v50, 0.0 }
 0x1f7   : > { %v620_v56 = vadd.f32 %v901_v48, %v619_v55  ;;  %v679_v59 = vmax.f32 %v617_v52, 0.0 }
 0x1f8   : > { %v682_v58 = vmax.f32 %v628_v54, 0.0 }
 0x1f9   : > { %v680_v60 = vmax.f32 %v620_v56, 0.0 }
 0x1fa   : > { %v955_v61 = vpack.c.bf16 %v682_v58, %v681_v57 }
 0x1fb   : > { %v950_v62 = vpack.c.bf16 %v680_v60, %v679_v59  ;;  %v1080_v63 = vpop.f32.mrb[4].mxu1 }
 0x1fc   : > { %987 = vst [vmem:[%s1266_s23 + $0x8] sm:$0xff] %v955_v61   ;;  %v641_v0 = vadd.f32 %v1080_v63, %v901_v48  ;;  %v632_v1 = vpop.f32.mrb[5].mxu1 }
 0x1fd   : > { %951 = vst [vmem:[%s1266_s23] sm:$0xff] %v950_v62   ;;  %v633_v2 = vadd.f32 %v901_v48, %v632_v1  ;;  %v1081_v3 = vpop.f32.mrb[6].mxu1 }
 0x1fe   : > { %v644_v4 = vadd.f32 %v1081_v3, %v901_v48  ;;  %v635_v5 = vpop.f32.mrb[7].mxu1  ;;  %v685_v7 = vmax.f32 %v641_v0, 0.0 }
 0x1ff   : > { %v636_v6 = vadd.f32 %v901_v48, %v635_v5  ;;  %v683_v9 = vmax.f32 %v633_v2, 0.0 }
 0x200   : > { %v686_v8 = vmax.f32 %v644_v4, 0.0 }
 0x201   : > { %v684_v10 = vmax.f32 %v636_v6, 0.0 }
 0x202   : > { %v965_v11 = vpack.c.bf16 %v686_v8, %v685_v7 }
 0x203   : > { %v960_v12 = vpack.c.bf16 %v684_v10, %v683_v9  ;;  %v1084_v13 = vpop.f32.mrb[8].mxu1 }
 0x204   : > { %989 = vst [vmem:[%s1266_s23 + $0x18] sm:$0xff] %v965_v11   ;;  %v657_v14 = vadd.f32 %v1084_v13, %v901_v48  ;;  %v648_v15 = vpop.f32.mrb[9].mxu1 }
 0x205   : > { %988 = vst [vmem:[%s1266_s23 + $0x10] sm:$0xff] %v960_v12   ;;  %v649_v16 = vadd.f32 %v901_v48, %v648_v15  ;;  %v1085_v17 = vpop.f32.mrb[10].mxu1 }
 0x206   : > { %v660_v18 = vadd.f32 %v1085_v17, %v901_v48  ;;  %v651_v19 = vpop.f32.mrb[11].mxu1  ;;  %v689_v21 = vmax.f32 %v657_v14, 0.0 }
 0x207   : > { %v652_v20 = vadd.f32 %v901_v48, %v651_v19  ;;  %v687_v23 = vmax.f32 %v649_v16, 0.0 }
 0x208   : > { %v690_v22 = vmax.f32 %v660_v18, 0.0 }
 0x209   : > { %v688_v24 = vmax.f32 %v652_v20, 0.0 }
 0x20a   : > { %v975_v25 = vpack.c.bf16 %v690_v22, %v689_v21 }
 0x20b   : > { %v970_v26 = vpack.c.bf16 %v688_v24, %v687_v23  ;;  %v1088_v27 = vpop.f32.mrb[12].mxu1 }
 0x20c   : > { %991 = vst [vmem:[%s1266_s23 + $0x28] sm:$0xff] %v975_v25   ;;  %v673_v28 = vadd.f32 %v1088_v27, %v901_v48  ;;  %v664_v29 = vpop.f32.mrb[13].mxu1 }
 0x20d   : > { %990 = vst [vmem:[%s1266_s23 + $0x20] sm:$0xff] %v970_v26   ;;  %v665_v30 = vadd.f32 %v901_v48, %v664_v29  ;;  %v1089_v31 = vpop.f32.mrb[14].mxu1 }
 0x20e   : > { %v676_v32 = vadd.f32 %v1089_v31, %v901_v48  ;;  %v667_v33 = vpop.f32.mrb[15].mxu1  ;;  %v693_v35 = vmax.f32 %v673_v28, 0.0 }
 0x20f   : > { %v668_v34 = vadd.f32 %v901_v48, %v667_v33  ;;  %v691_v37 = vmax.f32 %v665_v30, 0.0 }
 0x210   : > { %v694_v36 = vmax.f32 %v676_v32, 0.0 }
 0x211   : > { %v692_v38 = vmax.f32 %v668_v34, 0.0 }
 0x212   : > { %v985_v39 = vpack.c.bf16 %v694_v36, %v693_v35 }
 0x213   : > { %v980_v40 = vpack.c.bf16 %v692_v38, %v691_v37 }
 0x214   : > { %993 = vst [vmem:[%s1266_s23 + $0x38] sm:$0xff] %v985_v39  }
 0x215   : > { %992 = vst [vmem:[%s1266_s23 + $0x30] sm:$0xff] %v980_v40  }
 0x216 PF: > { %s14_s17 = sadd.s32 1, %s1160_s17   ;;  %s1290_s15 = smov %s1156_s16 }
 0x217   : > { %p11_p5 = scmp.ge.s32.totalorder %s14_s17, 4   ;;  %s1291_s16 = smov %s1293_s18 }
 0x219   :  { %13 = sbr.rel (!%p11_p5) target bundleno = 2 (0x2), region = 73 }

// kernel: cfdgcn_forward.11
= control target key start
LH: loop header
LB: loop body
LE: loop exit
PB: predicated region body
PF: predicated region fallthrough
CT: control target
= control target key end

     0   :  { %s1607_s21 = smov 0   ;;  %s1609_s22 = smov 0   ;;  %s1743_s0 = inlined_call_operand.vmem [shape: bf16[2,128,128], index: 0, kind: input, shape index: {}]   ;;  %s1744_s1 = inlined_call_operand.vmem [shape: bf16[2,128,128], index: 1, kind: input, shape index: {}]   ;;  %s1745_s2 = inlined_call_operand.vmem [shape: bf16[2,128,128], index: 2, kind: input, shape index: {}]   ;;  %s1746_s3 = inlined_call_operand.vmem [shape: bf16[128,128], index: 3, kind: input, shape index: {}]   ;;  %s1747_s4 = inlined_call_operand.vmem [shape: bf16[128,128], index: 4, kind: input, shape index: {}]   ;;  %s1748_s5 = inlined_call_operand.vmem [shape: f32[1,128], index: 5, kind: input, shape index: {}]   ;;  %s1749_s6 = inlined_call_operand.vmem [shape: bf16[2,128,128], index: 6, kind: output, shape index: {}]  }
   0x1   :  { %s1611_s23 = smov 0  }
   0x2 LB: > { %s28_s24 = sadd.s32 1, %s1566_s22  ;;  %p1189_p0 = scmp.ge.s32.totalorder %s1570_s23, 1  ;;  %s1570_s23 = sphi %s1611_s23, %s16_s23   ;;  %s1566_s22 = sphi %s1609_s22, %s1751_s22   ;;  %s1562_s21 = sphi %s1607_s21, %s1750_s21  }
   0x3   : > { %p30_p1 = scmp.ge.s32.totalorder %s28_s24, 2  ;;  %p253_p2 = scmp.lt.s32.totalorder %s1570_s23, 3 }
   0x5   : > { %s1753_s24 = smov (%p30_p1, %s28_s24), 0  ;;  %p254_p3 = pnand %p1189_p0, %p253_p2 }
   0x6   : > { %v1508_v0 = vld [vmem:[%s1747_s4] sm:$0xff] (!%p254_p3)   ;;  %p302_p4 = scmp.lt.s32.totalorder (!%p254_p3), %s1562_s21, 1  ;;  %v1509_v1 = vld [vmem:[%s1747_s4 + $0x8] sm:$0xff] (!%p254_p3)   ;;  %v1510_v2 = vld [vmem:[%s1747_s4 + $0x10] sm:$0xff] (!%p254_p3)  }
   0x7   : > { %257 = sbr.rel (%p254_p3) target bundleno = 566 (0x236), region = 44  ;;  %1372 = vmatprep.subr.bf16.mxu0 (!%p254_p3), %v1508_v0  ;;  %v1511_v3 = vld [vmem:[%s1747_s4 + $0x18] sm:$0xff] (!%p254_p3)   ;;  %v1512_v5 = vld [vmem:[%s1747_s4 + $0x20] sm:$0xff] (!%p254_p3)   ;;  %v1513_v6 = vld [vmem:[%s1747_s4 + $0x28] sm:$0xff] (!%p254_p3)  }
   0x8   : > { %1373 = vmatpush3.bf16.msra.mxu0 (!%p254_p3), %v1508_v0  ;;  %v1514_v7 = vld [vmem:[%s1747_s4 + $0x30] sm:$0xff] (!%p254_p3)   ;;  %v1515_v8 = vld [vmem:[%s1747_s4 + $0x38] sm:$0xff] (!%p254_p3)   ;;  %v1518_v9 = vld [vmem:[%s1746_s3] sm:$0xff] (!%p254_p3)  }
   0x9   : > { %1374 = vmatprep.subr.bf16.mxu0 (!%p254_p3), %v1509_v1  ;;  %v1519_v12 = vld [vmem:[%s1746_s3 + $0x8] sm:$0xff] (!%p254_p3)   ;;  %v1522_v13 = vld [vmem:[%s1746_s3 + $0x10] sm:$0xff] (!%p254_p3)   ;;  %v1523_v16 = vld [vmem:[%s1746_s3 + $0x18] sm:$0xff] (!%p254_p3)  }
   0xa   : > { %v1526_v17 = vld [vmem:[%s1746_s3 + $0x20] sm:$0xff] (!%p254_p3)   ;;  %v1527_v20 = vld [vmem:[%s1746_s3 + $0x28] sm:$0xff] (!%p254_p3)   ;;  %v1530_v21 = vld [vmem:[%s1746_s3 + $0x30] sm:$0xff] (!%p254_p3)  }
   0xb   : > { %v1531_v24 = vld [vmem:[%s1746_s3 + $0x38] sm:$0xff] (!%p254_p3)   ;;  %v1230_v0 = vld [vmem:[%s1748_s5] ss:$0 sm:$0xff] (!%p254_p3) }
   0xc   : > { %1375 = vmatpush3.bf16.msra.mxu0 (!%p254_p3), %v1509_v1 }
   0xd   : > { %1376 = vmatprep.subr.bf16.mxu0 (!%p254_p3), %v1510_v2 }
   0xe   : > { %s1755_s21 = smov (!%p302_p4, %s1562_s21), 1 }
   0xf   : > { %s1634_s7 = sshll.u32 %s1755_s21, 6 }
  0x10   : > { %s1640_s10 = scalar_lea.vmem %s1745_s2, %s1634_s7  ;;  %1377 = vmatpush3.bf16.msra.mxu0 %v1510_v2  ;;  %s1659_s21 = scalar_lea.vmem %s1744_s1, %s1634_s7 }
  0x11   : > { %v1516_v4 = vld [vmem:[%s1640_s10] sm:$0xff]   ;;  %1378 = vmatprep.subr.bf16.mxu0 %v1511_v3  ;;  %v1517_v10 = vld [vmem:[%s1640_s10 + $0x8] sm:$0xff]   ;;  %v1520_v11 = vld [vmem:[%s1640_s10 + $0x10] sm:$0xff]   ;;  %s1707_s26 = scalar_lea.vmem %s1743_s0, %s1634_s7  ;;  %s1724_s30 = scalar_lea.vmem %s1749_s6, %s1634_s7 }
  0x12   : > { %1388 = vmatprep.mubr.bf16.mxu0 %v1516_v4  ;;  %v1521_v14 = vld [vmem:[%s1640_s10 + $0x18] sm:$0xff]   ;;  %v1524_v15 = vld [vmem:[%s1640_s10 + $0x20] sm:$0xff]   ;;  %v1525_v18 = vld [vmem:[%s1640_s10 + $0x28] sm:$0xff]  }
  0x13   : > { %v1528_v19 = vld [vmem:[%s1640_s10 + $0x30] sm:$0xff]   ;;  %v1529_v22 = vld [vmem:[%s1640_s10 + $0x38] sm:$0xff]   ;;  %v1532_v23 = vld [vmem:[%s1659_s21] sm:$0xff]  }
  0x14   : > { %1379 = vmatpush3.bf16.msra.mxu0 %v1511_v3  ;;  %v1533_v25 = vld [vmem:[%s1659_s21 + $0x8] sm:$0xff]   ;;  %v1534_v26 = vld [vmem:[%s1659_s21 + $0x10] sm:$0xff]   ;;  %v1535_v27 = vld [vmem:[%s1659_s21 + $0x18] sm:$0xff]  }
  0x15   : > { %1380 = vmatprep.subr.bf16.mxu0 %v1512_v5  ;;  %v1536_v28 = vld [vmem:[%s1659_s21 + $0x20] sm:$0xff]   ;;  %v1537_v29 = vld [vmem:[%s1659_s21 + $0x28] sm:$0xff]   ;;  %v1538_v30 = vld [vmem:[%s1659_s21 + $0x30] sm:$0xff]  }
  0x16   : > { %v1539_v31 = vld [vmem:[%s1659_s21 + $0x38] sm:$0xff]   ;;  %v1540_v32 = vld [vmem:[%s1707_s26] sm:$0xff]   ;;  %v1541_v57 = vld [vmem:[%s1707_s26 + $0x8] sm:$0xff]  }
  0x17   : > { %1452 = vmatprep.mubr.bf16.mxu1 %v1540_v32  ;;  %v1542_v58 = vld [vmem:[%s1707_s26 + $0x10] sm:$0xff]   ;;  %v1543_v59 = vld [vmem:[%s1707_s26 + $0x18] sm:$0xff]   ;;  %v1544_v60 = vld [vmem:[%s1707_s26 + $0x20] sm:$0xff]  }
  0x18   : > { %1381 = vmatpush3.bf16.msra.mxu0 %v1512_v5  ;;  %v1545_v61 = vld [vmem:[%s1707_s26 + $0x28] sm:$0xff]   ;;  %v1546_v62 = vld [vmem:[%s1707_s26 + $0x30] sm:$0xff]   ;;  %v1547_v63 = vld [vmem:[%s1707_s26 + $0x38] sm:$0xff]  }
  0x19   : > { %1382 = vmatprep.subr.bf16.mxu0 %v1513_v6 }
  0x1c   : > { %1383 = vmatpush3.bf16.msra.mxu0 %v1513_v6 }
  0x1d   : > { %1384 = vmatprep.subr.bf16.mxu0 %v1514_v7 }
  0x20   : > { %1385 = vmatpush3.bf16.msra.mxu0 %v1514_v7 }
  0x21   : > { %1386 = vmatprep.subr.bf16.mxu0 %v1515_v8 }
  0x24   : > { %1387 = vmatpush3.bf16.msra.mxu0 %v1515_v8 }
  0x25   : > { %1404 = vmatprep.subr.bf16.mxu0 %v1518_v9 }
  0x27   : > { %1389 = vmatmul.mubr.bf16.vlgmr.msra.gmra.mrb[0].mxu0 %v1517_v10 }
  0x28   : > { %1405 = vmatpush3.bf16.msra.mxu0 %v1518_v9  ;;  %1392 = vmatprep.mubr.bf16.mxu0 %v1520_v11 }
  0x29   : > { %1406 = vmatprep.subr.bf16.mxu0 %v1519_v12 }
  0x2c   : > { %1407 = vmatpush3.bf16.msra.mxu0 %v1519_v12 }
  0x2d   : > { %1408 = vmatprep.subr.bf16.mxu0 %v1522_v13 }
  0x2f   : > { %1393 = vmatmul.mubr.bf16.gmra.mrb[4].mxu0 %v1521_v14 }
  0x30   : > { %1409 = vmatpush3.bf16.msra.mxu0 %v1522_v13  ;;  %1396 = vmatprep.mubr.bf16.mxu0 %v1524_v15 }
  0x31   : > { %1410 = vmatprep.subr.bf16.mxu0 %v1523_v16 }
  0x34   : > { %1411 = vmatpush3.bf16.msra.mxu0 %v1523_v16 }
  0x35   : > { %1412 = vmatprep.subr.bf16.mxu0 %v1526_v17 }
  0x37   : > { %1397 = vmatmul.mubr.bf16.gmra.mrb[8].mxu0 %v1525_v18 }
  0x38   : > { %1413 = vmatpush3.bf16.msra.mxu0 %v1526_v17  ;;  %1400 = vmatprep.mubr.bf16.mxu0 %v1528_v19 }
  0x39   : > { %1414 = vmatprep.subr.bf16.mxu0 %v1527_v20 }
  0x3c   : > { %1415 = vmatpush3.bf16.msra.mxu0 %v1527_v20 }
  0x3d   : > { %1416 = vmatprep.subr.bf16.mxu0 %v1530_v21 }
  0x3f   : > { %1401 = vmatmul.mubr.bf16.gmra.mrb[12].mxu0 %v1529_v22 }
  0x40   : > { %1417 = vmatpush3.bf16.msra.mxu0 %v1530_v21  ;;  %1420 = vmatprep.mubr.bf16.mxu0 %v1532_v23 }
  0x41   : > { %1418 = vmatprep.subr.bf16.mxu0 %v1531_v24 }
  0x44   : > { %1419 = vmatpush3.bf16.msra.mxu0 %v1531_v24 }
  0x47   : > { %1421 = vmatmul.mubr.bf16.vlgmr.msra.gmra.mrb[0].mxu0 %v1533_v25 }
  0x48   : > { %1424 = vmatprep.mubr.bf16.mxu0 %v1534_v26 }
  0x4f   : > { %1425 = vmatmul.mubr.bf16.gmra.mrb[4].mxu0 %v1535_v27 }
  0x50   : > { %1428 = vmatprep.mubr.bf16.mxu0 %v1536_v28 }
  0x57   : > { %1429 = vmatmul.mubr.bf16.gmra.mrb[8].mxu0 %v1537_v29 }
  0x58   : > { %1432 = vmatprep.mubr.bf16.mxu0 %v1538_v30 }
  0x5f   : > { %1433 = vmatmul.mubr.bf16.gmra.mrb[12].mxu0 %v1539_v31 }
 0x11a   : > { %v1422_v33 = vpop.f32.mrb[0].mxu0 }
 0x11b   : > { %v723_v34 = vpop.f32.mrb[1].mxu0 }
 0x11c   : > { %v1423_v35 = vpop.f32.mrb[2].mxu0 }
 0x11d   : > { %v787_v36 = vpack.c.bf16 %v1423_v35, %v1422_v33  ;;  %v726_v37 = vpop.f32.mrb[3].mxu0 }
 0x11e   : > { %v786_v38 = vpack.c.bf16 %v726_v37, %v723_v34 }
 0x120   : > { %1436 = vmatprep.subr.bf16.mxu1 %v786_v38 }
 0x121   : > { %1437 = vmatpush3.bf16.msra.mxu1 %v786_v38 }
 0x122   : > { %v1426_v39 = vpop.f32.mrb[4].mxu0  ;;  %1438 = vmatprep.subr.bf16.mxu1 %v787_v36 }
 0x123   : > { %v739_v40 = vpop.f32.mrb[5].mxu0 }
 0x124   : > { %v1427_v41 = vpop.f32.mrb[6].mxu0 }
 0x125   : > { %v789_v42 = vpack.c.bf16 %v1427_v41, %v1426_v39  ;;  %v742_v43 = vpop.f32.mrb[7].mxu0  ;;  %1439 = vmatpush3.bf16.msra.mxu1 %v787_v36 }
 0x126   : > { %v788_v44 = vpack.c.bf16 %v742_v43, %v739_v40 }
 0x128   : > { %1440 = vmatprep.subr.bf16.mxu1 %v788_v44 }
 0x129   : > { %1441 = vmatpush3.bf16.msra.mxu1 %v788_v44 }
 0x12a   : > { %v1430_v45 = vpop.f32.mrb[8].mxu0  ;;  %1442 = vmatprep.subr.bf16.mxu1 %v789_v42 }
 0x12b   : > { %v755_v46 = vpop.f32.mrb[9].mxu0 }
 0x12c   : > { %v1431_v47 = vpop.f32.mrb[10].mxu0 }
 0x12d   : > { %v791_v48 = vpack.c.bf16 %v1431_v47, %v1430_v45  ;;  %v758_v49 = vpop.f32.mrb[11].mxu0  ;;  %1443 = vmatpush3.bf16.msra.mxu1 %v789_v42 }
 0x12e   : > { %v790_v50 = vpack.c.bf16 %v758_v49, %v755_v46 }
 0x130   : > { %1444 = vmatprep.subr.bf16.mxu1 %v790_v50 }
 0x131   : > { %1445 = vmatpush3.bf16.msra.mxu1 %v790_v50 }
 0x132   : > { %v1434_v51 = vpop.f32.mrb[12].mxu0  ;;  %1446 = vmatprep.subr.bf16.mxu1 %v791_v48 }
 0x133   : > { %v771_v52 = vpop.f32.mrb[13].mxu0 }
 0x134   : > { %v1435_v53 = vpop.f32.mrb[14].mxu0 }
 0x135   : > { %v793_v54 = vpack.c.bf16 %v1435_v53, %v1434_v51  ;;  %v774_v55 = vpop.f32.mrb[15].mxu0  ;;  %1447 = vmatpush3.bf16.msra.mxu1 %v791_v48 }
 0x136   : > { %v792_v56 = vpack.c.bf16 %v774_v55, %v771_v52 }
 0x138   : > { %1448 = vmatprep.subr.bf16.mxu1 %v792_v56 }
 0x139   : > { %1449 = vmatpush3.bf16.msra.mxu1 %v792_v56 }
 0x13a   : > { %1450 = vmatprep.subr.bf16.mxu1 %v793_v54 }
 0x13d   : > { %1451 = vmatpush3.bf16.msra.mxu1 %v793_v54 }
 0x140   : > { %1453 = vmatmul.mubr.bf16.vlgmr.msra.gmra.mrb[0].mxu1 %v1541_v57 }
 0x141   : > { %1456 = vmatprep.mubr.bf16.mxu1 %v1542_v58 }
 0x148   : > { %1457 = vmatmul.mubr.bf16.gmra.mrb[4].mxu1 %v1543_v59 }
 0x149   : > { %1460 = vmatprep.mubr.bf16.mxu1 %v1544_v60 }
 0x150   : > { %1461 = vmatmul.mubr.bf16.gmra.mrb[8].mxu1 %v1545_v61 }
 0x151   : > { %1464 = vmatprep.mubr.bf16.mxu1 %v1546_v62 }
 0x158   : > { %1465 = vmatmul.mubr.bf16.gmra.mrb[12].mxu1 %v1547_v63 }
 0x213   : > { %v1454_v1 = vpop.f32.mrb[0].mxu1 }
 0x214   : > { %v924_v2 = vadd.f32 %v1454_v1, %v1230_v0  ;;  %v915_v3 = vpop.f32.mrb[1].mxu1 }
 0x215   : > { %v916_v4 = vadd.f32 %v1230_v0, %v915_v3  ;;  %v1455_v5 = vpop.f32.mrb[2].mxu1 }
 0x216   : > { %v927_v6 = vadd.f32 %v1455_v5, %v1230_v0  ;;  %v918_v7 = vpop.f32.mrb[3].mxu1  ;;  %v980_v9 = vmax.f32 %v924_v2, 0.0 }
 0x217   : > { %v919_v8 = vadd.f32 %v1230_v0, %v918_v7  ;;  %v978_v11 = vmax.f32 %v916_v4, 0.0 }
 0x218   : > { %v981_v10 = vmax.f32 %v927_v6, 0.0 }
 0x219   : > { %v979_v12 = vmax.f32 %v919_v8, 0.0 }
 0x21a   : > { %v1285_v13 = vpack.c.bf16 %v981_v10, %v980_v9 }
 0x21b   : > { %v1280_v14 = vpack.c.bf16 %v979_v12, %v978_v11  ;;  %v1458_v15 = vpop.f32.mrb[4].mxu1 }
 0x21c   : > { %1317 = vst [vmem:[%s1724_s30 + $0x8] sm:$0xff] %v1285_v13   ;;  %v940_v16 = vadd.f32 %v1458_v15, %v1230_v0  ;;  %v931_v17 = vpop.f32.mrb[5].mxu1 }
 0x21d   : > { %1281 = vst [vmem:[%s1724_s30] sm:$0xff] %v1280_v14   ;;  %v932_v18 = vadd.f32 %v1230_v0, %v931_v17  ;;  %v1459_v19 = vpop.f32.mrb[6].mxu1 }
 0x21e   : > { %v943_v20 = vadd.f32 %v1459_v19, %v1230_v0  ;;  %v934_v21 = vpop.f32.mrb[7].mxu1  ;;  %v984_v23 = vmax.f32 %v940_v16, 0.0 }
 0x21f   : > { %v935_v22 = vadd.f32 %v1230_v0, %v934_v21  ;;  %v982_v25 = vmax.f32 %v932_v18, 0.0 }
 0x220   : > { %v985_v24 = vmax.f32 %v943_v20, 0.0 }
 0x221   : > { %v983_v26 = vmax.f32 %v935_v22, 0.0 }
 0x222   : > { %v1295_v27 = vpack.c.bf16 %v985_v24, %v984_v23 }
 0x223   : > { %v1290_v28 = vpack.c.bf16 %v983_v26, %v982_v25  ;;  %v1462_v29 = vpop.f32.mrb[8].mxu1 }
 0x224   : > { %1319 = vst [vmem:[%s1724_s30 + $0x18] sm:$0xff] %v1295_v27   ;;  %v956_v30 = vadd.f32 %v1462_v29, %v1230_v0  ;;  %v947_v31 = vpop.f32.mrb[9].mxu1 }
 0x225   : > { %1318 = vst [vmem:[%s1724_s30 + $0x10] sm:$0xff] %v1290_v28   ;;  %v948_v32 = vadd.f32 %v1230_v0, %v947_v31  ;;  %v1463_v33 = vpop.f32.mrb[10].mxu1 }
 0x226   : > { %v959_v34 = vadd.f32 %v1463_v33, %v1230_v0  ;;  %v950_v35 = vpop.f32.mrb[11].mxu1  ;;  %v988_v37 = vmax.f32 %v956_v30, 0.0 }
 0x227   : > { %v951_v36 = vadd.f32 %v1230_v0, %v950_v35  ;;  %v986_v39 = vmax.f32 %v948_v32, 0.0 }
 0x228   : > { %v989_v38 = vmax.f32 %v959_v34, 0.0 }
 0x229   : > { %v987_v40 = vmax.f32 %v951_v36, 0.0 }
 0x22a   : > { %v1305_v41 = vpack.c.bf16 %v989_v38, %v988_v37 }
 0x22b   : > { %v1300_v42 = vpack.c.bf16 %v987_v40, %v986_v39  ;;  %v1466_v43 = vpop.f32.mrb[12].mxu1 }
 0x22c   : > { %1321 = vst [vmem:[%s1724_s30 + $0x28] sm:$0xff] %v1305_v41   ;;  %v972_v44 = vadd.f32 %v1466_v43, %v1230_v0  ;;  %v963_v45 = vpop.f32.mrb[13].mxu1 }
 0x22d   : > { %1320 = vst [vmem:[%s1724_s30 + $0x20] sm:$0xff] %v1300_v42   ;;  %v964_v46 = vadd.f32 %v1230_v0, %v963_v45  ;;  %v1467_v47 = vpop.f32.mrb[14].mxu1 }
 0x22e   : > { %v975_v48 = vadd.f32 %v1467_v47, %v1230_v0  ;;  %v966_v49 = vpop.f32.mrb[15].mxu1  ;;  %v992_v51 = vmax.f32 %v972_v44, 0.0 }
 0x22f   : > { %v967_v50 = vadd.f32 %v1230_v0, %v966_v49  ;;  %v990_v53 = vmax.f32 %v964_v46, 0.0 }
 0x230   : > { %v993_v52 = vmax.f32 %v975_v48, 0.0 }
 0x231   : > { %v991_v54 = vmax.f32 %v967_v50, 0.0 }
 0x232   : > { %v1315_v55 = vpack.c.bf16 %v993_v52, %v992_v51 }
 0x233   : > { %v1310_v56 = vpack.c.bf16 %v991_v54, %v990_v53 }
 0x234   : > { %1323 = vst [vmem:[%s1724_s30 + $0x38] sm:$0xff] %v1315_v55  }
 0x235   : > { %1322 = vst [vmem:[%s1724_s30 + $0x30] sm:$0xff] %v1310_v56  }
 0x236 PF: > { %s16_s23 = sadd.s32 1, %s1570_s23   ;;  %s1750_s21 = smov %s1566_s22 }
 0x237   : > { %p13_p5 = scmp.ge.s32.totalorder %s16_s23, 4   ;;  %s1751_s22 = smov %s1753_s24 }
 0x239   :  { %15 = sbr.rel (!%p13_p5) target bundleno = 2 (0x2), region = 84 }

// kernel: cfdgcn_forward.13
= control target key start
LH: loop header
LB: loop body
LE: loop exit
PB: predicated region body
PF: predicated region fallthrough
CT: control target
= control target key end

     0   :  { %s1028_s15 = smov 0   ;;  %s1030_s16 = smov 0   ;;  %s1137_s0 = inlined_call_operand.vmem [shape: bf16[2,128,128], index: 0, kind: input, shape index: {}]   ;;  %s1138_s1 = inlined_call_operand.vmem [shape: bf16[2,128,128], index: 1, kind: input, shape index: {}]   ;;  %s1139_s2 = inlined_call_operand.vmem [shape: bf16[128,128], index: 2, kind: input, shape index: {}]   ;;  %s1140_s3 = inlined_call_operand.vmem [shape: f32[1,128], index: 3, kind: input, shape index: {}]   ;;  %s1141_s4 = inlined_call_operand.vmem [shape: f32[2,128,128], index: 4, kind: output, shape index: {}]  }
   0x1   :  { %s1032_s17 = smov 0  }
   0x2 LB: > { %s26_s18 = sadd.s32 1, %s997_s16  ;;  %p798_p0 = scmp.ge.s32.totalorder %s1001_s17, 1  ;;  %s1001_s17 = sphi %s1032_s17, %s14_s17   ;;  %s997_s16 = sphi %s1030_s16, %s1143_s16   ;;  %s993_s15 = sphi %s1028_s15, %s1142_s15  }
   0x3   : > { %p28_p1 = scmp.ge.s32.totalorder %s26_s18, 2  ;;  %p193_p2 = scmp.lt.s32.totalorder %s1001_s17, 3 }
   0x5   : > { %s1145_s18 = smov (%p28_p1, %s26_s18), 0  ;;  %p194_p3 = pnand %p798_p0, %p193_p2 }
   0x6   : > { %v955_v0 = vld [vmem:[%s1139_s2] sm:$0xff] (!%p194_p3)   ;;  %p233_p4 = scmp.lt.s32.totalorder (!%p194_p3), %s993_s15, 1  ;;  %v956_v1 = vld [vmem:[%s1139_s2 + $0x8] sm:$0xff] (!%p194_p3)   ;;  %v957_v2 = vld [vmem:[%s1139_s2 + $0x10] sm:$0xff] (!%p194_p3)  }
   0x7   : > { %197 = sbr.rel (%p194_p3) target bundleno = 530 (0x212), region = 36  ;;  %867 = vmatprep.subr.bf16.mxu0 (!%p194_p3), %v955_v0  ;;  %v958_v3 = vld [vmem:[%s1139_s2 + $0x18] sm:$0xff] (!%p194_p3)   ;;  %v959_v5 = vld [vmem:[%s1139_s2 + $0x20] sm:$0xff] (!%p194_p3)   ;;  %v960_v6 = vld [vmem:[%s1139_s2 + $0x28] sm:$0xff] (!%p194_p3)  }
   0x8   : > { %868 = vmatpush3.bf16.msra.mxu0 (!%p194_p3), %v955_v0  ;;  %v961_v7 = vld [vmem:[%s1139_s2 + $0x30] sm:$0xff] (!%p194_p3)   ;;  %v962_v8 = vld [vmem:[%s1139_s2 + $0x38] sm:$0xff] (!%p194_p3)   ;;  %v821_v48 = vld [vmem:[%s1140_s3] ss:$0 sm:$0xff] (!%p194_p3) }
   0x9   : > { %869 = vmatprep.subr.bf16.mxu0 (!%p194_p3), %v956_v1 }
   0xc   : > { %870 = vmatpush3.bf16.msra.mxu0 (!%p194_p3), %v956_v1 }
   0xd   : > { %871 = vmatprep.subr.bf16.mxu0 (!%p194_p3), %v957_v2 }
   0xe   : > { %s1147_s15 = smov (!%p233_p4, %s993_s15), 1 }
   0xf   : > { %s832_s25 = sshll.u32 %s1147_s15, 6  ;;  %s834_s20 = sshll.u32 %s1147_s15, 7 }
  0x10   : > { %s1063_s28 = scalar_lea.vmem %s1138_s1, %s832_s25  ;;  %872 = vmatpush3.bf16.msra.mxu0 %v957_v2  ;;  %s1093_s19 = scalar_lea.vmem %s1137_s0, %s832_s25 }
  0x11   : > { %v963_v4 = vld [vmem:[%s1063_s28] sm:$0xff]   ;;  %873 = vmatprep.subr.bf16.mxu0 %v958_v3  ;;  %v964_v9 = vld [vmem:[%s1063_s28 + $0x8] sm:$0xff]   ;;  %v965_v10 = vld [vmem:[%s1063_s28 + $0x10] sm:$0xff]   ;;  %s1110_s25 = scalar_lea.vmem %s1141_s4, %s834_s20 }
  0x12   : > { %883 = vmatprep.mubr.bf16.mxu0 %v963_v4  ;;  %v966_v11 = vld [vmem:[%s1063_s28 + $0x18] sm:$0xff]   ;;  %v967_v12 = vld [vmem:[%s1063_s28 + $0x20] sm:$0xff]   ;;  %v968_v13 = vld [vmem:[%s1063_s28 + $0x28] sm:$0xff]  }
  0x13   : > { %v969_v14 = vld [vmem:[%s1063_s28 + $0x30] sm:$0xff]   ;;  %v970_v15 = vld [vmem:[%s1063_s28 + $0x38] sm:$0xff]   ;;  %v971_v16 = vld [vmem:[%s1093_s19] sm:$0xff]  }
  0x14   : > { %874 = vmatpush3.bf16.msra.mxu0 %v958_v3  ;;  %915 = vmatprep.mubr.bf16.mxu1 %v971_v16  ;;  %v972_v41 = vld [vmem:[%s1093_s19 + $0x8] sm:$0xff]   ;;  %v973_v42 = vld [vmem:[%s1093_s19 + $0x10] sm:$0xff]   ;;  %v974_v43 = vld [vmem:[%s1093_s19 + $0x18] sm:$0xff]  }
  0x15   : > { %875 = vmatprep.subr.bf16.mxu0 %v959_v5  ;;  %v975_v44 = vld [vmem:[%s1093_s19 + $0x20] sm:$0xff]   ;;  %v976_v45 = vld [vmem:[%s1093_s19 + $0x28] sm:$0xff]   ;;  %v977_v46 = vld [vmem:[%s1093_s19 + $0x30] sm:$0xff]  }
  0x16   : > { %v978_v47 = vld [vmem:[%s1093_s19 + $0x38] sm:$0xff]  }
  0x18   : > { %876 = vmatpush3.bf16.msra.mxu0 %v959_v5 }
  0x19   : > { %877 = vmatprep.subr.bf16.mxu0 %v960_v6 }
  0x1c   : > { %878 = vmatpush3.bf16.msra.mxu0 %v960_v6 }
  0x1d   : > { %879 = vmatprep.subr.bf16.mxu0 %v961_v7 }
  0x20   : > { %880 = vmatpush3.bf16.msra.mxu0 %v961_v7 }
  0x21   : > { %881 = vmatprep.subr.bf16.mxu0 %v962_v8 }
  0x24   : > { %882 = vmatpush3.bf16.msra.mxu0 %v962_v8 }
  0x27   : > { %884 = vmatmul.mubr.bf16.vlgmr.msra.gmra.mrb[0].mxu0 %v964_v9 }
  0x28   : > { %887 = vmatprep.mubr.bf16.mxu0 %v965_v10 }
  0x2f   : > { %888 = vmatmul.mubr.bf16.gmra.mrb[4].mxu0 %v966_v11 }
  0x30   : > { %891 = vmatprep.mubr.bf16.mxu0 %v967_v12 }
  0x37   : > { %892 = vmatmul.mubr.bf16.gmra.mrb[8].mxu0 %v968_v13 }
  0x38   : > { %895 = vmatprep.mubr.bf16.mxu0 %v969_v14 }
  0x3f   : > { %896 = vmatmul.mubr.bf16.gmra.mrb[12].mxu0 %v970_v15 }
  0xfa   : > { %v885_v17 = vpop.f32.mrb[0].mxu0 }
  0xfb   : > { %v424_v18 = vpop.f32.mrb[1].mxu0 }
  0xfc   : > { %v886_v19 = vpop.f32.mrb[2].mxu0 }
  0xfd   : > { %v488_v20 = vpack.c.bf16 %v886_v19, %v885_v17  ;;  %v427_v21 = vpop.f32.mrb[3].mxu0 }
  0xfe   : > { %v487_v22 = vpack.c.bf16 %v427_v21, %v424_v18 }
 0x100   : > { %899 = vmatprep.subr.bf16.mxu1 %v487_v22 }
 0x101   : > { %900 = vmatpush3.bf16.msra.mxu1 %v487_v22 }
 0x102   : > { %v889_v23 = vpop.f32.mrb[4].mxu0  ;;  %901 = vmatprep.subr.bf16.mxu1 %v488_v20 }
 0x103   : > { %v440_v24 = vpop.f32.mrb[5].mxu0 }
 0x104   : > { %v890_v25 = vpop.f32.mrb[6].mxu0 }
 0x105   : > { %v490_v26 = vpack.c.bf16 %v890_v25, %v889_v23  ;;  %v443_v27 = vpop.f32.mrb[7].mxu0  ;;  %902 = vmatpush3.bf16.msra.mxu1 %v488_v20 }
 0x106   : > { %v489_v28 = vpack.c.bf16 %v443_v27, %v440_v24 }
 0x108   : > { %903 = vmatprep.subr.bf16.mxu1 %v489_v28 }
 0x109   : > { %904 = vmatpush3.bf16.msra.mxu1 %v489_v28 }
 0x10a   : > { %v893_v29 = vpop.f32.mrb[8].mxu0  ;;  %905 = vmatprep.subr.bf16.mxu1 %v490_v26 }
 0x10b   : > { %v456_v30 = vpop.f32.mrb[9].mxu0 }
 0x10c   : > { %v894_v31 = vpop.f32.mrb[10].mxu0 }
 0x10d   : > { %v492_v32 = vpack.c.bf16 %v894_v31, %v893_v29  ;;  %v459_v33 = vpop.f32.mrb[11].mxu0  ;;  %906 = vmatpush3.bf16.msra.mxu1 %v490_v26 }
 0x10e   : > { %v491_v34 = vpack.c.bf16 %v459_v33, %v456_v30 }
 0x110   : > { %907 = vmatprep.subr.bf16.mxu1 %v491_v34 }
 0x111   : > { %908 = vmatpush3.bf16.msra.mxu1 %v491_v34 }
 0x112   : > { %v897_v35 = vpop.f32.mrb[12].mxu0  ;;  %909 = vmatprep.subr.bf16.mxu1 %v492_v32 }
 0x113   : > { %v472_v36 = vpop.f32.mrb[13].mxu0 }
 0x114   : > { %v898_v37 = vpop.f32.mrb[14].mxu0 }
 0x115   : > { %v494_v38 = vpack.c.bf16 %v898_v37, %v897_v35  ;;  %v475_v39 = vpop.f32.mrb[15].mxu0  ;;  %910 = vmatpush3.bf16.msra.mxu1 %v492_v32 }
 0x116   : > { %v493_v40 = vpack.c.bf16 %v475_v39, %v472_v36 }
 0x118   : > { %911 = vmatprep.subr.bf16.mxu1 %v493_v40 }
 0x119   : > { %912 = vmatpush3.bf16.msra.mxu1 %v493_v40 }
 0x11a   : > { %913 = vmatprep.subr.bf16.mxu1 %v494_v38 }
 0x11d   : > { %914 = vmatpush3.bf16.msra.mxu1 %v494_v38 }
 0x120   : > { %916 = vmatmul.mubr.bf16.vlgmr.msra.gmra.mrb[0].mxu1 %v972_v41 }
 0x121   : > { %919 = vmatprep.mubr.bf16.mxu1 %v973_v42 }
 0x128   : > { %920 = vmatmul.mubr.bf16.gmra.mrb[4].mxu1 %v974_v43 }
 0x129   : > { %923 = vmatprep.mubr.bf16.mxu1 %v975_v44 }
 0x130   : > { %924 = vmatmul.mubr.bf16.gmra.mrb[8].mxu1 %v976_v45 }
 0x131   : > { %927 = vmatprep.mubr.bf16.mxu1 %v977_v46 }
 0x138   : > { %928 = vmatmul.mubr.bf16.gmra.mrb[12].mxu1 %v978_v47 }
 0x1f3   : > { %v917_v49 = vpop.f32.mrb[0].mxu1 }
 0x1f4   : > { %v625_v50 = vadd.f32 %v917_v49, %v821_v48  ;;  %v616_v51 = vpop.f32.mrb[1].mxu1 }
 0x1f5   : > { %v617_v52 = vadd.f32 %v821_v48, %v616_v51  ;;  %v918_v53 = vpop.f32.mrb[2].mxu1 }
 0x1f6   : > { %681 = vst [vmem:[%s1110_s25 + $0x10] sm:$0xff] %v625_v50  ;;  %v628_v54 = vadd.f32 %v918_v53, %v821_v48  ;;  %v619_v55 = vpop.f32.mrb[3].mxu1 }
 0x1f7   : > { %679 = vst [vmem:[%s1110_s25] sm:$0xff] %v617_v52  ;;  %v620_v56 = vadd.f32 %v821_v48, %v619_v55 }
 0x1f8   : > { %682 = vst [vmem:[%s1110_s25 + $0x18] sm:$0xff] %v628_v54 }
 0x1f9   : > { %680 = vst [vmem:[%s1110_s25 + $0x8] sm:$0xff] %v620_v56 }
 0x1fb   : > { %v921_v57 = vpop.f32.mrb[4].mxu1 }
 0x1fc   : > { %v641_v58 = vadd.f32 %v921_v57, %v821_v48  ;;  %v632_v59 = vpop.f32.mrb[5].mxu1 }
 0x1fd   : > { %v633_v60 = vadd.f32 %v821_v48, %v632_v59  ;;  %v922_v61 = vpop.f32.mrb[6].mxu1 }
 0x1fe   : > { %685 = vst [vmem:[%s1110_s25 + $0x30] sm:$0xff] %v641_v58  ;;  %v644_v62 = vadd.f32 %v922_v61, %v821_v48  ;;  %v635_v63 = vpop.f32.mrb[7].mxu1 }
 0x1ff   : > { %683 = vst [vmem:[%s1110_s25 + $0x20] sm:$0xff] %v633_v60  ;;  %v636_v0 = vadd.f32 %v821_v48, %v635_v63 }
 0x200   : > { %686 = vst [vmem:[%s1110_s25 + $0x38] sm:$0xff] %v644_v62 }
 0x201   : > { %684 = vst [vmem:[%s1110_s25 + $0x28] sm:$0xff] %v636_v0 }
 0x203   : > { %v925_v1 = vpop.f32.mrb[8].mxu1 }
 0x204   : > { %v657_v2 = vadd.f32 %v925_v1, %v821_v48  ;;  %v648_v3 = vpop.f32.mrb[9].mxu1 }
 0x205   : > { %v649_v4 = vadd.f32 %v821_v48, %v648_v3  ;;  %v926_v5 = vpop.f32.mrb[10].mxu1 }
 0x206   : > { %689 = vst [vmem:[%s1110_s25 + $0x50] sm:$0xff] %v657_v2  ;;  %v660_v6 = vadd.f32 %v926_v5, %v821_v48  ;;  %v651_v7 = vpop.f32.mrb[11].mxu1 }
 0x207   : > { %687 = vst [vmem:[%s1110_s25 + $0x40] sm:$0xff] %v649_v4  ;;  %v652_v8 = vadd.f32 %v821_v48, %v651_v7 }
 0x208   : > { %690 = vst [vmem:[%s1110_s25 + $0x58] sm:$0xff] %v660_v6 }
 0x209   : > { %688 = vst [vmem:[%s1110_s25 + $0x48] sm:$0xff] %v652_v8 }
 0x20b   : > { %v929_v9 = vpop.f32.mrb[12].mxu1 }
 0x20c   : > { %v673_v10 = vadd.f32 %v929_v9, %v821_v48  ;;  %v664_v11 = vpop.f32.mrb[13].mxu1 }
 0x20d   : > { %v665_v12 = vadd.f32 %v821_v48, %v664_v11  ;;  %v930_v13 = vpop.f32.mrb[14].mxu1 }
 0x20e   : > { %693 = vst [vmem:[%s1110_s25 + $0x70] sm:$0xff] %v673_v10  ;;  %v676_v14 = vadd.f32 %v930_v13, %v821_v48  ;;  %v667_v15 = vpop.f32.mrb[15].mxu1 }
 0x20f   : > { %691 = vst [vmem:[%s1110_s25 + $0x60] sm:$0xff] %v665_v12  ;;  %v668_v16 = vadd.f32 %v821_v48, %v667_v15 }
 0x210   : > { %694 = vst [vmem:[%s1110_s25 + $0x78] sm:$0xff] %v676_v14 }
 0x211   : > { %692 = vst [vmem:[%s1110_s25 + $0x68] sm:$0xff] %v668_v16 }
 0x212 PF: > { %s14_s17 = sadd.s32 1, %s1001_s17   ;;  %s1142_s15 = smov %s997_s16 }
 0x213   : > { %p11_p5 = scmp.ge.s32.totalorder %s14_s17, 4   ;;  %s1143_s16 = smov %s1145_s18 }
 0x215   :  { %13 = sbr.rel (!%p11_p5) target bundleno = 2 (0x2), region = 73 }

// kernel: cfdgcn_forward.10
= control target key start
LH: loop header
LB: loop body
LE: loop exit
PB: predicated region body
PF: predicated region fallthrough
CT: control target
= control target key end

     0   :  { %s2694_s12 = smov 0   ;;  %s2696_s13 = smov 0   ;;  %s4422_s0 = inlined_call_operand.vmem [shape: f32[2,128,2], index: 0, kind: input, shape index: {}]   ;;  %s4423_s1 = inlined_call_operand.vmem [shape: f32[2,64], index: 1, kind: input, shape index: {}]   ;;  %s4424_s2 = inlined_call_operand.vmem [shape: bf16[2,64,128], index: 2, kind: input, shape index: {}]   ;;  %s4425_s3 = inlined_call_operand.vmem [shape: bf16[2,128,128], index: 3, kind: output, shape index: {}]  }
   0x1   :  { %s2698_s14 = smov 0  }
   0x2 LB: > { %s25_s15 = sadd.s32 1, %s2665_s13  ;;  %p2283_p0 = scmp.ge.s32.totalorder %s2669_s14, 1  ;;  %s2669_s14 = sphi %s2698_s14, %s13_s14   ;;  %s2665_s13 = sphi %s2696_s13, %s4642_s13   ;;  %s2661_s12 = sphi %s2694_s12, %s4641_s12  }
   0x3   : > { %p27_p1 = scmp.ge.s32.totalorder %s25_s15, 2  ;;  %p168_p2 = scmp.lt.s32.totalorder %s2669_s14, 3 }
   0x5   : > { %s4644_s15 = smov (%p27_p1, %s25_s15), 0  ;;  %p169_p3 = pnand %p2283_p0, %p168_p2 }
   0x7   : > { %172 = sbr.rel (%p169_p3) target bundleno = 1785 (0x6f9), region = 32 }
   0xe   : > { %p206_p4 = scmp.lt.s32.totalorder %s2661_s12, 1  ;;  %v2671_v0 = vmov 0   ;;  %v2672_v6 = vmov 1   ;;  %v336_v18 = vlaneseq  ;;  %v247_v23 = vld [vmem:[%s4423_s1] sm:$0x3]  ;;  %vm490_vm0 = vcmask 523264  }
   0xf   : > { %2506 = vset.pattern.permute.xlu1 %v2671_v0  ;;  %2505 = vset.pattern.permute.xlu0 %v2671_v0 }
  0x10   : > { %s4646_s12 = smov (!%p206_p4, %s2661_s12), 1  ;;  %v337_v19 = vshrl.u32 %v336_v18, 7 }
  0x11   : > { %s2368_s16 = sshll.u32 %s4646_s12, 7  ;;  %s2369_s22 = sshll.u32 %s4646_s12, 5 }
  0x12   : > { %s2718_s19 = scalar_lea.vmem %s4422_s0, %s2368_s16  ;;  %v338_v20 = vsub.s32 0, %v337_v19  ;;  %v422_v24 = vsub.s32 1, %v337_v19  ;;  %s4262_s25 = scalar_lea.vmem %s4424_s2, %s2369_s22 }
  0x13   : > { %v239_v1 = vld [vmem:[%s2718_s19 + $0x40] sm:$0xff]  ;;  %v240_v3 = vld [vmem:[%s2718_s19 + $0x48] sm:$0xff]  ;;  %v234_v5 = vld [vmem:[%s2718_s19 + $0x18] sm:$0xff]  ;;  %s2370_s26 = sshll.u32 %s4646_s12, 6 }
  0x14   : > { %v231_v2 = vld [vmem:[%s2718_s19] sm:$0xff]  ;;  %298 = vperm.xlu1 %2506, %v239_v1   ;;  %v232_v4 = vld [vmem:[%s2718_s19 + $0x8] sm:$0xff]  ;;  %v238_v8 = vld [vmem:[%s2718_s19 + $0x38] sm:$0xff]  ;;  %v2740_v25 = vrot.slane %v247_v23, %v338_v20  ;;  %v2743_v29 = vrot.slane %v247_v23, %v422_v24  ;;  %s228_s29 = scalar_lea.vmem %s4425_s3, %s2370_s26 }
  0x15   : > { %258 = vperm.xlu0 %2505, %v231_v2   ;;  %v236_v7 = vld [vmem:[%s2718_s19 + $0x28] sm:$0xff]  ;;  %v233_v9 = vld [vmem:[%s2718_s19 + $0x10] sm:$0xff]  ;;  %v242_v11 = vld [vmem:[%s2718_s19 + $0x58] sm:$0xff] }
  0x16   : > { %v241_v10 = vld [vmem:[%s2718_s19 + $0x50] sm:$0xff]  ;;  %v235_v12 = vld [vmem:[%s2718_s19 + $0x20] sm:$0xff]  ;;  %v244_v13 = vld [vmem:[%s2718_s19 + $0x68] sm:$0xff] }
  0x17   : > { %v243_v14 = vld [vmem:[%s2718_s19 + $0x60] sm:$0xff]  ;;  %v237_v15 = vld [vmem:[%s2718_s19 + $0x30] sm:$0xff]  ;;  %v246_v16 = vld [vmem:[%s2718_s19 + $0x78] sm:$0xff] }
  0x18   : > { %303 = vperm.xlu1 %2506, %v240_v3   ;;  %v245_v17 = vld [vmem:[%s2718_s19 + $0x70] sm:$0xff] }
  0x19   : > { %263 = vperm.xlu0 %2505, %v232_v4  }
  0x1c   : > { %2507 = vset.pattern.permute.xlu1 %v2672_v6 }
  0x1d   : > { %273 = vperm.xlu0 %2505, %v234_v5   ;;  %361 = vperm.xlu1 %2507, %v232_v4  }
  0x21   : > { %283 = vperm.xlu0 %2505, %v236_v7   ;;  %389 = vperm.xlu1 %2507, %v239_v1  }
  0x25   : > { %293 = vperm.xlu0 %2505, %v238_v8   ;;  %2508 = vset.pattern.permute.xlu1 %v2671_v0 }
  0x26   : > { %268 = vperm.xlu1 %2508, %v233_v9  }
  0x29   : > { %2513 = vset.pattern.permute.xlu0 %v2672_v6 }
  0x2a   : > { %357 = vperm.xlu0 %2513, %v231_v2   ;;  %308 = vperm.xlu1 %2508, %v241_v10  }
  0x2e   : > { %393 = vperm.xlu0 %2513, %v240_v3   ;;  %313 = vperm.xlu1 %2508, %v242_v11  }
  0x32   : > { %365 = vperm.xlu0 %2513, %v233_v9   ;;  %2509 = vset.pattern.permute.xlu1 %v2672_v6 }
  0x33   : > { %369 = vperm.xlu1 %2509, %v234_v5  }
  0x36   : > { %401 = vperm.xlu0 %2513, %v242_v11  }
  0x37   : > { %397 = vperm.xlu1 %2509, %v241_v10  }
  0x3a   : > { %373 = vperm.xlu0 %2513, %v235_v12  }
  0x3b   : > { %2510 = vset.pattern.permute.xlu1 %v2671_v0 }
  0x3c   : > { %278 = vperm.xlu1 %2510, %v235_v12  }
  0x3e   : > { %409 = vperm.xlu0 %2513, %v244_v13  }
  0x40   : > { %318 = vperm.xlu1 %2510, %v243_v14  }
  0x42   : > { %381 = vperm.xlu0 %2513, %v237_v15  }
  0x44   : > { %323 = vperm.xlu1 %2510, %v244_v13  }
  0x46   : > { %417 = vperm.xlu0 %2513, %v246_v16  }
  0x48   : > { %2511 = vset.pattern.permute.xlu1 %v2672_v6 }
  0x49   : > { %377 = vperm.xlu1 %2511, %v236_v7  }
  0x4d   : > { %405 = vperm.xlu1 %2511, %v243_v14  }
  0x51   : > { %2512 = vset.pattern.permute.xlu1 %v2671_v0 }
  0x52   : > { %288 = vperm.xlu1 %2512, %v237_v15  }
  0x56   : > { %328 = vperm.xlu1 %2512, %v245_v17  }
  0x5a   : > { %333 = vperm.xlu1 %2512, %v246_v16  }
  0x5e   : > { %2514 = vset.pattern.permute.xlu1 %v2672_v6 }
  0x5f   : > { %385 = vperm.xlu1 %2514, %v238_v8  }
  0x63   : > { %413 = vperm.xlu1 %2514, %v245_v17  }
  0x93   : > { %v299_v21 = vpop.permute.xlu1 %298 }
  0x94   : > { %v259_v22 = vpop.permute.xlu0 %258  ;;  %v348_v34 = vsub.f32 %v299_v21, %v2740_v25 }
  0x95   : > { %v340_v44 = vsub.f32 %v259_v22, %v2740_v25 }
  0x96   : > { %v448_v40 = vmul.f32 %v348_v34, %v348_v34 }
  0x97   : > { %v304_v26 = vpop.permute.xlu1 %303  ;;  %v440_v49 = vmul.f32 %v340_v44, %v340_v44 }
  0x98   : > { %v264_v27 = vpop.permute.xlu0 %263  ;;  %v349_v52 = vsub.f32 %v304_v26, %v2740_v25 }
  0x99   : > { %v341_v28 = vsub.f32 %v264_v27, %v2740_v25 }
  0x9a   : > { %v449_v59 = vmul.f32 %v349_v52, %v349_v52 }
  0x9b   : > { %v441_v32 = vmul.f32 %v341_v28, %v341_v28 }
  0x9c   : > { %v274_v30 = vpop.permute.xlu0 %273  ;;  %v362_v31 = vpop.permute.xlu1 %361 }
  0x9d   : > { %v425_v33 = vsub.f32 %v362_v31, %v2743_v29  ;;  %v343_v58 = vsub.f32 %v274_v30, %v2740_v25 }
  0x9f   : > { %v457_v35 = vmul.f32 %v425_v33, %v425_v33  ;;  %v443_v2 = vmul.f32 %v343_v58, %v343_v58 }
  0xa0   : > { %v2747_v36 = vpop.permute.xlu0 %283  ;;  %v390_v37 = vpop.permute.xlu1 %389 }
  0xa1   : > { %v2749_v38 = vadd.f32 %v457_v35, %v441_v32  ;;  %v432_v39 = vsub.f32 %v390_v37, %v2743_v29 }
  0xa3   : > { %v464_v41 = vmul.f32 %v432_v39, %v432_v39  ;;  %v494_v42 = vsel %vm490_vm0, %v2749_v38, inf }
  0xa4   : > { %v2754_v43 = vpop.permute.xlu0 %293  ;;  %495 = vmin.xlane.f32.xlu0 %v494_v42  ;;  %v345_v42 = vsub.f32 %v2747_v36, %v2740_v25 }
  0xa5   : > { %v2757_v45 = vadd.f32 %v464_v41, %v448_v40  ;;  %v269_v46 = vpop.permute.xlu1 %268 }
  0xa6   : > { %v342_v60 = vsub.f32 %v269_v46, %v2740_v25 }
  0xa7   : > { %v515_v47 = vsel %vm490_vm0, %v2757_v45, inf }
  0xa8   : > { %516 = vmin.xlane.f32.xlu0 %v515_v47  ;;  %v442_v5 = vmul.f32 %v342_v60, %v342_v60 }
  0xa9   : > { %v358_v48 = vpop.permute.xlu0 %357  ;;  %v309_v51 = vpop.permute.xlu1 %308 }
  0xaa   : > { %v424_v50 = vsub.f32 %v358_v48, %v2743_v29  ;;  %v350_v9 = vsub.f32 %v309_v51, %v2740_v25 }
  0xac   : > { %v456_v53 = vmul.f32 %v424_v50, %v424_v50  ;;  %v450_v21 = vmul.f32 %v350_v9, %v350_v9  ;;  %v445_v50 = vmul.f32 %v345_v42, %v345_v42 }
  0xad   : > { %v394_v54 = vpop.permute.xlu0 %393  ;;  %v314_v57 = vpop.permute.xlu1 %313 }
  0xae   : > { %v2763_v55 = vadd.f32 %v456_v53, %v440_v49  ;;  %v433_v56 = vsub.f32 %v394_v54, %v2743_v29  ;;  %v351_v3 = vsub.f32 %v314_v57, %v2740_v25 }
  0xb0   : > { %v465_v61 = vmul.f32 %v433_v56, %v433_v56  ;;  %v491_v62 = vsel %vm490_vm0, %v2763_v55, inf  ;;  %v451_v14 = vmul.f32 %v351_v3, %v351_v3 }
  0xb1   : > { %492 = vmin.xlane.f32.xlu1 %v491_v62  ;;  %v366_v63 = vpop.permute.xlu0 %365 }
  0xb2   : > { %v2770_v0 = vadd.f32 %v465_v61, %v449_v59  ;;  %v426_v1 = vsub.f32 %v366_v63, %v2743_v29  ;;  %v370_v4 = vpop.permute.xlu1 %369 }
  0xb3   : > { %v427_v7 = vsub.f32 %v370_v4, %v2743_v29 }
  0xb4   : > { %v458_v6 = vmul.f32 %v426_v1, %v426_v1  ;;  %v518_v8 = vsel %vm490_vm0, %v2770_v0, inf }
  0xb5   : > { %519 = vmin.xlane.f32.xlu1 %v518_v8  ;;  %v402_v10 = vpop.permute.xlu0 %401  ;;  %v459_v12 = vmul.f32 %v427_v7, %v427_v7 }
  0xb6   : > { %v2778_v11 = vadd.f32 %v458_v6, %v442_v5  ;;  %v435_v13 = vsub.f32 %v402_v10, %v2743_v29  ;;  %v398_v15 = vpop.permute.xlu1 %397 }
  0xb7   : > { %v2781_v16 = vadd.f32 %v459_v12, %v443_v2  ;;  %v434_v19 = vsub.f32 %v398_v15, %v2743_v29 }
  0xb8   : > { %v467_v17 = vmul.f32 %v435_v13, %v435_v13  ;;  %v497_v20 = vsel %vm490_vm0, %v2778_v11, inf }
  0xb9   : > { %498 = vmin.xlane.f32.xlu0 %v497_v20  ;;  %v374_v22 = vpop.permute.xlu0 %373  ;;  %v466_v24 = vmul.f32 %v434_v19, %v434_v19  ;;  %v500_v26 = vsel %vm490_vm0, %v2781_v16, inf }
  0xba   : > { %v2786_v23 = vadd.f32 %v467_v17, %v451_v14  ;;  %v428_v27 = vsub.f32 %v374_v22, %v2743_v29  ;;  %501 = vmin.xlane.f32.xlu1 %v500_v26  ;;  %v347_v14 = vsub.f32 %v2754_v43, %v2740_v25 }
  0xbb   : > { %v2791_v28 = vadd.f32 %v466_v24, %v450_v21  ;;  %v279_v30 = vpop.permute.xlu1 %278 }
  0xbc   : > { %v460_v31 = vmul.f32 %v428_v27, %v428_v27  ;;  %v344_v32 = vsub.f32 %v279_v30, %v2740_v25  ;;  %v524_v34 = vsel %vm490_vm0, %v2786_v23, inf  ;;  %v447_v21 = vmul.f32 %v347_v14, %v347_v14 }
  0xbd   : > { %v521_v33 = vsel %vm490_vm0, %v2791_v28, inf  ;;  %v410_v44 = vpop.permute.xlu0 %409 }
  0xbe   : > { %v444_v35 = vmul.f32 %v344_v32, %v344_v32  ;;  %522 = vmin.xlane.f32.xlu0 %v521_v33  ;;  %525 = vmin.xlane.f32.xlu1 %v524_v34  ;;  %v437_v46 = vsub.f32 %v410_v44, %v2743_v29 }
  0xbf   : > { %v319_v37 = vpop.permute.xlu1 %318 }
  0xc0   : > { %v2798_v39 = vadd.f32 %v460_v31, %v444_v35  ;;  %v469_v51 = vmul.f32 %v437_v46, %v437_v46  ;;  %v352_v52 = vsub.f32 %v319_v37, %v2740_v25 }
  0xc1   : > { %v382_v59 = vpop.permute.xlu0 %381 }
  0xc2   : > { %v503_v40 = vsel %vm490_vm0, %v2798_v39, inf  ;;  %v452_v36 = vmul.f32 %v352_v52, %v352_v52  ;;  %v430_v63 = vsub.f32 %v382_v59, %v2743_v29 }
  0xc3   : > { %v324_v41 = vpop.permute.xlu1 %323  ;;  %504 = vmin.xlane.f32.xlu0 %v503_v40 }
  0xc4   : > { %v353_v47 = vsub.f32 %v324_v41, %v2740_v25  ;;  %v462_v6 = vmul.f32 %v430_v63, %v430_v63 }
  0xc5   : > { %v418_v13 = vpop.permute.xlu0 %417 }
  0xc6   : > { %v453_v53 = vmul.f32 %v353_v47, %v353_v47  ;;  %v439_v19 = vsub.f32 %v418_v13, %v2743_v29 }
  0xc8   : > { %v378_v48 = vpop.permute.xlu1 %377  ;;  %v2811_v60 = vadd.f32 %v469_v51, %v453_v53  ;;  %v471_v30 = vmul.f32 %v439_v19, %v439_v19 }
  0xc9   : > { %v429_v49 = vsub.f32 %v378_v48, %v2743_v29 }
  0xca   : > { %v530_v5 = vsel %vm490_vm0, %v2811_v60, inf }
  0xcb   : > { %v461_v54 = vmul.f32 %v429_v49, %v429_v49 }
  0xcc   : > { %v406_v56 = vpop.permute.xlu1 %405 }
  0xcd   : > { %v2808_v57 = vadd.f32 %v461_v54, %v445_v50  ;;  %v436_v58 = vsub.f32 %v406_v56, %v2743_v29 }
  0xcf   : > { %v468_v61 = vmul.f32 %v436_v58, %v436_v58  ;;  %v506_v62 = vsel %vm490_vm0, %v2808_v57, inf }
  0xd0   : > { %507 = vmin.xlane.f32.xlu1 %v506_v62 }
  0xd1   : > { %v2816_v1 = vadd.f32 %v468_v61, %v452_v36  ;;  %v289_v2 = vpop.permute.xlu1 %288 }
  0xd2   : > { %v346_v3 = vsub.f32 %v289_v2, %v2740_v25 }
  0xd3   : > { %v527_v4 = vsel %vm490_vm0, %v2816_v1, inf }
  0xd4   : > { %v446_v7 = vmul.f32 %v346_v3, %v346_v3  ;;  %528 = vmin.xlane.f32.xlu0 %v527_v4  ;;  %531 = vmin.xlane.f32.xlu1 %v530_v5 }
  0xd5   : > { %v329_v8 = vpop.permute.xlu1 %328 }
  0xd6   : > { %v2823_v9 = vadd.f32 %v462_v6, %v446_v7  ;;  %v354_v22 = vsub.f32 %v329_v8, %v2740_v25 }
  0xd8   : > { %v509_v10 = vsel %vm490_vm0, %v2823_v9, inf  ;;  %v454_v33 = vmul.f32 %v354_v22, %v354_v22 }
  0xd9   : > { %v334_v12 = vpop.permute.xlu1 %333  ;;  %510 = vmin.xlane.f32.xlu0 %v509_v10 }
  0xda   : > { %v355_v15 = vsub.f32 %v334_v12, %v2740_v25 }
  0xdc   : > { %v455_v24 = vmul.f32 %v355_v15, %v355_v15 }
  0xde   : > { %v386_v17 = vpop.permute.xlu1 %385  ;;  %v2836_v43 = vadd.f32 %v471_v30, %v455_v24 }
  0xdf   : > { %v431_v20 = vsub.f32 %v386_v17, %v2743_v29 }
  0xe0   : > { %v536_v40 = vsel %vm490_vm0, %v2836_v43, inf }
  0xe1   : > { %v463_v26 = vmul.f32 %v431_v20, %v431_v20 }
  0xe2   : > { %v414_v27 = vpop.permute.xlu1 %413 }
  0xe3   : > { %v2833_v31 = vadd.f32 %v463_v26, %v447_v21  ;;  %v438_v32 = vsub.f32 %v414_v27, %v2743_v29  ;;  %v2847_v29 = vand.u32 127, %v336_v18 }
  0xe5   : > { %v470_v34 = vmul.f32 %v438_v32, %v438_v32  ;;  %v512_v35 = vsel %vm490_vm0, %v2833_v31, inf }
  0xe6   : > { %513 = vmin.xlane.f32.xlu1 %v512_v35 }
  0xe7   : > { %v2840_v37 = vadd.f32 %v470_v34, %v454_v33 }
  0xe9   : > { %v533_v25 = vsel %vm490_vm0, %v2840_v37, inf }
  0xea   : > { %534 = vmin.xlane.f32.xlu0 %v533_v25  ;;  %537 = vmin.xlane.f32.xlu1 %v536_v40 }
 0x131   : > { %v2849_v41 = vpop.xlane.xlu0 %495 }
 0x132   : > { %vm540_vm1 = vcmp.eq.f32.partialorder %v2749_v38, %v2849_v41 }
 0x133   : > { %v556_v42 = vsel %vm540_vm1, %v2847_v29, 64 }
 0x134   : > { %v2855_v44 = vsel %vm490_vm0, %v556_v42, 2147483647 }
 0x135   : > { %v588_v46 = vshra.s32 %v2855_v44, 16  ;;  %v2858_v47 = vpop.xlane.xlu0 %516 }
 0x136   : > { %vm547_vm2 = vcmp.eq.f32.partialorder %v2757_v45, %v2858_v47 }
 0x137   : > { %v2860_v48 = vcvt.s32.f32 %v588_v46  ;;  %v563_v49 = vsel %vm547_vm2, %v2847_v29, 64 }
 0x138   : > { %v2875_v52 = vsel %vm490_vm0, %v563_v49, 2147483647 }
 0x139   : > { %591 = vmin.xlane.f32.xlu1 %v2860_v48  ;;  %v693_v36 = vshra.s32 %v2875_v52, 16 }
 0x13b   : > { %v2899_v3 = vcvt.s32.f32 %v693_v36 }
 0x13e   : > { %v2865_v18 = vpop.xlane.xlu1 %492 }
 0x13f   : > { %vm539_vm3 = vcmp.eq.f32.partialorder %v2763_v55, %v2865_v18 }
 0x140   : > { %v555_v50 = vsel %vm539_vm3, %v2847_v29, 64 }
 0x141   : > { %v2872_v51 = vsel %vm490_vm0, %v555_v50, 2147483647 }
 0x142   : > { %v2877_v53 = vpop.xlane.xlu1 %519  ;;  %v573_v54 = vshra.s32 %v2872_v51, 16 }
 0x143   : > { %vm548_vm4 = vcmp.eq.f32.partialorder %v2770_v0, %v2877_v53 }
 0x144   : > { %v2882_v56 = vcvt.s32.f32 %v573_v54  ;;  %v564_v58 = vsel %vm548_vm4, %v2847_v29, 64 }
 0x145   : > { %v2887_v59 = vsel %vm490_vm0, %v564_v58, 2147483647 }
 0x146   : > { %576 = vmin.xlane.f32.xlu0 %v2882_v56  ;;  %v2890_v61 = vpop.xlane.xlu0 %498  ;;  %v708_v62 = vshra.s32 %v2887_v59, 16 }
 0x147   : > { %vm541_vm5 = vcmp.eq.f32.partialorder %v2778_v11, %v2890_v61  ;;  %v2895_v63 = vpop.xlane.xlu1 %501 }
 0x148   : > { %4490 = vst [vmem:[#allocation2_spill] sm:$0xff] %v2895_v63  ;;  %v2897_v2 = vcvt.s32.f32 %v708_v62  ;;  %v557_v4 = vsel %vm541_vm5, %v2847_v29, 64  ;;  %vm542_vm6 = vcmp.eq.f32.partialorder %v2781_v16, %v2895_v63 }
 0x149   : > { %v2905_v5 = vsel %vm490_vm0, %v557_v4, 2147483647  ;;  %v558_v7 = vsel %vm542_vm6, %v2847_v29, 64 }
 0x14a   : > { %711 = vmin.xlane.f32.xlu1 %v2897_v2  ;;  %696 = vmin.xlane.f32.xlu0 %v2899_v3  ;;  %v603_v6 = vshra.s32 %v2905_v5, 16  ;;  %v2912_v8 = vsel %vm490_vm0, %v558_v7, 2147483647 }
 0x14b   : > { %v2914_v10 = vpop.xlane.xlu1 %525  ;;  %v2916_v12 = vpop.xlane.xlu0 %522  ;;  %v618_v14 = vshra.s32 %v2912_v8, 16 }
 0x14c   : > { %4491 = vst [vmem:[#allocation3_spill] sm:$0xff] %v2914_v10  ;;  %4492 = vst [vmem:[#allocation4_spill] sm:$0xff] %v2916_v12  ;;  %v2918_v13 = vcvt.s32.f32 %v603_v6  ;;  %vm550_vm7 = vcmp.eq.f32.partialorder %v2786_v23, %v2914_v10  ;;  %vm549_vm8 = vcmp.eq.f32.partialorder %v2791_v28, %v2916_v12  ;;  %v707_v12 = vand.u32 65535, %v2887_v59 }
 0x14d   : > { %v2926_v15 = vcvt.s32.f32 %v618_v14  ;;  %v566_v17 = vsel %vm550_vm7, %v2847_v29, 64  ;;  %v565_v19 = vsel %vm549_vm8, %v2847_v29, 64  ;;  %v692_v10 = vand.u32 65535, %v2875_v52 }
 0x14e   : > { %606 = vmin.xlane.f32.xlu0 %v2918_v13  ;;  %v2931_v20 = vsel %vm490_vm0, %v566_v17, 2147483647  ;;  %v2934_v21 = vsel %vm490_vm0, %v565_v19, 2147483647 }
 0x14f   : > { %621 = vmin.xlane.f32.xlu1 %v2926_v15  ;;  %v738_v22 = vshra.s32 %v2931_v20, 16  ;;  %v723_v24 = vshra.s32 %v2934_v21, 16 }
 0x150   : > { %v2939_v26 = vpop.xlane.xlu0 %504 }
 0x151   : > { %4493 = vst [vmem:[#allocation5_spill] sm:$0xff] %v2939_v26  ;;  %vm543_vm9 = vcmp.eq.f32.partialorder %v2798_v39, %v2939_v26  ;;  %v2943_v27 = vcvt.s32.f32 %v738_v22  ;;  %v2945_v30 = vcvt.s32.f32 %v723_v24  ;;  %v572_v26 = vand.u32 65535, %v2872_v51 }
 0x152   : > { %v559_v32 = vsel %vm543_vm9, %v2847_v29, 64  ;;  %v602_v51 = vand.u32 65535, %v2905_v5 }
 0x153   : > { %741 = vmin.xlane.f32.xlu1 %v2943_v27  ;;  %726 = vmin.xlane.f32.xlu0 %v2945_v30  ;;  %v2951_v33 = vsel %vm490_vm0, %v559_v32, 2147483647 }
 0x154   : > { %v633_v34 = vshra.s32 %v2951_v33, 16 }
 0x156   : > { %v2954_v35 = vcvt.s32.f32 %v633_v34 }
 0x158   : > { %636 = vmin.xlane.f32.xlu0 %v2954_v35 }
 0x15d   : > { %v2957_v25 = vpop.xlane.xlu1 %507 }
 0x15e   : > { %4494 = vst [vmem:[#allocation6_spill] sm:$0xff] %v2957_v25  ;;  %vm544_vm10 = vcmp.eq.f32.partialorder %v2808_v57, %v2957_v25 }
 0x15f   : > { %v560_v40 = vsel %vm544_vm10, %v2847_v29, 64 }
 0x160   : > { %v2963_v42 = vsel %vm490_vm0, %v560_v40, 2147483647 }
 0x161   : > { %v2965_v46 = vpop.xlane.xlu1 %531  ;;  %v2967_v49 = vpop.xlane.xlu0 %528  ;;  %v648_v50 = vshra.s32 %v2963_v42, 16 }
 0x162   : > { %4495 = vst [vmem:[#allocation7_spill] sm:$0xff] %v2965_v46  ;;  %4496 = vst [vmem:[#allocation8_spill] sm:$0xff] %v2967_v49  ;;  %vm552_vm11 = vcmp.eq.f32.partialorder %v2811_v60, %v2965_v46  ;;  %vm551_vm12 = vcmp.eq.f32.partialorder %v2816_v1, %v2967_v49 }
 0x163   : > { %v2974_v54 = vcvt.s32.f32 %v648_v50  ;;  %v568_v58 = vsel %vm552_vm11, %v2847_v29, 64  ;;  %v567_v36 = vsel %vm551_vm12, %v2847_v29, 64 }
 0x164   : > { %v2979_v62 = vsel %vm490_vm0, %v568_v58, 2147483647  ;;  %v2982_v4 = vsel %vm490_vm0, %v567_v36, 2147483647 }
 0x165   : > { %651 = vmin.xlane.f32.xlu1 %v2974_v54  ;;  %v768_v6 = vshra.s32 %v2979_v62, 16  ;;  %v753_v7 = vshra.s32 %v2982_v4, 16 }
 0x166   : > { %v2987_v14 = vpop.xlane.xlu0 %510 }
 0x167   : > { %4497 = vst [vmem:[#allocation9_spill] sm:$0xff] %v2987_v14  ;;  %vm545_vm13 = vcmp.eq.f32.partialorder %v2823_v9, %v2987_v14  ;;  %v2991_v17 = vcvt.s32.f32 %v768_v6  ;;  %v2993_v19 = vcvt.s32.f32 %v753_v7 }
 0x168   : > { %v561_v22 = vsel %vm545_vm13, %v2847_v29, 64 }
 0x169   : > { %771 = vmin.xlane.f32.xlu1 %v2991_v17  ;;  %756 = vmin.xlane.f32.xlu0 %v2993_v19  ;;  %v2999_v24 = vsel %vm490_vm0, %v561_v22, 2147483647 }
 0x16a   : > { %v663_v32 = vshra.s32 %v2999_v24, 16 }
 0x16c   : > { %v3002_v34 = vcvt.s32.f32 %v663_v32 }
 0x16e   : > { %666 = vmin.xlane.f32.xlu0 %v3002_v34 }
 0x173   : > { %v3005_v40 = vpop.xlane.xlu1 %513 }
 0x174   : > { %4498 = vst [vmem:[#allocation10_spill] sm:$0xff] %v3005_v40  ;;  %vm546_vm14 = vcmp.eq.f32.partialorder %v2833_v31, %v3005_v40 }
 0x175   : > { %v562_v50 = vsel %vm546_vm14, %v2847_v29, 64 }
 0x176   : > { %v3011_v58 = vsel %vm490_vm0, %v562_v50, 2147483647 }
 0x177   : > { %v3013_v36 = vpop.xlane.xlu1 %537  ;;  %v3015_v6 = vpop.xlane.xlu0 %534  ;;  %v678_v7 = vshra.s32 %v3011_v58, 16 }
 0x178   : > { %4499 = vst [vmem:[#allocation11_spill] sm:$0xff] %v3013_v36  ;;  %4500 = vst [vmem:[#allocation12_spill] sm:$0xff] %v3015_v6  ;;  %vm554_vm15 = vcmp.eq.f32.partialorder %v2836_v43, %v3013_v36  ;;  %vm553_vm1 = vcmp.eq.f32.partialorder %v2840_v37, %v3015_v6 }
 0x179   : > { %v3022_v22 = vcvt.s32.f32 %v678_v7  ;;  %v570_v32 = vsel %vm554_vm15, %v2847_v29, 64  ;;  %v569_v40 = vsel %vm553_vm1, %v2847_v29, 64 }
 0x17a   : > { %v3027_v50 = vsel %vm490_vm0, %v570_v32, 2147483647  ;;  %v3030_v14 = vsel %vm490_vm0, %v569_v40, 2147483647  ;;  %v587_v32 = vand.u32 65535, %v2855_v44 }
 0x17b   : > { %681 = vmin.xlane.f32.xlu1 %v3022_v22  ;;  %v798_v49 = vshra.s32 %v3027_v50, 16  ;;  %v783_v36 = vshra.s32 %v3030_v14, 16 }
 0x17c   : > { %v589_v40 = vcvt.s32.f32 %v587_v32 }
 0x17d   : > { %v3035_v46 = vcvt.s32.f32 %v798_v49  ;;  %v3037_v7 = vcvt.s32.f32 %v783_v36  ;;  %v574_v36 = vcvt.s32.f32 %v572_v26 }
 0x17f   : > { %801 = vmin.xlane.f32.xlu1 %v3035_v46  ;;  %786 = vmin.xlane.f32.xlu0 %v3037_v7 }
 0x1c6   : > { %v3042_v6 = vpop.xlane.xlu1 %591 }
 0x1c7   : > { %vm593_vm2 = vcmp.eq.f32.partialorder %v2860_v48, %v3042_v6  ;;  %v709_v48 = vcvt.s32.f32 %v707_v12 }
 0x1c8   : > { %v594_v25 = vsel %vm593_vm2, %v589_v40, inf  ;;  %v604_v40 = vcvt.s32.f32 %v602_v51 }
 0x1c9   : > { %595 = vmin.xlane.f32.xlu1 %v594_v25  ;;  %v694_v25 = vcvt.s32.f32 %v692_v10 }
 0x1d3   : > { %v3047_v49 = vpop.xlane.xlu0 %576 }
 0x1d4   : > { %vm578_vm3 = vcmp.eq.f32.partialorder %v2882_v56, %v3047_v49  ;;  %v617_v56 = vand.u32 65535, %v2912_v8 }
 0x1d5   : > { %v579_v44 = vsel %vm578_vm3, %v574_v36, inf }
 0x1d6   : > { %580 = vmin.xlane.f32.xlu0 %v579_v44  ;;  %v619_v12 = vcvt.s32.f32 %v617_v56 }
 0x1d7   : > { %v3053_v32 = vpop.xlane.xlu1 %711  ;;  %v3055_v63 = vpop.xlane.xlu0 %696 }
 0x1d8   : > { %vm713_vm4 = vcmp.eq.f32.partialorder %v2897_v2, %v3053_v32  ;;  %vm698_vm5 = vcmp.eq.f32.partialorder %v2899_v3, %v3055_v63  ;;  %v737_v2 = vand.u32 65535, %v2931_v20  ;;  %v722_v3 = vand.u32 65535, %v2934_v21 }
 0x1d9   : > { %v714_v52 = vsel %vm713_vm4, %v709_v48, inf  ;;  %v699_v59 = vsel %vm698_vm5, %v694_v25, inf  ;;  %v632_v20 = vand.u32 65535, %v2951_v33  ;;  %v752_v33 = vand.u32 65535, %v2982_v4 }
 0x1da   : > { %715 = vmin.xlane.f32.xlu1 %v714_v52  ;;  %700 = vmin.xlane.f32.xlu0 %v699_v59  ;;  %v739_v48 = vcvt.s32.f32 %v737_v2  ;;  %v647_v59 = vand.u32 65535, %v2963_v42  ;;  %v662_v42 = vand.u32 65535, %v2999_v24  ;;  %v782_v24 = vand.u32 65535, %v3030_v14 }
 0x1db   : > { %v3063_v26 = vpop.xlane.xlu0 %606  ;;  %v634_v51 = vcvt.s32.f32 %v632_v20  ;;  %v754_v2 = vcvt.s32.f32 %v752_v33  ;;  %v598_v14 = vcvt.f32.s32 %v3042_v6  ;;  %v583_v6 = vcvt.f32.s32 %v3047_v49 }
 0x1dc   : > { %vm608_vm6 = vcmp.eq.f32.partialorder %v2918_v13, %v3063_v26  ;;  %v3067_v10 = vpop.xlane.xlu1 %621  ;;  %v724_v13 = vcvt.s32.f32 %v722_v3  ;;  %v649_v56 = vcvt.s32.f32 %v647_v59  ;;  %v664_v3 = vcvt.s32.f32 %v662_v42 }
 0x1dd   : > { %v609_v5 = vsel %vm608_vm6, %v604_v40, inf  ;;  %vm623_vm7 = vcmp.eq.f32.partialorder %v2926_v15, %v3067_v10  ;;  %v703_v33 = vcvt.f32.s32 %v3055_v63  ;;  %v628_v49 = vcvt.f32.s32 %v3067_v10 }
 0x1de   : > { %610 = vmin.xlane.f32.xlu0 %v609_v5  ;;  %v624_v8 = vsel %vm623_vm7, %v619_v12, inf }
 0x1df   : > { %625 = vmin.xlane.f32.xlu1 %v624_v8  ;;  %v629_v10 = vshll.u32 %v628_v49, 16 }
 0x1e0   : > { %v3073_v36 = vpop.xlane.xlu1 %741  ;;  %v3075_v44 = vpop.xlane.xlu0 %726 }
 0x1e1   : > { %vm743_vm8 = vcmp.eq.f32.partialorder %v2943_v27, %v3073_v36  ;;  %vm728_vm9 = vcmp.eq.f32.partialorder %v2945_v30, %v3075_v44  ;;  %v767_v30 = vand.u32 65535, %v2979_v62 }
 0x1e2   : > { %v744_v21 = vsel %vm743_vm8, %v739_v48, inf  ;;  %v729_v25 = vsel %vm728_vm9, %v724_v13, inf  ;;  %v677_v48 = vand.u32 65535, %v3011_v58 }
 0x1e3   : > { %745 = vmin.xlane.f32.xlu1 %v744_v21  ;;  %730 = vmin.xlane.f32.xlu0 %v729_v25 }
 0x1e4   : > { %v679_v13 = vcvt.s32.f32 %v677_v48 }
 0x1e5   : > { %v3082_v15 = vpop.xlane.xlu0 %636 }
 0x1e6   : > { %vm638_vm10 = vcmp.eq.f32.partialorder %v2954_v35, %v3082_v15  ;;  %v769_v35 = vcvt.s32.f32 %v767_v30  ;;  %v718_v30 = vcvt.f32.s32 %v3053_v32 }
 0x1e7   : > { %v639_v52 = vsel %vm638_vm10, %v634_v51, inf  ;;  %v784_v51 = vcvt.s32.f32 %v782_v24 }
 0x1e8   : > { %640 = vmin.xlane.f32.xlu0 %v639_v52  ;;  %v599_v52 = vshll.u32 %v598_v14, 16  ;;  %v733_v14 = vcvt.f32.s32 %v3075_v44 }
 0x1f2   : > { %v3087_v27 = vpop.xlane.xlu1 %651 }
 0x1f3   : > { %vm653_vm11 = vcmp.eq.f32.partialorder %v2974_v54, %v3087_v27 }
 0x1f4   : > { %v654_v40 = vsel %vm653_vm11, %v649_v56, inf }
 0x1f5   : > { %655 = vmin.xlane.f32.xlu1 %v654_v40 }
 0x1f6   : > { %v3093_v5 = vpop.xlane.xlu1 %771  ;;  %v3095_v12 = vpop.xlane.xlu0 %756 }
 0x1f7   : > { %vm773_vm12 = vcmp.eq.f32.partialorder %v2991_v17, %v3093_v5  ;;  %vm758_vm13 = vcmp.eq.f32.partialorder %v2993_v19, %v3095_v12  ;;  %v797_v19 = vand.u32 65535, %v3027_v50 }
 0x1f8   : > { %v774_v62 = vsel %vm773_vm12, %v769_v35, inf  ;;  %v759_v4 = vsel %vm758_vm13, %v754_v2, inf  ;;  %v584_v35 = vshll.u32 %v583_v6, 16 }
 0x1f9   : > { %775 = vmin.xlane.f32.xlu1 %v774_v62  ;;  %760 = vmin.xlane.f32.xlu0 %v759_v4  ;;  %v719_v62 = vshll.u32 %v718_v30, 16  ;;  %v704_v4 = vshll.u32 %v703_v33, 16  ;;  %v734_v30 = vshll.u32 %v733_v14, 16 }
 0x1fb   : > { %v3102_v54 = vpop.xlane.xlu0 %666 }
 0x1fc   : > { %vm668_vm14 = vcmp.eq.f32.partialorder %v3002_v34, %v3102_v54  ;;  %v799_v34 = vcvt.s32.f32 %v797_v19 }
 0x1fd   : > { %v669_v8 = vsel %vm668_vm14, %v664_v3, inf }
 0x1fe   : > { %670 = vmin.xlane.f32.xlu0 %v669_v8  ;;  %v613_v8 = vcvt.f32.s32 %v3063_v26 }
 0x208   : > { %v3107_v17 = vpop.xlane.xlu1 %681 }
 0x209   : > { %vm683_vm15 = vcmp.eq.f32.partialorder %v3022_v22, %v3107_v17 }
 0x20a   : > { %v684_v20 = vsel %vm683_vm15, %v679_v13, inf }
 0x20b   : > { %685 = vmin.xlane.f32.xlu1 %v684_v20  ;;  %v614_v20 = vshll.u32 %v613_v8, 16 }
 0x20c   : > { %v3113_v21 = vpop.xlane.xlu1 %801  ;;  %v3115_v25 = vpop.xlane.xlu0 %786 }
 0x20d   : > { %vm803_vm1 = vcmp.eq.f32.partialorder %v3035_v46, %v3113_v21  ;;  %vm788_vm2 = vcmp.eq.f32.partialorder %v3037_v7, %v3115_v25 }
 0x20e   : > { %v804_v58 = vsel %vm803_vm1, %v799_v34, inf  ;;  %v789_v50 = vsel %vm788_vm2, %v784_v51, inf }
 0x20f   : > { %805 = vmin.xlane.f32.xlu1 %v804_v58  ;;  %790 = vmin.xlane.f32.xlu0 %v789_v50 }
 0x256   : > { %v596_v22 = vpop.xlane.xlu1 %595 }
 0x257   : > { %v597_v59 = vcvt.f32.s32 %v596_v22 }
 0x259   : > { %v3122_v56 = vadd.s32 %v599_v52, %v597_v59 }
 0x25b   : > { %vm812_vm3 = vcmp.eq.s32.totalorder %v2847_v29, %v3122_v56 }
 0x25c   : > { %v3130_v46 = vsel %vm812_vm3, inf, %v2749_v38 }
 0x25d   : > { %v974_v7 = vsel %vm490_vm0, %v3130_v46, inf }
 0x25e   : > { %975 = vmin.xlane.f32.xlu1 %v974_v7 }
 0x263   : > { %v581_v40 = vpop.xlane.xlu0 %580 }
 0x264   : > { %v582_v2 = vcvt.f32.s32 %v581_v40 }
 0x266   : > { %v3137_v42 = vadd.s32 %v584_v35, %v582_v2  ;;  %v643_v2 = vcvt.f32.s32 %v3082_v15 }
 0x267   : > { %v716_v3 = vpop.xlane.xlu1 %715  ;;  %v701_v38 = vpop.xlane.xlu0 %700 }
 0x268   : > { %v717_v48 = vcvt.f32.s32 %v716_v3  ;;  %v702_v13 = vcvt.f32.s32 %v701_v38  ;;  %vm811_vm4 = vcmp.eq.s32.totalorder %v2847_v29, %v3137_v42  ;;  %v644_v15 = vshll.u32 %v643_v2, 16 }
 0x269   : > { %v3147_v63 = vsel %vm811_vm4, inf, %v2763_v55  ;;  %v748_v55 = vcvt.f32.s32 %v3073_v36 }
 0x26a   : > { %4501 = vst [vmem:[#allocation13_spill] sm:$0xff] %v3147_v63  ;;  %v3149_v32 = vadd.s32 %v719_v62, %v717_v48  ;;  %v3151_v19 = vadd.s32 %v704_v4, %v702_v13  ;;  %v971_v26 = vsel %vm490_vm0, %v3147_v63, inf }
 0x26b   : > { %972 = vmin.xlane.f32.xlu0 %v971_v26  ;;  %v611_v24 = vpop.xlane.xlu0 %610 }
 0x26c   : > { %v612_v34 = vcvt.f32.s32 %v611_v24  ;;  %vm820_vm5 = vcmp.eq.s32.totalorder %v2847_v29, %v3149_v32  ;;  %vm819_vm6 = vcmp.eq.s32.totalorder %v2847_v29, %v3151_v19  ;;  %v626_v51 = vpop.xlane.xlu1 %625  ;;  %v658_v24 = vcvt.f32.s32 %v3087_v27 }
 0x26d   : > { %v3164_v58 = vsel %vm820_vm5, inf, %v2770_v0  ;;  %v3170_v50 = vsel %vm819_vm6, inf, %v2757_v45  ;;  %v627_v52 = vcvt.f32.s32 %v626_v51  ;;  %v749_v45 = vshll.u32 %v748_v55, 16 }
 0x26e   : > { %4502 = vst [vmem:[#allocation14_spill] sm:$0xff] %v3164_v58  ;;  %4503 = vst [vmem:[#allocation15_spill] sm:$0xff] %v3170_v50  ;;  %v3173_v22 = vadd.s32 %v614_v20, %v612_v34  ;;  %v998_v36 = vsel %vm490_vm0, %v3164_v58, inf  ;;  %v995_v59 = vsel %vm490_vm0, %v3170_v50, inf  ;;  %v778_v20 = vcvt.f32.s32 %v3093_v5 }
 0x26f   : > { %999 = vmin.xlane.f32.xlu1 %v998_v36  ;;  %v3179_v0 = vadd.s32 %v629_v10, %v627_v52  ;;  %996 = vmin.xlane.f32.xlu0 %v995_v59  ;;  %v659_v10 = vshll.u32 %v658_v24, 16  ;;  %v763_v55 = vcvt.f32.s32 %v3095_v12  ;;  %v673_v27 = vcvt.f32.s32 %v3102_v54 }
 0x270   : > { %vm813_vm7 = vcmp.eq.s32.totalorder %v2847_v29, %v3173_v22  ;;  %v746_v7 = vpop.xlane.xlu1 %745  ;;  %v731_v6 = vpop.xlane.xlu0 %730  ;;  %v779_v52 = vshll.u32 %v778_v20, 16 }
 0x271   : > { %v3187_v44 = vsel %vm813_vm7, inf, %v2778_v11  ;;  %v747_v33 = vcvt.f32.s32 %v746_v7  ;;  %v732_v40 = vcvt.f32.s32 %v731_v6  ;;  %vm814_vm8 = vcmp.eq.s32.totalorder %v2847_v29, %v3179_v0 }
 0x272   : > { %4504 = vst [vmem:[#allocation16_spill] sm:$0xff] %v3187_v44  ;;  %v977_v35 = vsel %vm490_vm0, %v3187_v44, inf  ;;  %v3202_v11 = vsel %vm814_vm8, inf, %v2781_v16  ;;  %v674_v54 = vshll.u32 %v673_v27, 16 }
 0x273   : > { %v3194_v62 = vadd.s32 %v749_v45, %v747_v33  ;;  %v3196_v4 = vadd.s32 %v734_v30, %v732_v40  ;;  %978 = vmin.xlane.f32.xlu0 %v977_v35  ;;  %4506 = vst [vmem:[#allocation18_spill] sm:$0xff] %v3202_v11  ;;  %v980_v3 = vsel %vm490_vm0, %v3202_v11, inf }
 0x274   : > { %981 = vmin.xlane.f32.xlu1 %v980_v3 }
 0x275   : > { %4505 = vst [vmem:[#allocation17_spill] sm:$0xff] %v3196_v4  ;;  %v641_v38 = vpop.xlane.xlu0 %640  ;;  %vm822_vm9 = vcmp.eq.s32.totalorder %v2847_v29, %v3194_v62  ;;  %vm821_vm10 = vcmp.eq.s32.totalorder %v2847_v29, %v3196_v4 }
 0x276   : > { %v642_v8 = vcvt.f32.s32 %v641_v38  ;;  %v3214_v48 = vsel %vm822_vm9, inf, %v2786_v23  ;;  %v3220_v16 = vsel %vm821_vm10, inf, %v2791_v28 }
 0x277   : > { %4507 = vst [vmem:[#allocation19_spill] sm:$0xff] %v3214_v48  ;;  %4508 = vst [vmem:[#allocation20_spill] sm:$0xff] %v3220_v16  ;;  %v1004_v13 = vsel %vm490_vm0, %v3214_v48, inf  ;;  %v1001_v49 = vsel %vm490_vm0, %v3220_v16, inf }
 0x278   : > { %v3226_v26 = vadd.s32 %v644_v15, %v642_v8  ;;  %1002 = vmin.xlane.f32.xlu0 %v1001_v49  ;;  %1005 = vmin.xlane.f32.xlu1 %v1004_v13  ;;  %v688_v15 = vcvt.f32.s32 %v3107_v17  ;;  %v808_v8 = vcvt.f32.s32 %v3113_v21 }
 0x27a   : > { %4509 = vst [vmem:[#allocation21_spill] sm:$0xff] %v3226_v26  ;;  %vm815_vm11 = vcmp.eq.s32.totalorder %v2847_v29, %v3226_v26  ;;  %v689_v49 = vshll.u32 %v688_v15, 16 }
 0x27b   : > { %v3234_v23 = vsel %vm815_vm11, inf, %v2798_v39  ;;  %v764_v39 = vshll.u32 %v763_v55, 16 }
 0x27c   : > { %4510 = vst [vmem:[#allocation22_spill] sm:$0xff] %v3234_v23  ;;  %v983_v28 = vsel %vm490_vm0, %v3234_v23, inf }
 0x27d   : > { %984 = vmin.xlane.f32.xlu0 %v983_v28  ;;  %v793_v28 = vcvt.f32.s32 %v3115_v25 }
 0x282   : > { %v656_v34 = vpop.xlane.xlu1 %655 }
 0x283   : > { %v657_v51 = vcvt.f32.s32 %v656_v34  ;;  %v809_v34 = vshll.u32 %v808_v8, 16 }
 0x285   : > { %v3241_v14 = vadd.s32 %v659_v10, %v657_v51 }
 0x286   : > { %v776_v36 = vpop.xlane.xlu1 %775  ;;  %v761_v59 = vpop.xlane.xlu0 %760 }
 0x287   : > { %4511 = vst [vmem:[#allocation23_spill] sm:$0xff] %v3241_v14  ;;  %v777_v45 = vcvt.f32.s32 %v776_v36  ;;  %v762_v7 = vcvt.f32.s32 %v761_v59  ;;  %vm816_vm12 = vcmp.eq.s32.totalorder %v2847_v29, %v3241_v14 }
 0x288   : > { %v3250_v5 = vsel %vm816_vm12, inf, %v2808_v57 }
 0x289   : > { %4512 = vst [vmem:[#allocation24_spill] sm:$0xff] %v3250_v5  ;;  %v3252_v12 = vadd.s32 %v779_v52, %v777_v45  ;;  %v3254_v6 = vadd.s32 %v764_v39, %v762_v7  ;;  %v986_v30 = vsel %vm490_vm0, %v3250_v5, inf }
 0x28a   : > { %987 = vmin.xlane.f32.xlu1 %v986_v30 }
 0x28b   : > { %4513 = vst [vmem:[#allocation25_spill] sm:$0xff] %v3252_v12  ;;  %4514 = vst [vmem:[#allocation26_spill] sm:$0xff] %v3254_v6  ;;  %v671_v33 = vpop.xlane.xlu0 %670  ;;  %vm824_vm13 = vcmp.eq.s32.totalorder %v2847_v29, %v3252_v12  ;;  %vm823_vm14 = vcmp.eq.s32.totalorder %v2847_v29, %v3254_v6 }
 0x28c   : > { %v672_v40 = vcvt.f32.s32 %v671_v33  ;;  %v3266_v57 = vsel %vm824_vm13, inf, %v2811_v60  ;;  %v3272_v35 = vsel %vm823_vm14, inf, %v2816_v1 }
 0x28d   : > { %4515 = vst [vmem:[#allocation27_spill] sm:$0xff] %v3266_v57  ;;  %4516 = vst [vmem:[#allocation28_spill] sm:$0xff] %v3272_v35  ;;  %v1010_v2 = vsel %vm490_vm0, %v3266_v57, inf  ;;  %v1007_v3 = vsel %vm490_vm0, %v3272_v35, inf }
 0x28e   : > { %v3278_v38 = vadd.s32 %v674_v54, %v672_v40  ;;  %1011 = vmin.xlane.f32.xlu1 %v1010_v2  ;;  %1008 = vmin.xlane.f32.xlu0 %v1007_v3 }
 0x290   : > { %4517 = vst [vmem:[#allocation29_spill] sm:$0xff] %v3278_v38  ;;  %vm4437_vm15 = vcmp.eq.s32.totalorder %v2847_v29, %v3278_v38 }
 0x291   : > { %v3286_v60 = vsel %vm4437_vm15, inf, %v2823_v9  ;;  %v794_v9 = vshll.u32 %v793_v28, 16 }
 0x292   : > { %4518 = vst [vmem:[#allocation30_spill] sm:$0xff] %v3286_v60  ;;  %v989_v1 = vsel %vm490_vm0, %v3286_v60, inf }
 0x293   : > { %990 = vmin.xlane.f32.xlu0 %v989_v1 }
 0x298   : > { %v686_v13 = vpop.xlane.xlu1 %685 }
 0x299   : > { %v687_v24 = vcvt.f32.s32 %v686_v13 }
 0x29b   : > { %v3293_v20 = vadd.s32 %v689_v49, %v687_v24 }
 0x29c   : > { %v806_v10 = vpop.xlane.xlu1 %805  ;;  %v791_v55 = vpop.xlane.xlu0 %790 }
 0x29d   : > { %4519 = vst [vmem:[#allocation31_spill] sm:$0xff] %v3293_v20  ;;  %v807_v51 = vcvt.f32.s32 %v806_v10  ;;  %v792_v52 = vcvt.f32.s32 %v791_v55  ;;  %vm4440_vm1 = vcmp.eq.s32.totalorder %v2847_v29, %v3293_v20 }
 0x29e   : > { %v3301_v17 = vsel %vm4440_vm1, inf, %v2833_v31 }
 0x29f   : > { %4520 = vst [vmem:[#allocation32_spill] sm:$0xff] %v3301_v17  ;;  %v3303_v21 = vadd.s32 %v809_v34, %v807_v51  ;;  %v3305_v25 = vadd.s32 %v794_v9, %v792_v52  ;;  %v992_v36 = vsel %vm490_vm0, %v3301_v17, inf }
 0x2a0   : > { %993 = vmin.xlane.f32.xlu1 %v992_v36 }
 0x2a1   : > { %4521 = vst [vmem:[#allocation33_spill] sm:$0xff] %v3303_v21  ;;  %4522 = vst [vmem:[#allocation34_spill] sm:$0xff] %v3305_v25  ;;  %vm4438_vm2 = vcmp.eq.s32.totalorder %v2847_v29, %v3303_v21  ;;  %vm4439_vm15 = vcmp.eq.s32.totalorder %v2847_v29, %v3305_v25 }
 0x2a2   : > { %v3317_v31 = vsel %vm4438_vm2, inf, %v2836_v43  ;;  %v3323_v59 = vsel %vm4439_vm15, inf, %v2840_v37 }
 0x2a3   : > { %4523 = vst [vmem:[#allocation35_spill] sm:$0xff] %v3317_v31  ;;  %4524 = vst [vmem:[#allocation36_spill] sm:$0xff] %v3323_v59  ;;  %v1016_v39 = vsel %vm490_vm0, %v3317_v31, inf  ;;  %v1013_v45 = vsel %vm490_vm0, %v3323_v59, inf }
 0x2a4   : > { %1017 = vmin.xlane.f32.xlu1 %v1016_v39  ;;  %1014 = vmin.xlane.f32.xlu0 %v1013_v45 }
 0x2eb   : > { %v3329_v7 = vpop.xlane.xlu1 %975 }
 0x2ec   : > { %vm1020_vm2 = vcmp.eq.f32.partialorder %v3130_v46, %v3329_v7 }
 0x2ed   : > { %v1036_v43 = vsel %vm1020_vm2, %v2847_v29, 64 }
 0x2ee   : > { %v3335_v27 = vsel %vm490_vm0, %v1036_v43, 2147483647 }
 0x2ef   : > { %v1068_v37 = vshra.s32 %v3335_v27, 16 }
 0x2f1   : > { %v3338_v30 = vcvt.s32.f32 %v1068_v37 }
 0x2f3   : > { %1071 = vmin.xlane.f32.xlu1 %v3338_v30 }
 0x2f8   : > { %v3341_v33 = vpop.xlane.xlu0 %972 }
 0x2f9   : > { %vm1019_vm15 = vcmp.eq.f32.partialorder %v3147_v63, %v3341_v33 }
 0x2fa   : > { %v1035_v54 = vsel %vm1019_vm15, %v2847_v29, 64 }
 0x2fb   : > { %v3347_v40 = vsel %vm490_vm0, %v1035_v54, 2147483647 }
 0x2fc   : > { %v3349_v2 = vpop.xlane.xlu1 %999  ;;  %v1053_v3 = vshra.s32 %v3347_v40, 16  ;;  %v3354_v1 = vpop.xlane.xlu0 %996 }
 0x2fd   : > { %vm1028_vm2 = vcmp.eq.f32.partialorder %v3164_v58, %v3349_v2  ;;  %vm1027_vm1 = vcmp.eq.f32.partialorder %v3170_v50, %v3354_v1  ;;  %v1052_v50 = vand.u32 65535, %v3347_v40 }
 0x2fe   : > { %v1044_v15 = vsel %vm1028_vm2, %v2847_v29, 64  ;;  %v3359_v8 = vcvt.s32.f32 %v1053_v3  ;;  %v1043_v49 = vsel %vm1027_vm1, %v2847_v29, 64 }
 0x2ff   : > { %v3362_v13 = vsel %vm490_vm0, %v1044_v15, 2147483647  ;;  %v3368_v24 = vsel %vm490_vm0, %v1043_v49, 2147483647 }
 0x300   : > { %1056 = vmin.xlane.f32.xlu0 %v3359_v8  ;;  %v1188_v28 = vshra.s32 %v3362_v13, 16  ;;  %v3370_v34 = vpop.xlane.xlu0 %978  ;;  %v1173_v10 = vshra.s32 %v3368_v24, 16  ;;  %v1187_v58 = vand.u32 65535, %v3362_v13 }
 0x301   : > { %vm1021_vm15 = vcmp.eq.f32.partialorder %v3187_v44, %v3370_v34  ;;  %v3378_v51 = vpop.xlane.xlu1 %981 }
 0x302   : > { %v3375_v55 = vcvt.s32.f32 %v1188_v28  ;;  %v1037_v9 = vsel %vm1021_vm15, %v2847_v29, 64  ;;  %v3380_v52 = vcvt.s32.f32 %v1173_v10  ;;  %vm1022_vm1 = vcmp.eq.f32.partialorder %v3202_v11, %v3378_v51 }
 0x303   : > { %v3386_v36 = vsel %vm490_vm0, %v1037_v9, 2147483647  ;;  %v1038_v39 = vsel %vm1022_vm1, %v2847_v29, 64  ;;  %v1189_v63 = vcvt.s32.f32 %v1187_v58  ;;  %v1310_v32 = vmax.f32 %v3378_v51, 1e-16 }
 0x304   : > { %1191 = vmin.xlane.f32.xlu1 %v3375_v55  ;;  %1176 = vmin.xlane.f32.xlu0 %v3380_v52  ;;  %v1083_v45 = vshra.s32 %v3386_v36, 16  ;;  %v3392_v43 = vsel %vm490_vm0, %v1038_v39, 2147483647 }
 0x305   : > { %v3394_v37 = vpop.xlane.xlu0 %1002  ;;  %v3396_v54 = vpop.xlane.xlu1 %1005  ;;  %v1098_v15 = vshra.s32 %v3392_v43, 16 }
 0x306   : > { %vm1029_vm2 = vcmp.eq.f32.partialorder %v3220_v16, %v3394_v37  ;;  %v3400_v3 = vcvt.s32.f32 %v1083_v45  ;;  %vm1030_vm15 = vcmp.eq.f32.partialorder %v3214_v48, %v3396_v54  ;;  %v1317_v19 = vmax.f32 %v3394_v37, 1e-16 }
 0x307   : > { %v1045_v49 = vsel %vm1029_vm2, %v2847_v29, 64  ;;  %v1046_v28 = vsel %vm1030_vm15, %v2847_v29, 64  ;;  %v3408_v10 = vcvt.s32.f32 %v1098_v15 }
 0x308   : > { %1086 = vmin.xlane.f32.xlu0 %v3400_v3  ;;  %v3411_v9 = vsel %vm490_vm0, %v1045_v49, 2147483647  ;;  %v3414_v39 = vsel %vm490_vm0, %v1046_v28, 2147483647 }
 0x309   : > { %v1203_v45 = vshra.s32 %v3411_v9, 16  ;;  %1101 = vmin.xlane.f32.xlu1 %v3408_v10  ;;  %v1218_v21 = vshra.s32 %v3414_v39, 16 }
 0x30a   : > { %v3418_v25 = vpop.xlane.xlu0 %984 }
 0x30b   : > { %4525 = vst [vmem:[#allocation37_spill] sm:$0xff] %v3418_v25  ;;  %vm1023_vm1 = vcmp.eq.f32.partialorder %v3234_v23, %v3418_v25  ;;  %v3423_v20 = vcvt.s32.f32 %v1203_v45  ;;  %v3426_v49 = vcvt.s32.f32 %v1218_v21  ;;  %v1172_v25 = vand.u32 65535, %v3368_v24 }
 0x30c   : > { %v1039_v15 = vsel %vm1023_vm1, %v2847_v29, 64 }
 0x30d   : > { %v3429_v28 = vsel %vm490_vm0, %v1039_v15, 2147483647  ;;  %1206 = vmin.xlane.f32.xlu0 %v3423_v20  ;;  %1221 = vmin.xlane.f32.xlu1 %v3426_v49 }
 0x30e   : > { %v1113_v38 = vshra.s32 %v3429_v28, 16 }
 0x310   : > { %v3434_v6 = vcvt.s32.f32 %v1113_v38 }
 0x312   : > { %1116 = vmin.xlane.f32.xlu0 %v3434_v6 }
 0x317   : > { %v3437_v12 = vpop.xlane.xlu1 %987 }
 0x318   : > { %4526 = vst [vmem:[#allocation38_spill] sm:$0xff] %v3437_v12  ;;  %vm1024_vm2 = vcmp.eq.f32.partialorder %v3250_v5, %v3437_v12 }
 0x319   : > { %v1040_v21 = vsel %vm1024_vm2, %v2847_v29, 64 }
 0x31a   : > { %v3443_v45 = vsel %vm490_vm0, %v1040_v21, 2147483647 }
 0x31b   : > { %v3445_v15 = vpop.xlane.xlu1 %1011  ;;  %v3447_v14 = vpop.xlane.xlu0 %1008  ;;  %v1128_v23 = vshra.s32 %v3443_v45, 16 }
 0x31c   : > { %4527 = vst [vmem:[#allocation39_spill] sm:$0xff] %v3445_v15  ;;  %4528 = vst [vmem:[#allocation40_spill] sm:$0xff] %v3447_v14  ;;  %vm1032_vm15 = vcmp.eq.f32.partialorder %v3266_v57, %v3445_v15  ;;  %vm1031_vm1 = vcmp.eq.f32.partialorder %v3272_v35, %v3447_v14 }
 0x31d   : > { %v1048_v38 = vsel %vm1032_vm15, %v2847_v29, 64  ;;  %v1047_v5 = vsel %vm1031_vm1, %v2847_v29, 64  ;;  %v3456_v12 = vcvt.s32.f32 %v1128_v23 }
 0x31e   : > { %v3459_v21 = vsel %vm490_vm0, %v1048_v38, 2147483647  ;;  %v3462_v26 = vsel %vm490_vm0, %v1047_v5, 2147483647 }
 0x31f   : > { %1131 = vmin.xlane.f32.xlu1 %v3456_v12  ;;  %v1248_v48 = vshra.s32 %v3459_v21, 16  ;;  %v1233_v57 = vshra.s32 %v3462_v26, 16 }
 0x320   : > { %v3467_v15 = vpop.xlane.xlu0 %990 }
 0x321   : > { %4529 = vst [vmem:[#allocation41_spill] sm:$0xff] %v3467_v15  ;;  %vm1025_vm2 = vcmp.eq.f32.partialorder %v3286_v60, %v3467_v15  ;;  %v3471_v35 = vcvt.s32.f32 %v1248_v48  ;;  %v3473_v23 = vcvt.s32.f32 %v1233_v57 }
 0x322   : > { %v1041_v38 = vsel %vm1025_vm2, %v2847_v29, 64 }
 0x323   : > { %v3477_v5 = vsel %vm490_vm0, %v1041_v38, 2147483647  ;;  %1251 = vmin.xlane.f32.xlu1 %v3471_v35  ;;  %1236 = vmin.xlane.f32.xlu0 %v3473_v23 }
 0x324   : > { %v1143_v14 = vshra.s32 %v3477_v5, 16 }
 0x326   : > { %v3482_v16 = vcvt.s32.f32 %v1143_v14 }
 0x328   : > { %1146 = vmin.xlane.f32.xlu0 %v3482_v16 }
 0x32d   : > { %v3485_v60 = vpop.xlane.xlu1 %993 }
 0x32e   : > { %4530 = vst [vmem:[#allocation42_spill] sm:$0xff] %v3485_v60  ;;  %vm1026_vm15 = vcmp.eq.f32.partialorder %v3301_v17, %v3485_v60 }
 0x32f   : > { %v1042_v48 = vsel %vm1026_vm15, %v2847_v29, 64 }
 0x330   : > { %v3491_v57 = vsel %vm490_vm0, %v1042_v48, 2147483647 }
 0x331   : > { %v3493_v38 = vpop.xlane.xlu1 %1017  ;;  %v3495_v15 = vpop.xlane.xlu0 %1014  ;;  %v1158_v11 = vshra.s32 %v3491_v57, 16 }
 0x332   : > { %4531 = vst [vmem:[#allocation43_spill] sm:$0xff] %v3493_v38  ;;  %4532 = vst [vmem:[#allocation44_spill] sm:$0xff] %v3495_v15  ;;  %vm1034_vm1 = vcmp.eq.f32.partialorder %v3317_v31, %v3493_v38  ;;  %vm1033_vm2 = vcmp.eq.f32.partialorder %v3323_v59, %v3495_v15 }
 0x333   : > { %v1050_v14 = vsel %vm1034_vm1, %v2847_v29, 64  ;;  %v1049_v17 = vsel %vm1033_vm2, %v2847_v29, 64  ;;  %v3504_v60 = vcvt.s32.f32 %v1158_v11  ;;  %v1067_v11 = vand.u32 65535, %v3335_v27 }
 0x334   : > { %v3507_v48 = vsel %vm490_vm0, %v1050_v14, 2147483647  ;;  %v3510_v44 = vsel %vm490_vm0, %v1049_v17, 2147483647 }
 0x335   : > { %1161 = vmin.xlane.f32.xlu1 %v3504_v60  ;;  %v1278_v4 = vshra.s32 %v3507_v48, 16  ;;  %v1263_v31 = vshra.s32 %v3510_v44, 16  ;;  %v1069_v17 = vcvt.s32.f32 %v1067_v11 }
 0x337   : > { %v3515_v38 = vcvt.s32.f32 %v1278_v4  ;;  %v3517_v59 = vcvt.s32.f32 %v1263_v31  ;;  %v1054_v31 = vcvt.s32.f32 %v1052_v50  ;;  %v1174_v50 = vcvt.s32.f32 %v1172_v25 }
 0x339   : > { %1281 = vmin.xlane.f32.xlu1 %v3515_v38  ;;  %1266 = vmin.xlane.f32.xlu0 %v3517_v59 }
 0x380   : > { %v3522_v14 = vpop.xlane.xlu1 %1071 }
 0x381   : > { %vm1073_vm15 = vcmp.eq.f32.partialorder %v3338_v30, %v3522_v14  ;;  %v1082_v30 = vand.u32 65535, %v3386_v36  ;;  %v1202_v36 = vand.u32 65535, %v3411_v9  ;;  %v1112_v9 = vand.u32 65535, %v3429_v28 }
 0x382   : > { %v1074_v15 = vsel %vm1073_vm15, %v1069_v17, inf }
 0x383   : > { %1075 = vmin.xlane.f32.xlu1 %v1074_v15  ;;  %v1084_v58 = vcvt.s32.f32 %v1082_v30 }
 0x38d   : > { %v3527_v4 = vpop.xlane.xlu0 %1056 }
 0x38e   : > { %vm1058_vm1 = vcmp.eq.f32.partialorder %v3359_v8, %v3527_v4  ;;  %v1097_v8 = vand.u32 65535, %v3392_v43 }
 0x38f   : > { %v1059_v27 = vsel %vm1058_vm1, %v1054_v31, inf  ;;  %v1204_v31 = vcvt.s32.f32 %v1202_v36 }
 0x390   : > { %1060 = vmin.xlane.f32.xlu0 %v1059_v27  ;;  %v1099_v17 = vcvt.s32.f32 %v1097_v8  ;;  %v1247_v8 = vand.u32 65535, %v3459_v21 }
 0x391   : > { %v3533_v11 = vpop.xlane.xlu1 %1191  ;;  %v3538_v40 = vpop.xlane.xlu0 %1176 }
 0x392   : > { %vm1193_vm2 = vcmp.eq.f32.partialorder %v3375_v55, %v3533_v11  ;;  %vm1178_vm15 = vcmp.eq.f32.partialorder %v3380_v52, %v3538_v40  ;;  %v1217_v52 = vand.u32 65535, %v3414_v39 }
 0x393   : > { %v1194_v13 = vsel %vm1193_vm2, %v1189_v63, inf  ;;  %v1179_v24 = vsel %vm1178_vm15, %v1174_v50, inf  ;;  %v1114_v50 = vcvt.s32.f32 %v1112_v9 }
 0x394   : > { %1195 = vmin.xlane.f32.xlu1 %v1194_v13  ;;  %1180 = vmin.xlane.f32.xlu0 %v1179_v24 }
 0x395   : > { %v3543_v15 = vpop.xlane.xlu0 %1086 }
 0x396   : > { %vm1088_vm1 = vcmp.eq.f32.partialorder %v3400_v3, %v3543_v15  ;;  %v3548_v55 = vpop.xlane.xlu1 %1101  ;;  %v1219_v3 = vcvt.s32.f32 %v1217_v52 }
 0x397   : > { %v1089_v25 = vsel %vm1088_vm1, %v1084_v58, inf  ;;  %vm1103_vm2 = vcmp.eq.f32.partialorder %v3408_v10, %v3548_v55 }
 0x398   : > { %1090 = vmin.xlane.f32.xlu0 %v1089_v25  ;;  %v1104_v63 = vsel %vm1103_vm2, %v1099_v17, inf }
 0x399   : > { %1105 = vmin.xlane.f32.xlu1 %v1104_v63 }
 0x39a   : > { %v3553_v43 = vpop.xlane.xlu0 %1206  ;;  %v3555_v27 = vpop.xlane.xlu1 %1221 }
 0x39b   : > { %vm1208_vm15 = vcmp.eq.f32.partialorder %v3423_v20, %v3553_v43  ;;  %vm1223_vm1 = vcmp.eq.f32.partialorder %v3426_v49, %v3555_v27  ;;  %v1127_v20 = vand.u32 65535, %v3443_v45  ;;  %v1232_v49 = vand.u32 65535, %v3462_v26 }
 0x39c   : > { %v1209_v39 = vsel %vm1208_vm15, %v1204_v31, inf  ;;  %v1224_v30 = vsel %vm1223_vm1, %v1219_v3, inf  ;;  %v1142_v45 = vand.u32 65535, %v3477_v5  ;;  %v1157_v31 = vand.u32 65535, %v3491_v57 }
 0x39d   : > { %1210 = vmin.xlane.f32.xlu0 %v1209_v39  ;;  %1225 = vmin.xlane.f32.xlu1 %v1224_v30  ;;  %v1129_v28 = vcvt.s32.f32 %v1127_v20  ;;  %v1234_v17 = vcvt.s32.f32 %v1232_v49  ;;  %v1262_v5 = vand.u32 65535, %v3510_v44  ;;  %v828_v44 = vmax.f32 %v2849_v41, 1e-16  ;;  %v4533_v49 = vld [vmem:[#allocation2_spill] sm:$0xff] }
 0x39e   : > { %v1144_v52 = vcvt.s32.f32 %v1142_v45  ;;  %v1159_v3 = vcvt.s32.f32 %v1157_v31  ;;  %v827_v20 = vmax.f32 %v2865_v18, 1e-16  ;;  %v4473_v18 = vmov 0.0   ;;  %v4535_v45 = vld [vmem:[#allocation4_spill] sm:$0xff] }
 0x39f   : > { %v3562_v10 = vpop.xlane.xlu0 %1116  ;;  %2519 = vrcp.f32 %v828_v44  ;;  %v2292_v42 = vsel %vm813_vm7, 1.0, %v4473_v18  ;;  %v3678_v37 = vsel %vm814_vm8, 1.0, %v4473_v18 }
 0x3a0   : > { %vm1118_vm2 = vcmp.eq.f32.partialorder %v3434_v6, %v3562_v10  ;;  %v1249_v6 = vcvt.s32.f32 %v1247_v8 }
 0x3a1   : > { %v1119_v13 = vsel %vm1118_vm2, %v1114_v50, inf  ;;  %v1264_v50 = vcvt.s32.f32 %v1262_v5 }
 0x3a2   : > { %1120 = vmin.xlane.f32.xlu0 %v1119_v13  ;;  %v835_v13 = vmax.f32 %v2858_v47, 1e-16 }
 0x3ac   : > { %v3567_v24 = vpop.xlane.xlu1 %1131 }
 0x3ad   : > { %vm1133_vm15 = vcmp.eq.f32.partialorder %v3456_v12, %v3567_v24 }
 0x3ae   : > { %v1134_v58 = vsel %vm1133_vm15, %v1129_v28, inf  ;;  %v1078_v28 = vcvt.f32.s32 %v3522_v14  ;;  %v1307_v14 = vmax.f32 %v3341_v33, 1e-16  ;;  %v1316_v33 = vmax.f32 %v3349_v2, 1e-16 }
 0x3af   : > { %1135 = vmin.xlane.f32.xlu1 %v1134_v58  ;;  %v830_v58 = vmax.f32 %v4533_v49, 1e-16  ;;  %v1183_v49 = vcvt.f32.s32 %v3538_v40  ;;  %v1093_v40 = vcvt.f32.s32 %v3543_v15 }
 0x3b0   : > { %v3573_v36 = vpop.xlane.xlu1 %1251  ;;  %v3575_v25 = vpop.xlane.xlu0 %1236  ;;  %v1079_v41 = vshll.u32 %v1078_v28, 16 }
 0x3b1   : > { %vm1253_vm1 = vcmp.eq.f32.partialorder %v3471_v35, %v3573_v36  ;;  %vm1238_vm2 = vcmp.eq.f32.partialorder %v3473_v23, %v3575_v25  ;;  %v1277_v23 = vand.u32 65535, %v3507_v48 }
 0x3b2   : > { %v1254_v26 = vsel %vm1253_vm1, %v1249_v6, inf  ;;  %v1239_v21 = vsel %vm1238_vm2, %v1234_v17, inf }
 0x3b3   : > { %1255 = vmin.xlane.f32.xlu1 %v1254_v26  ;;  %1240 = vmin.xlane.f32.xlu0 %v1239_v21  ;;  %v837_v26 = vmax.f32 %v4535_v45, 1e-16 }
 0x3b5   : > { %v3582_v12 = vpop.xlane.xlu0 %1146 }
 0x3b6   : > { %vm1148_vm15 = vcmp.eq.f32.partialorder %v3482_v16, %v3582_v12  ;;  %v1279_v16 = vcvt.s32.f32 %v1277_v23 }
 0x3b7   : > { %v1149_v63 = vsel %vm1148_vm15, %v1144_v52, inf  ;;  %v4536_v52 = vld [vmem:[#allocation5_spill] sm:$0xff] }
 0x3b8   : > { %1150 = vmin.xlane.f32.xlu0 %v1149_v63  ;;  %v831_v63 = vmax.f32 %v4536_v52, 1e-16 }
 0x3c2   : > { %v3587_v35 = vpop.xlane.xlu1 %1161 }
 0x3c3   : > { %vm1163_vm1 = vcmp.eq.f32.partialorder %v3504_v60, %v3587_v35  ;;  %v1308_v60 = vmax.f32 %v3329_v7, 1e-16  ;;  %v4534_v7 = vld [vmem:[#allocation3_spill] sm:$0xff] }
 0x3c4   : > { %v1164_v9 = vsel %vm1163_vm1, %v1159_v3, inf  ;;  %v838_v17 = vmax.f32 %v4534_v7, 1e-16  ;;  %v1108_v7 = vcvt.f32.s32 %v3548_v55 }
 0x3c5   : > { %1165 = vmin.xlane.f32.xlu1 %v1164_v9  ;;  %2521 = vrcp.f32 %v1308_v60  ;;  %v1315_v9 = vmax.f32 %v3354_v1, 1e-16  ;;  %v2299_v1 = vsel %vm820_vm5, 1.0, %v4473_v18 }
 0x3c6   : > { %v3593_v39 = vpop.xlane.xlu1 %1281  ;;  %v3595_v30 = vpop.xlane.xlu0 %1266  ;;  %2523 = vrcp.f32 %v835_v13 }
 0x3c7   : > { %vm1283_vm2 = vcmp.eq.f32.partialorder %v3515_v38, %v3593_v39  ;;  %vm1268_vm15 = vcmp.eq.f32.partialorder %v3517_v59, %v3595_v30  ;;  %v836_v38 = vmax.f32 %v2877_v53, 1e-16  ;;  %v829_v59 = vmax.f32 %v2890_v61, 1e-16  ;;  %v3615_v61 = vpop.eup %2519 }
 0x3c8   : > { %v1284_v57 = vsel %vm1283_vm2, %v1279_v16, inf  ;;  %v1269_v48 = vsel %vm1268_vm15, %v1264_v50, inf  ;;  %2525 = vrcp.f32 %v827_v20  ;;  %v2291_v53 = vsel %vm812_vm3, 1.0, %v4473_v18 }
 0x3c9   : > { %1285 = vmin.xlane.f32.xlu1 %v1284_v57  ;;  %1270 = vmin.xlane.f32.xlu0 %v1269_v48  ;;  %2527 = vrcp.f32 %v836_v38  ;;  %v908_v3 = vmul.f32 %v3615_v61, %v2291_v53  ;;  %v1063_v50 = vcvt.f32.s32 %v3527_v4  ;;  %v2298_v48 = vsel %vm819_vm6, 1.0, %v4473_v18 }
 0x3ca   : > { %2529 = vrcp.f32 %v829_v59  ;;  %v1309_v4 = vmax.f32 %v3370_v34, 1e-16  ;;  %v1198_v38 = vcvt.f32.s32 %v3533_v11  ;;  %v1318_v11 = vmax.f32 %v3396_v54, 1e-16 }
 0x3cb   : > { %2531 = vrcp.f32 %v830_v58  ;;  %v1064_v28 = vshll.u32 %v1063_v50, 16 }
 0x3cc   : > { %2533 = vrcp.f32 %v838_v17  ;;  %v1199_v17 = vshll.u32 %v1198_v38, 16 }
 0x3cd   : > { %2535 = vrcp.f32 %v1307_v14  ;;  %v1184_v14 = vshll.u32 %v1183_v49, 16  ;;  %v4540_v49 = vld [vmem:[#allocation15_spill] sm:$0xff] }
 0x3ce   : > { %2537 = vrcp.f32 %v837_v26  ;;  %v4537_v26 = vld [vmem:[#allocation13_spill] sm:$0xff] }
 0x3cf   : > { %v3619_v21 = vpop.eup %2521  ;;  %2539 = vrcp.f32 %v831_v63 }
 0x3d0   : > { %v3632_v16 = vpop.eup %2523  ;;  %2541 = vrcp.f32 %v1316_v33  ;;  %v4538_v33 = vld [vmem:[#allocation37_spill] sm:$0xff] }
 0x3d1   : > { %2543 = vrcp.f32 %v1315_v9  ;;  %v3666_v34 = vmul.f32 %v3632_v16, %v2298_v48  ;;  %v1109_v9 = vshll.u32 %v1108_v7, 16  ;;  %v1213_v48 = vcvt.f32.s32 %v3553_v43 }
 0x3d2   : > { %v3641_v57 = vpop.eup %2525  ;;  %2545 = vrcp.f32 %v1309_v4 }
 0x3d3   : > { %v3656_v44 = vpop.eup %2527  ;;  %2547 = vrcp.f32 %v1310_v32 }
 0x3d4   : > { %v3660_v20 = vpop.eup %2529  ;;  %v916_v59 = vmul.f32 %v3656_v44, %v2299_v1  ;;  %2549 = vrcp.f32 %v1317_v19  ;;  %v1228_v1 = vcvt.f32.s32 %v3555_v27  ;;  %v4539_v19 = vld [vmem:[#allocation14_spill] sm:$0xff] }
 0x3d5   : > { %v3672_v51 = vpop.eup %2531  ;;  %2551 = vrcp.f32 %v1318_v11 }
 0x410   : > { %v1076_v8 = vpop.xlane.xlu1 %1075 }
 0x411   : > { %v1077_v6 = vcvt.f32.s32 %v1076_v8  ;;  %v3669_v8 = vmul.f32 %v3660_v20, %v2292_v42 }
 0x413   : > { %v1080_v47 = vadd.s32 %v1079_v41, %v1077_v6  ;;  %v3681_v41 = vpop.eup %2533  ;;  %v3687_v6 = vsel %vm822_vm9, 1.0, %v4473_v18 }
 0x414   : > { %v3692_v54 = vpop.eup %2535 }
 0x415   : > { %vm1292_vm1 = vcmp.eq.s32.totalorder %v2847_v29, %v1080_v47  ;;  %v3698_v63 = vpop.eup %2537 }
 0x416   : > { %v3623_v31 = vsel %vm1292_vm1, inf, %v3130_v46  ;;  %v2307_v56 = vsel %vm1292_vm1, 1.0, %v4473_v18  ;;  %v2290_v46 = vsel %vm811_vm4, 1.0, %v4473_v18 }
 0x417   : > { %v1454_v23 = vsel %vm490_vm0, %v3623_v31, inf  ;;  %v1388_v5 = vmul.f32 %v3619_v21, %v2307_v56  ;;  %v907_v60 = vmul.f32 %v3641_v57, %v2290_v46 }
 0x418   : > { %1455 = vmin.xlane.f32.xlu1 %v1454_v23  ;;  %v1311_v23 = vmax.f32 %v4538_v33, 1e-16 }
 0x419   : > { %v3639_v2 = vadd.f32 %v1388_v5, %v908_v3  ;;  %v3703_v3 = vpop.eup %2539  ;;  %v1094_v5 = vshll.u32 %v1093_v40, 16 }
 0x41a   : > { %v3706_v50 = vpop.eup %2541  ;;  %2553 = vrcp.f32 %v1311_v23 }
 0x41b   : > { %v3713_v32 = vpop.eup %2543 }
 0x41d   : > { %v1061_v13 = vpop.xlane.xlu0 %1060 }
 0x41e   : > { %v1062_v22 = vcvt.f32.s32 %v1061_v13 }
 0x420   : > { %v1065_v58 = vadd.s32 %v1064_v28, %v1062_v22 }
 0x421   : > { %v1196_v0 = vpop.xlane.xlu1 %1195  ;;  %v1181_v53 = vpop.xlane.xlu0 %1180 }
 0x422   : > { %v1197_v47 = vcvt.f32.s32 %v1196_v0  ;;  %vm1291_vm3 = vcmp.eq.s32.totalorder %v2847_v29, %v1065_v58  ;;  %v1182_v45 = vcvt.f32.s32 %v1181_v53  ;;  %v2300_v53 = vsel %vm821_vm10, 1.0, %v4473_v18 }
 0x423   : > { %v3695_v62 = vsel %vm1291_vm3, inf, %v4537_v26  ;;  %v2306_v52 = vsel %vm1291_vm3, 1.0, %v4473_v18 }
 0x424   : > { %v1200_v15 = vadd.s32 %v1199_v17, %v1197_v47  ;;  %v1451_v55 = vsel %vm490_vm0, %v3695_v62, inf  ;;  %v1387_v56 = vmul.f32 %v3692_v54, %v2306_v52  ;;  %v1185_v46 = vadd.s32 %v1184_v14, %v1182_v45  ;;  %v3730_v17 = vpop.eup %2545 }
 0x425   : > { %1452 = vmin.xlane.f32.xlu0 %v1451_v55  ;;  %v1091_v42 = vpop.xlane.xlu0 %1090  ;;  %v1214_v14 = vshll.u32 %v1213_v48, 16  ;;  %v3738_v26 = vpop.eup %2547  ;;  %v1229_v52 = vshll.u32 %v1228_v1, 16  ;;  %v4544_v48 = vld [vmem:[#allocation16_spill] sm:$0xff] }
 0x426   : > { %vm1300_vm4 = vcmp.eq.s32.totalorder %v2847_v29, %v1200_v15  ;;  %v3711_v4 = vadd.f32 %v1387_v56, %v907_v60  ;;  %v1092_v13 = vcvt.f32.s32 %v1091_v42  ;;  %vm1299_vm5 = vcmp.eq.s32.totalorder %v2847_v29, %v1185_v46  ;;  %v1106_v22 = vpop.xlane.xlu1 %1105  ;;  %v3744_v33 = vpop.eup %2549 }
 0x427   : > { %v3716_v28 = vsel %vm1300_vm4, inf, %v4539_v19  ;;  %v2315_v38 = vsel %vm1300_vm4, 1.0, %v4473_v18  ;;  %v3724_v11 = vsel %vm1299_vm5, inf, %v4540_v49  ;;  %v2314_v60 = vsel %vm1299_vm5, 1.0, %v4473_v18 }
 0x428   : > { %v1478_v27 = vsel %vm490_vm0, %v3716_v28, inf  ;;  %v1396_v43 = vmul.f32 %v3706_v50, %v2315_v38  ;;  %v1095_v58 = vadd.s32 %v1094_v5, %v1092_v13  ;;  %v1107_v40 = vcvt.f32.s32 %v1106_v22  ;;  %v4545_v38 = vld [vmem:[#allocation18_spill] sm:$0xff] }
 0x429   : > { %1479 = vmin.xlane.f32.xlu1 %v1478_v27  ;;  %v1475_v7 = vsel %vm490_vm0, %v3724_v11, inf  ;;  %v1395_v0 = vmul.f32 %v3713_v32, %v2314_v60  ;;  %v1123_v5 = vcvt.f32.s32 %v3562_v10  ;;  %v910_v10 = vmul.f32 %v3672_v51, %v3678_v37 }
 0x42a   : > { %1476 = vmin.xlane.f32.xlu0 %v1475_v7  ;;  %v3736_v45 = vadd.f32 %v1396_v43, %v916_v59  ;;  %v1110_v15 = vadd.s32 %v1109_v9, %v1107_v40  ;;  %v1211_v55 = vpop.xlane.xlu0 %1210  ;;  %vm1293_vm6 = vcmp.eq.s32.totalorder %v2847_v29, %v1095_v58  ;;  %v1226_v46 = vpop.xlane.xlu1 %1225  ;;  %v918_v40 = vmul.f32 %v3681_v41, %v3687_v6 }
 0x42b   : > { %v3742_v56 = vadd.f32 %v1395_v0, %v3666_v34  ;;  %v1212_v23 = vcvt.f32.s32 %v1211_v55  ;;  %v3748_v42 = vsel %vm1293_vm6, inf, %v4544_v48  ;;  %v2308_v59 = vsel %vm1293_vm6, 1.0, %v4473_v18  ;;  %v3755_v34 = vpop.eup %2551 }
 0x42c   : > { %4542 = vst [vmem:[#allocation2_spill] sm:$0xff] %v3736_v45  ;;  %v1227_v13 = vcvt.f32.s32 %v1226_v46  ;;  %v1457_v9 = vsel %vm490_vm0, %v3748_v42, inf  ;;  %v1389_v1 = vmul.f32 %v3730_v17, %v2308_v59  ;;  %vm1294_vm7 = vcmp.eq.s32.totalorder %v2847_v29, %v1110_v15  ;;  %v4549_v15 = vld [vmem:[#allocation19_spill] sm:$0xff] }
 0x42d   : > { %4543 = vst [vmem:[#allocation3_spill] sm:$0xff] %v3742_v56  ;;  %v1215_v19 = vadd.s32 %v1214_v14, %v1212_v23  ;;  %v3760_v22 = vsel %vm1294_vm7, inf, %v4545_v38  ;;  %v2309_v27 = vsel %vm1294_vm7, 1.0, %v4473_v18  ;;  %v917_v37 = vmul.f32 %v3698_v63, %v2300_v53  ;;  %v4552_v38 = vld [vmem:[#allocation38_spill] sm:$0xff]  ;;  %v4578_v56 = vld [vmem:[#allocation12_spill] sm:$0xff] }
 0x42e   : > { %1458 = vmin.xlane.f32.xlu0 %v1457_v9  ;;  %v1230_v43 = vadd.s32 %v1229_v52, %v1227_v13  ;;  %v3764_v49 = vadd.f32 %v1389_v1, %v3669_v8  ;;  %v1460_v60 = vsel %vm490_vm0, %v3760_v22, inf  ;;  %v1390_v58 = vmul.f32 %v3738_v26, %v2309_v27  ;;  %v4548_v8 = vld [vmem:[#allocation20_spill] sm:$0xff]  ;;  %v3790_v13 = vpop.eup %2553  ;;  %v4550_v9 = vld [vmem:[#allocation6_spill] sm:$0xff] }
 0x42f   : > { %v1124_v7 = vshll.u32 %v1123_v5, 16  ;;  %1461 = vmin.xlane.f32.xlu1 %v1460_v60  ;;  %v1121_v0 = vpop.xlane.xlu0 %1120  ;;  %vm1301_vm8 = vcmp.eq.s32.totalorder %v2847_v29, %v1215_v19  ;;  %v832_v1 = vmax.f32 %v4550_v9, 1e-16  ;;  %v2294_v19 = vsel %vm815_vm11, 1.0, %v4473_v18 }
 0x430   : > { %4546 = vst [vmem:[#allocation4_spill] sm:$0xff] %v3764_v49  ;;  %v3773_v47 = vadd.f32 %v1390_v58, %v910_v10  ;;  %v1122_v14 = vcvt.f32.s32 %v1121_v0  ;;  %vm1302_vm9 = vcmp.eq.s32.totalorder %v2847_v29, %v1230_v43  ;;  %v3777_v52 = vsel %vm1301_vm8, inf, %v4548_v8  ;;  %v4555_v58 = vld [vmem:[#allocation7_spill] sm:$0xff]  ;;  %v4556_v0 = vld [vmem:[#allocation22_spill] sm:$0xff]  ;;  %v4561_v10 = vld [vmem:[#allocation9_spill] sm:$0xff] }
 0x431   : > { %v3780_v55 = vsel %vm1302_vm9, inf, %v4549_v15  ;;  %v2317_v6 = vsel %vm1302_vm9, 1.0, %v4473_v18  ;;  %v1481_v53 = vsel %vm490_vm0, %v3777_v52, inf  ;;  %v2316_v5 = vsel %vm1301_vm8, 1.0, %v4473_v18  ;;  %v4574_v49 = vld [vmem:[#allocation42_spill] sm:$0xff] }
 0x432   : > { %4547 = vst [vmem:[#allocation5_spill] sm:$0xff] %v3773_v47  ;;  %v1125_v46 = vadd.s32 %v1124_v7, %v1122_v14  ;;  %v1484_v23 = vsel %vm490_vm0, %v3780_v55, inf  ;;  %v1398_v48 = vmul.f32 %v3755_v34, %v2317_v6  ;;  %1482 = vmin.xlane.f32.xlu0 %v1481_v53  ;;  %v1397_v59 = vmul.f32 %v3744_v33, %v2316_v5  ;;  %v4558_v5 = vld [vmem:[#allocation39_spill] sm:$0xff] }
 0x433   : > { %1485 = vmin.xlane.f32.xlu1 %v1484_v23  ;;  %v1312_v27 = vmax.f32 %v4552_v38, 1e-16  ;;  %v840_v7 = vmax.f32 %v4555_v58, 1e-16  ;;  %v911_v15 = vmul.f32 %v3703_v3, %v2294_v19  ;;  %2555 = vrcp.f32 %v832_v1  ;;  %v4562_v38 = vld [vmem:[#allocation41_spill] sm:$0xff] }
 0x434   : > { %v3798_v43 = vadd.f32 %v1398_v48, %v918_v40  ;;  %v3800_v60 = vadd.f32 %v1397_v59, %v917_v37  ;;  %vm1295_vm10 = vcmp.eq.s32.totalorder %v2847_v29, %v1125_v46  ;;  %v4557_v40 = vld [vmem:[#allocation8_spill] sm:$0xff]  ;;  %v1320_v46 = vmax.f32 %v4558_v5, 1e-16 }
 0x435   : > { %v3805_v14 = vsel %vm1295_vm10, inf, %v4556_v0  ;;  %v2310_v8 = vsel %vm1295_vm10, 1.0, %v4473_v18  ;;  %v839_v37 = vmax.f32 %v4557_v40, 1e-16  ;;  %2557 = vrcp.f32 %v1312_v27  ;;  %v4560_v48 = vld [vmem:[#allocation40_spill] sm:$0xff] }
 0x436   : > { %4553 = vst [vmem:[#allocation13_spill] sm:$0xff] %v3798_v43  ;;  %4554 = vst [vmem:[#allocation37_spill] sm:$0xff] %v3800_v60  ;;  %v1463_v6 = vsel %vm490_vm0, %v3805_v14, inf  ;;  %v1391_v53 = vmul.f32 %v3790_v13, %v2310_v8  ;;  %2559 = vrcp.f32 %v840_v7  ;;  %v1319_v59 = vmax.f32 %v4560_v48, 1e-16  ;;  %v4571_v43 = vld [vmem:[#allocation29_spill] sm:$0xff] }
 0x437   : > { %1464 = vmin.xlane.f32.xlu0 %v1463_v6  ;;  %v1138_v9 = vcvt.f32.s32 %v3567_v24  ;;  %2561 = vrcp.f32 %v839_v37  ;;  %v833_v19 = vmax.f32 %v4561_v10, 1e-16  ;;  %v1313_v58 = vmax.f32 %v4562_v38, 1e-16  ;;  %v4565_v38 = vld [vmem:[#allocation24_spill] sm:$0xff] }
 0x438   : > { %v3814_v23 = vadd.f32 %v1391_v53, %v911_v15  ;;  %2563 = vrcp.f32 %v1320_v46  ;;  %v1258_v1 = vcvt.f32.s32 %v3573_v36  ;;  %v1243_v0 = vcvt.f32.s32 %v3575_v25 }
 0x439   : > { %2565 = vrcp.f32 %v1319_v59  ;;  %v1139_v8 = vshll.u32 %v1138_v9, 16  ;;  %v2295_v24 = vsel %vm816_vm12, 1.0, %v4473_v18  ;;  %v2303_v40 = vsel %vm824_vm13, 1.0, %v4473_v18 }
 0x43a   : > { %4559 = vst [vmem:[#allocation14_spill] sm:$0xff] %v3814_v23  ;;  %2567 = vrcp.f32 %v833_v19  ;;  %v1259_v36 = vshll.u32 %v1258_v1, 16  ;;  %v1244_v37 = vshll.u32 %v1243_v0, 16  ;;  %v1153_v48 = vcvt.f32.s32 %v3582_v12 }
 0x43b   : > { %2569 = vrcp.f32 %v1313_v58 }
 0x43c   : > { %v1136_v27 = vpop.xlane.xlu1 %1135 }
 0x43d   : > { %v1137_v15 = vcvt.f32.s32 %v1136_v27  ;;  %v3830_v46 = vpop.eup %2555 }
 0x43e   : > { %v912_v19 = vmul.f32 %v3830_v46, %v2295_v24  ;;  %v2302_v24 = vsel %vm823_vm14, 1.0, %v4473_v18  ;;  %vm4572_vm14 = vcmp.eq.s32.totalorder %v2847_v29, %v4571_v43  ;;  %v841_v43 = vmax.f32 %v4578_v56, 1e-16 }
 0x43f   : > { %v1140_v6 = vadd.s32 %v1139_v8, %v1137_v15  ;;  %v3834_v10 = vpop.eup %2557  ;;  %v1288_v56 = vcvt.f32.s32 %v3593_v39 }
 0x440   : > { %v1256_v25 = vpop.xlane.xlu1 %1255  ;;  %v1241_v5 = vpop.xlane.xlu0 %1240 }
 0x441   : > { %v1257_v59 = vcvt.f32.s32 %v1256_v25  ;;  %v1242_v9 = vcvt.f32.s32 %v1241_v5  ;;  %vm1296_vm11 = vcmp.eq.s32.totalorder %v2847_v29, %v1140_v6  ;;  %v3841_v1 = vpop.eup %2559  ;;  %v1154_v25 = vshll.u32 %v1153_v48, 16 }
 0x442   : > { %v3838_v27 = vsel %vm1296_vm11, inf, %v4565_v38  ;;  %v2311_v58 = vsel %vm1296_vm11, 1.0, %v4473_v18  ;;  %v920_v7 = vmul.f32 %v3841_v1, %v2303_v40  ;;  %v3851_v53 = vpop.eup %2561  ;;  %v4568_v40 = vld [vmem:[#allocation27_spill] sm:$0xff] }
 0x443   : > { %v1260_v0 = vadd.s32 %v1259_v36, %v1257_v59  ;;  %v1245_v8 = vadd.s32 %v1244_v37, %v1242_v9  ;;  %v1466_v12 = vsel %vm490_vm0, %v3838_v27, inf  ;;  %v1392_v15 = vmul.f32 %v3834_v10, %v2311_v58  ;;  %v3857_v37 = vpop.eup %2563  ;;  %v4569_v58 = vld [vmem:[#allocation28_spill] sm:$0xff] }
 0x444   : > { %1467 = vmin.xlane.f32.xlu1 %v1466_v12  ;;  %v3866_v6 = vpop.eup %2565 }
 0x445   : > { %v3853_v5 = vadd.f32 %v1392_v15, %v912_v19  ;;  %v1151_v36 = vpop.xlane.xlu0 %1150  ;;  %vm1304_vm12 = vcmp.eq.s32.totalorder %v2847_v29, %v1260_v0  ;;  %vm1303_vm13 = vcmp.eq.s32.totalorder %v2847_v29, %v1245_v8  ;;  %v919_v15 = vmul.f32 %v3851_v53, %v2302_v24 }
 0x446   : > { %v1152_v59 = vcvt.f32.s32 %v1151_v36  ;;  %v3860_v9 = vsel %vm1304_vm12, inf, %v4568_v40  ;;  %v2319_v38 = vsel %vm1304_vm12, 1.0, %v4473_v18  ;;  %v3864_v12 = vsel %vm1303_vm13, inf, %v4569_v58  ;;  %v3876_v58 = vpop.eup %2567 }
 0x447   : > { %4567 = vst [vmem:[#allocation15_spill] sm:$0xff] %v3853_v5  ;;  %v1490_v48 = vsel %vm490_vm0, %v3860_v9, inf  ;;  %v1400_v19 = vmul.f32 %v3857_v37, %v2319_v38  ;;  %v1487_v0 = vsel %vm490_vm0, %v3864_v12, inf  ;;  %v2318_v8 = vsel %vm1303_vm13, 1.0, %v4473_v18  ;;  %v4570_v5 = vld [vmem:[#allocation10_spill] sm:$0xff]  ;;  %v3885_v47 = vpop.eup %2569 }
 0x448   : > { %v1155_v36 = vadd.s32 %v1154_v25, %v1152_v59  ;;  %1491 = vmin.xlane.f32.xlu1 %v1490_v48  ;;  %1488 = vmin.xlane.f32.xlu0 %v1487_v0  ;;  %v1399_v40 = vmul.f32 %v3866_v6, %v2318_v8  ;;  %v834_v23 = vmax.f32 %v4570_v5, 1e-16  ;;  %v2296_v38 = vsel %vm4572_vm14, 1.0, %v4473_v18  ;;  %v4576_v59 = vld [vmem:[#allocation11_spill] sm:$0xff]  ;;  %v4577_v0 = vld [vmem:[#allocation30_spill] sm:$0xff] }
 0x449   : > { %v3883_v60 = vadd.f32 %v1400_v19, %v920_v7  ;;  %v1314_v24 = vmax.f32 %v4574_v49, 1e-16  ;;  %v842_v48 = vmax.f32 %v4576_v59, 1e-16  ;;  %v913_v7 = vmul.f32 %v3876_v58, %v2296_v38 }
 0x44a   : > { %v3888_v25 = vadd.f32 %v1399_v40, %v919_v15  ;;  %vm1297_vm2 = vcmp.eq.s32.totalorder %v2847_v29, %v1155_v36  ;;  %2571 = vrcp.f32 %v834_v23  ;;  %v4579_v15 = vld [vmem:[#allocation43_spill] sm:$0xff]  ;;  %v4580_v36 = vld [vmem:[#allocation44_spill] sm:$0xff]  ;;  %v1273_v23 = vcvt.f32.s32 %v3595_v30 }
 0x44b   : > { %4573 = vst [vmem:[#allocation17_spill] sm:$0xff] %v3883_v60  ;;  %v3893_v8 = vsel %vm1297_vm2, inf, %v4577_v0  ;;  %v2312_v5 = vsel %vm1297_vm2, 1.0, %v4473_v18  ;;  %v1322_v40 = vmax.f32 %v4579_v15, 1e-16  ;;  %2573 = vrcp.f32 %v1314_v24  ;;  %v4583_v24 = vld [vmem:[#allocation31_spill] sm:$0xff] }
 0x44c   : > { %4575 = vst [vmem:[#allocation16_spill] sm:$0xff] %v3888_v25  ;;  %v1469_v19 = vsel %vm490_vm0, %v3893_v8, inf  ;;  %v1393_v49 = vmul.f32 %v3885_v47, %v2312_v5  ;;  %v1321_v59 = vmax.f32 %v4580_v36, 1e-16  ;;  %2575 = vrcp.f32 %v842_v48  ;;  %v4585_v48 = vld [vmem:[#allocation33_spill] sm:$0xff] }
 0x44d   : > { %1470 = vmin.xlane.f32.xlu0 %v1469_v19  ;;  %v1168_v18 = vcvt.f32.s32 %v3587_v35  ;;  %2577 = vrcp.f32 %v841_v43  ;;  %v4582_v15 = vmov 0.0   ;;  %vm4584_vm15 = vcmp.eq.s32.totalorder %v2847_v29, %v4583_v24  ;;  %v4589_v24 = vld [vmem:[#allocation32_spill] sm:$0xff] }
 0x44e   : > { %v3903_v0 = vadd.f32 %v1393_v49, %v913_v7  ;;  %2579 = vrcp.f32 %v1322_v40  ;;  %v2297_v19 = vsel %vm4584_vm15, 1.0, %v4582_v15  ;;  %vm4586_vm1 = vcmp.eq.s32.totalorder %v2847_v29, %v4585_v48 }
 0x44f   : > { %2581 = vrcp.f32 %v1321_v59  ;;  %v1169_v25 = vshll.u32 %v1168_v18, 16  ;;  %v2305_v35 = vsel %vm4586_vm1, 1.0, %v4582_v15  ;;  %v1289_v43 = vshll.u32 %v1288_v56, 16 }
 0x450   : > { %4581 = vst [vmem:[#allocation18_spill] sm:$0xff] %v3903_v0  ;;  %v1274_v18 = vshll.u32 %v1273_v23, 16 }
 0x452   : > { %v1166_v38 = vpop.xlane.xlu1 %1165 }
 0x453   : > { %v1167_v5 = vcvt.f32.s32 %v1166_v38 }
 0x454   : > { %v3916_v39 = vpop.eup %2571 }
 0x455   : > { %v1170_v7 = vadd.s32 %v1169_v25, %v1167_v5  ;;  %v3919_v59 = vpop.eup %2573  ;;  %v914_v38 = vmul.f32 %v3916_v39, %v2297_v19  ;;  %v4587_v25 = vld [vmem:[#allocation34_spill] sm:$0xff] }
 0x456   : > { %v1286_v49 = vpop.xlane.xlu1 %1285  ;;  %v1271_v40 = vpop.xlane.xlu0 %1270  ;;  %vm4588_vm4 = vcmp.eq.s32.totalorder %v2847_v29, %v4587_v25 }
 0x457   : > { %v1287_v36 = vcvt.f32.s32 %v1286_v49  ;;  %v1272_v30 = vcvt.f32.s32 %v1271_v40  ;;  %vm1298_vm3 = vcmp.eq.s32.totalorder %v2847_v29, %v1170_v7  ;;  %v2304_v5 = vsel %vm4588_vm4, 1.0, %v4582_v15  ;;  %v3930_v0 = vpop.eup %2575 }
 0x458   : > { %v3927_v56 = vsel %vm1298_vm3, inf, %v4589_v24  ;;  %v2313_v48 = vsel %vm1298_vm3, 1.0, %v4582_v15  ;;  %4590 = vst [vmem:[#allocation20_spill] sm:$0xff] %v3930_v0  ;;  %v3935_v19 = vpop.eup %2577  ;;  %v922_v60 = vmul.f32 %v3930_v0, %v2305_v35 }
 0x459   : > { %v1290_v23 = vadd.s32 %v1289_v43, %v1287_v36  ;;  %v1275_v49 = vadd.s32 %v1274_v18, %v1272_v30  ;;  %v1472_v7 = vsel %vm490_vm0, %v3927_v56, inf  ;;  %v1394_v40 = vmul.f32 %v3919_v59, %v2313_v48  ;;  %4591 = vst [vmem:[#allocation19_spill] sm:$0xff] %v3935_v19  ;;  %v3938_v25 = vpop.eup %2579  ;;  %v4595_v18 = vld [vmem:[#allocation35_spill] sm:$0xff]  ;;  %v4596_v48 = vld [vmem:[#allocation36_spill] sm:$0xff] }
 0x45a   : > { %1473 = vmin.xlane.f32.xlu1 %v1472_v7  ;;  %4592 = vst [vmem:[#allocation6_spill] sm:$0xff] %v3938_v25  ;;  %v921_v24 = vmul.f32 %v3935_v19, %v2304_v5  ;;  %v3945_v43 = vpop.eup %2581 }
 0x45b   : > { %v3941_v45 = vadd.f32 %v1394_v40, %v914_v38  ;;  %vm1306_vm5 = vcmp.eq.s32.totalorder %v2847_v29, %v1290_v23  ;;  %vm1305_vm6 = vcmp.eq.s32.totalorder %v2847_v29, %v1275_v49  ;;  %4594 = vst [vmem:[#allocation38_spill] sm:$0xff] %v3945_v43 }
 0x45c   : > { %v3948_v36 = vsel %vm1306_vm5, inf, %v4595_v18  ;;  %v2321_v30 = vsel %vm1306_vm5, 1.0, %v4582_v15  ;;  %v3952_v35 = vsel %vm1305_vm6, inf, %v4596_v48  ;;  %v2320_v7 = vsel %vm1305_vm6, 1.0, %v4582_v15 }
 0x45d   : > { %4593 = vst [vmem:[#allocation21_spill] sm:$0xff] %v3941_v45  ;;  %v1496_v38 = vsel %vm490_vm0, %v3948_v36, inf  ;;  %v1402_v5 = vmul.f32 %v3938_v25, %v2321_v30  ;;  %v1493_v23 = vsel %vm490_vm0, %v3952_v35, inf  ;;  %v1401_v49 = vmul.f32 %v3945_v43, %v2320_v7 }
 0x45e   : > { %1497 = vmin.xlane.f32.xlu1 %v1496_v38  ;;  %1494 = vmin.xlane.f32.xlu0 %v1493_v23 }
 0x45f   : > { %v3961_v40 = vadd.f32 %v1402_v5, %v922_v60  ;;  %v3963_v18 = vadd.f32 %v1401_v49, %v921_v24  ;;  %v1420_v60 = vadd.f32 %v3619_v21, %v3615_v61 }
 0x461   : > { %4597 = vst [vmem:[#allocation7_spill] sm:$0xff] %v3961_v40  ;;  %4598 = vst [vmem:[#allocation22_spill] sm:$0xff] %v3963_v18  ;;  %v1427_v40 = vadd.f32 %v3713_v32, %v3632_v16 }
 0x4a5   : > { %v1456_v48 = vpop.xlane.xlu1 %1455 }
 0x4a6   : > { %vm1500_vm7 = vcmp.eq.f32.partialorder %v3623_v31, %v1456_v48  ;;  %v1788_v45 = vmax.f32 %v1456_v48, 1e-16 }
 0x4a7   : > { %v1516_v19 = vsel %vm1500_vm7, %v2847_v29, 64 }
 0x4a8   : > { %v3968_v0 = vsel %vm490_vm0, %v1516_v19, 2147483647  ;;  %2583 = vrcp.f32 %v1788_v45 }
 0x4a9   : > { %v1548_v30 = vshra.s32 %v3968_v0, 16 }
 0x4ab   : > { %v3971_v25 = vcvt.s32.f32 %v1548_v30 }
 0x4ad   : > { %1551 = vmin.xlane.f32.xlu1 %v3971_v25 }
 0x4b2   : > { %v1453_v24 = vpop.xlane.xlu0 %1452  ;;  %v3976_v7 = vpop.eup %2583 }
 0x4b3   : > { %vm1499_vm8 = vcmp.eq.f32.partialorder %v3695_v62, %v1453_v24  ;;  %v1787_v31 = vmax.f32 %v1453_v24, 1e-16  ;;  %v3980_v38 = vadd.f32 %v3976_v7, %v1420_v60 }
 0x4b4   : > { %v1515_v45 = vsel %vm1499_vm8, %v2847_v29, 64 }
 0x4b5   : > { %v3984_v19 = vsel %vm490_vm0, %v1515_v45, 2147483647  ;;  %2585 = vrcp.f32 %v1787_v31 }
 0x4b6   : > { %v1480_v5 = vpop.xlane.xlu1 %1479  ;;  %v1533_v23 = vshra.s32 %v3984_v19, 16 }
 0x4b7   : > { %vm1508_vm9 = vcmp.eq.f32.partialorder %v3716_v28, %v1480_v5  ;;  %v1796_v61 = vmax.f32 %v1480_v5, 1e-16  ;;  %v1477_v21 = vpop.xlane.xlu0 %1476 }
 0x4b8   : > { %v1524_v49 = vsel %vm1508_vm9, %v2847_v29, 64  ;;  %vm1507_vm10 = vcmp.eq.f32.partialorder %v3724_v11, %v1477_v21  ;;  %v1795_v62 = vmax.f32 %v1477_v21, 1e-16  ;;  %v3990_v48 = vcvt.s32.f32 %v1533_v23 }
 0x4b9   : > { %v3993_v30 = vsel %vm490_vm0, %v1524_v49, 2147483647  ;;  %2587 = vrcp.f32 %v1796_v61  ;;  %v1523_v60 = vsel %vm1507_vm10, %v2847_v29, 64  ;;  %v1419_v23 = vadd.f32 %v3692_v54, %v3641_v57 }
 0x4ba   : > { %v3997_v24 = vsel %vm490_vm0, %v1523_v60, 2147483647  ;;  %2589 = vrcp.f32 %v1795_v62  ;;  %1536 = vmin.xlane.f32.xlu0 %v3990_v48  ;;  %v1668_v28 = vshra.s32 %v3993_v30, 16  ;;  %v1428_v54 = vadd.f32 %v3706_v50, %v3656_v44 }
 0x4bb   : > { %v1459_v31 = vpop.xlane.xlu0 %1458  ;;  %v1653_v11 = vshra.s32 %v3997_v24, 16 }
 0x4bc   : > { %vm1501_vm11 = vcmp.eq.f32.partialorder %v3748_v42, %v1459_v31  ;;  %v1789_v45 = vmax.f32 %v1459_v31, 1e-16  ;;  %v4003_v5 = vcvt.s32.f32 %v1668_v28  ;;  %v1462_v21 = vpop.xlane.xlu1 %1461 }
 0x4bd   : > { %v1517_v61 = vsel %vm1501_vm11, %v2847_v29, 64  ;;  %v4008_v49 = vcvt.s32.f32 %v1653_v11  ;;  %vm1502_vm12 = vcmp.eq.f32.partialorder %v3760_v22, %v1462_v21  ;;  %v1790_v60 = vmax.f32 %v1462_v21, 1e-16 }
 0x4be   : > { %v4011_v62 = vsel %vm490_vm0, %v1517_v61, 2147483647  ;;  %2591 = vrcp.f32 %v1789_v45  ;;  %1671 = vmin.xlane.f32.xlu1 %v4003_v5  ;;  %v1518_v28 = vsel %vm1502_vm12, %v2847_v29, 64 }
 0x4bf   : > { %v4015_v42 = vpop.eup %2585  ;;  %1656 = vmin.xlane.f32.xlu0 %v4008_v49  ;;  %v1563_v57 = vshra.s32 %v4011_v62, 16  ;;  %v4026_v11 = vsel %vm490_vm0, %v1518_v28, 2147483647  ;;  %2593 = vrcp.f32 %v1790_v60  ;;  %v1483_v22 = vpop.xlane.xlu0 %1482 }
 0x4c0   : > { %v4023_v31 = vadd.f32 %v4015_v42, %v1419_v23  ;;  %v1486_v45 = vpop.xlane.xlu1 %1485  ;;  %vm1509_vm13 = vcmp.eq.f32.partialorder %v3777_v52, %v1483_v22  ;;  %v1797_v61 = vmax.f32 %v1483_v22, 1e-16  ;;  %v1578_v18 = vshra.s32 %v4026_v11, 16 }
 0x4c1   : > { %v4029_v21 = vcvt.s32.f32 %v1563_v57  ;;  %vm1510_vm14 = vcmp.eq.f32.partialorder %v3780_v55, %v1486_v45  ;;  %v1798_v44 = vmax.f32 %v1486_v45, 1e-16  ;;  %v1525_v50 = vsel %vm1509_vm13, %v2847_v29, 64 }
 0x4c2   : > { %v1526_v60 = vsel %vm1510_vm14, %v2847_v29, 64  ;;  %v4040_v28 = vsel %vm490_vm0, %v1525_v50, 2147483647  ;;  %2595 = vrcp.f32 %v1797_v61  ;;  %v4043_v52 = vcvt.s32.f32 %v1578_v18 }
 0x4c3   : > { %v4036_v23 = vpop.eup %2587  ;;  %1566 = vmin.xlane.f32.xlu0 %v4029_v21  ;;  %v4051_v32 = vsel %vm490_vm0, %v1526_v60, 2147483647  ;;  %2597 = vrcp.f32 %v1798_v44  ;;  %v1683_v55 = vshra.s32 %v4040_v28, 16 }
 0x4c4   : > { %v4045_v57 = vpop.eup %2589  ;;  %v4048_v16 = vadd.f32 %v4036_v23, %v1428_v54  ;;  %1581 = vmin.xlane.f32.xlu1 %v4043_v52  ;;  %v1465_v45 = vpop.xlane.xlu0 %1464  ;;  %v1698_v18 = vshra.s32 %v4051_v32, 16  ;;  %v1421_v54 = vadd.f32 %v3730_v17, %v3660_v20 }
 0x4c5   : > { %v4055_v22 = vadd.f32 %v4045_v57, %v1427_v40  ;;  %vm1503_vm2 = vcmp.eq.f32.partialorder %v3805_v14, %v1465_v45  ;;  %v1791_v61 = vmax.f32 %v1465_v45, 1e-16  ;;  %v4060_v50 = vcvt.s32.f32 %v1683_v55 }
 0x4c6   : > { %v1519_v44 = vsel %vm1503_vm2, %v2847_v29, 64  ;;  %v4065_v60 = vcvt.s32.f32 %v1698_v18  ;;  %v1422_v14 = vadd.f32 %v3738_v26, %v3672_v51  ;;  %v1430_v51 = vadd.f32 %v3755_v34, %v3681_v41 }
 0x4c7   : > { %v4070_v40 = vsel %vm490_vm0, %v1519_v44, 2147483647  ;;  %2599 = vrcp.f32 %v1791_v61  ;;  %1686 = vmin.xlane.f32.xlu0 %v4060_v50  ;;  %v1429_v61 = vadd.f32 %v3744_v33, %v3698_v63 }
 0x4c8   : > { %v4067_v43 = vpop.eup %2591  ;;  %1701 = vmin.xlane.f32.xlu1 %v4065_v60  ;;  %v1593_v20 = vshra.s32 %v4070_v40, 16 }
 0x4c9   : > { %v4076_v55 = vadd.f32 %v4067_v43, %v1421_v54  ;;  %v4080_v17 = vpop.eup %2593 }
 0x4ca   : > { %4599 = vst [vmem:[#allocation8_spill] sm:$0xff] %v4080_v17  ;;  %v4083_v45 = vadd.f32 %v4080_v17, %v1422_v14  ;;  %v4085_v18 = vcvt.s32.f32 %v1593_v20  ;;  %v1423_v20 = vadd.f32 %v3790_v13, %v3703_v3 }
 0x4cc   : > { %v4089_v44 = vpop.eup %2595  ;;  %1596 = vmin.xlane.f32.xlu0 %v4085_v18 }
 0x4cd   : > { %4600 = vst [vmem:[#allocation39_spill] sm:$0xff] %v4089_v44  ;;  %v4094_v26 = vpop.eup %2597  ;;  %v4097_v54 = vadd.f32 %v4089_v44, %v1429_v61 }
 0x4ce   : > { %4601 = vst [vmem:[#allocation40_spill] sm:$0xff] %v4094_v26  ;;  %v4100_v14 = vadd.f32 %v4094_v26, %v1430_v51 }
 0x4d1   : > { %v4104_v17 = vpop.eup %2599  ;;  %v1468_v63 = vpop.xlane.xlu1 %1467 }
 0x4d2   : > { %4602 = vst [vmem:[#allocation9_spill] sm:$0xff] %v4104_v17  ;;  %v4107_v33 = vadd.f32 %v4104_v17, %v1423_v20  ;;  %vm1504_vm15 = vcmp.eq.f32.partialorder %v3838_v27, %v1468_v63  ;;  %v1792_v41 = vmax.f32 %v1468_v63, 1e-16 }
 0x4d3   : > { %v1520_v34 = vsel %vm1504_vm15, %v2847_v29, 64 }
 0x4d4   : > { %v4112_v61 = vsel %vm490_vm0, %v1520_v34, 2147483647  ;;  %2601 = vrcp.f32 %v1792_v41 }
 0x4d5   : > { %v1492_v51 = vpop.xlane.xlu1 %1491  ;;  %v1489_v26 = vpop.xlane.xlu0 %1488  ;;  %v1608_v44 = vshra.s32 %v4112_v61, 16 }
 0x4d6   : > { %vm1512_vm1 = vcmp.eq.f32.partialorder %v3860_v9, %v1492_v51  ;;  %v1800_v3 = vmax.f32 %v1492_v51, 1e-16  ;;  %vm1511_vm3 = vcmp.eq.f32.partialorder %v3864_v12, %v1489_v26  ;;  %v1799_v13 = vmax.f32 %v1489_v26, 1e-16 }
 0x4d7   : > { %v1528_v20 = vsel %vm1512_vm1, %v2847_v29, 64  ;;  %v1527_v27 = vsel %vm1511_vm3, %v2847_v29, 64  ;;  %v4119_v63 = vcvt.s32.f32 %v1608_v44 }
 0x4d8   : > { %v4122_v34 = vsel %vm490_vm0, %v1528_v20, 2147483647  ;;  %2603 = vrcp.f32 %v1800_v3  ;;  %v4125_v41 = vsel %vm490_vm0, %v1527_v27, 2147483647 }
 0x4d9   : > { %2605 = vrcp.f32 %v1799_v13  ;;  %1611 = vmin.xlane.f32.xlu1 %v4119_v63  ;;  %v1728_v9 = vshra.s32 %v4122_v34, 16  ;;  %v1713_v12 = vshra.s32 %v4125_v41, 16  ;;  %v1424_v13 = vadd.f32 %v3834_v10, %v3830_v46 }
 0x4da   : > { %v1471_v26 = vpop.xlane.xlu0 %1470 }
 0x4db   : > { %vm1505_vm4 = vcmp.eq.f32.partialorder %v3893_v8, %v1471_v26  ;;  %v1793_v51 = vmax.f32 %v1471_v26, 1e-16  ;;  %v4131_v44 = vcvt.s32.f32 %v1728_v9  ;;  %v4133_v17 = vcvt.s32.f32 %v1713_v12 }
 0x4dc   : > { %v1521_v3 = vsel %vm1505_vm4, %v2847_v29, 64  ;;  %v1432_v26 = vadd.f32 %v3857_v37, %v3841_v1 }
 0x4dd   : > { %v4137_v20 = vsel %vm490_vm0, %v1521_v3, 2147483647  ;;  %2607 = vrcp.f32 %v1793_v51  ;;  %1731 = vmin.xlane.f32.xlu1 %v4131_v44  ;;  %1716 = vmin.xlane.f32.xlu0 %v4133_v17  ;;  %v1431_v3 = vadd.f32 %v3866_v6, %v3851_v53 }
 0x4de   : > { %v1623_v8 = vshra.s32 %v4137_v20, 16  ;;  %v4144_v27 = vpop.eup %2601 }
 0x4df   : > { %4603 = vst [vmem:[#allocation41_spill] sm:$0xff] %v4144_v27  ;;  %v4147_v9 = vadd.f32 %v4144_v27, %v1424_v13 }
 0x4e0   : > { %v4149_v12 = vcvt.s32.f32 %v1623_v8  ;;  %v1425_v8 = vadd.f32 %v3885_v47, %v3876_v58 }
 0x4e2   : > { %v4153_v51 = vpop.eup %2603  ;;  %1626 = vmin.xlane.f32.xlu0 %v4149_v12 }
 0x4e3   : > { %4604 = vst [vmem:[#allocation23_spill] sm:$0xff] %v4153_v51  ;;  %v4158_v46 = vpop.eup %2605  ;;  %v4161_v10 = vadd.f32 %v4153_v51, %v1432_v26  ;;  %v1547_v51 = vand.u32 65535, %v3968_v0  ;;  %v1652_v0 = vand.u32 65535, %v3997_v24  ;;  %v1577_v24 = vand.u32 65535, %v4026_v11 }
 0x4e4   : > { %4605 = vst [vmem:[#allocation25_spill] sm:$0xff] %v4158_v46  ;;  %v4164_v13 = vadd.f32 %v4158_v46, %v1431_v3 }
 0x4e7   : > { %v4168_v27 = vpop.eup %2607  ;;  %v1474_v1 = vpop.xlane.xlu1 %1473 }
 0x4e8   : > { %4606 = vst [vmem:[#allocation24_spill] sm:$0xff] %v4168_v27  ;;  %v4171_v37 = vadd.f32 %v4168_v27, %v1425_v8  ;;  %vm1506_vm5 = vcmp.eq.f32.partialorder %v3927_v56, %v1474_v1  ;;  %v1794_v53 = vmax.f32 %v1474_v1, 1e-16 }
 0x4e9   : > { %v1522_v6 = vsel %vm1506_vm5, %v2847_v29, 64 }
 0x4ea   : > { %4607 = vst [vmem:[#allocation26_spill] sm:$0xff] %v4171_v37  ;;  %v4176_v26 = vsel %vm490_vm0, %v1522_v6, 2147483647  ;;  %2609 = vrcp.f32 %v1794_v53 }
 0x4eb   : > { %v4178_v3 = vpop.xlane.xlu1 %1497  ;;  %v4180_v46 = vpop.xlane.xlu0 %1494  ;;  %v1638_v47 = vshra.s32 %v4176_v26, 16  ;;  %2611 = vrcp.f32 %v3980_v38 }
 0x4ec   : > { %4608 = vst [vmem:[#allocation27_spill] sm:$0xff] %v4178_v3  ;;  %4609 = vst [vmem:[#allocation28_spill] sm:$0xff] %v4180_v46  ;;  %vm1514_vm6 = vcmp.eq.f32.partialorder %v3948_v36, %v4178_v3  ;;  %vm1513_vm7 = vcmp.eq.f32.partialorder %v3952_v35, %v4180_v46  ;;  %v1532_v46 = vand.u32 65535, %v3984_v19  ;;  %v1654_v19 = vcvt.s32.f32 %v1652_v0 }
 0x4ed   : > { %v1530_v58 = vsel %vm1514_vm6, %v2847_v29, 64  ;;  %v1529_v56 = vsel %vm1513_vm7, %v2847_v29, 64  ;;  %v4189_v8 = vcvt.s32.f32 %v1638_v47  ;;  %v1426_v47 = vadd.f32 %v3919_v59, %v3916_v39 }
 0x4ee   : > { %v4192_v1 = vsel %vm490_vm0, %v1530_v58, 2147483647  ;;  %v4195_v53 = vsel %vm490_vm0, %v1529_v56, 2147483647  ;;  %v1534_v39 = vcvt.s32.f32 %v1532_v46  ;;  %v1667_v59 = vand.u32 65535, %v3993_v30 }
 0x4ef   : > { %1641 = vmin.xlane.f32.xlu1 %v4189_v8  ;;  %v1758_v6 = vshra.s32 %v4192_v1, 16  ;;  %v1743_v36 = vshra.s32 %v4195_v53, 16  ;;  %v1562_v46 = vand.u32 65535, %v4011_v62  ;;  %2613 = vrcp.f32 %v4023_v31 }
 0x4f0   : > { %2615 = vrcp.f32 %v4048_v16 }
 0x4f1   : > { %v4200_v27 = vcvt.s32.f32 %v1758_v6  ;;  %v4202_v35 = vcvt.s32.f32 %v1743_v36  ;;  %v1549_v6 = vcvt.s32.f32 %v1547_v51  ;;  %2617 = vrcp.f32 %v4055_v22 }
 0x4f2   : > { %2619 = vrcp.f32 %v4076_v55 }
 0x4f3   : > { %1761 = vmin.xlane.f32.xlu1 %v4200_v27  ;;  %1746 = vmin.xlane.f32.xlu0 %v4202_v35  ;;  %2621 = vrcp.f32 %v4083_v45 }
 0x4f4   : > { %v4208_v58 = vpop.eup %2609  ;;  %2623 = vrcp.f32 %v4097_v54 }
 0x4f5   : > { %4610 = vst [vmem:[#allocation10_spill] sm:$0xff] %v4208_v58  ;;  %v4211_v56 = vadd.f32 %v4208_v58, %v1426_v47  ;;  %v1669_v58 = vcvt.s32.f32 %v1667_v59  ;;  %v1579_v59 = vcvt.s32.f32 %v1577_v24  ;;  %v1712_v24 = vand.u32 65535, %v4125_v41 }
 0x4f6   : > { %2625 = vrcp.f32 %v4100_v14 }
 0x4f7   : > { %2627 = vrcp.f32 %v4107_v33  ;;  %v4617_v33 = vld [vmem:[#allocation40_spill] sm:$0xff] }
 0x4f8   : > { %2629 = vrcp.f32 %v4147_v9 }
 0x4f9   : > { %2631 = vrcp.f32 %v4161_v10  ;;  %v4624_v10 = vld [vmem:[#allocation26_spill] sm:$0xff] }
 0x4fa   : > { %2633 = vrcp.f32 %v4164_v13 }
 0x4fb   : > { %2635 = vrcp.f32 %v4624_v10 }
 0x4fc   : > { %v4637_v10 = vld [vmem:[#allocation10_spill] sm:$0xff] }
 0x53a   : > { %v4214_v37 = vpop.xlane.xlu1 %1551 }
 0x53b   : > { %vm1553_vm8 = vcmp.eq.f32.partialorder %v3971_v25, %v4214_v37 }
 0x53c   : > { %v1554_v36 = vsel %vm1553_vm8, %v1549_v6, inf }
 0x53d   : > { %1555 = vmin.xlane.f32.xlu1 %v1554_v36  ;;  %v1564_v36 = vcvt.s32.f32 %v1562_v46 }
 0x547   : > { %v4219_v3 = vpop.xlane.xlu0 %1536 }
 0x548   : > { %vm1538_vm9 = vcmp.eq.f32.partialorder %v3990_v48, %v4219_v3 }
 0x549   : > { %v1539_v47 = vsel %vm1538_vm9, %v1534_v39, inf }
 0x54a   : > { %1540 = vmin.xlane.f32.xlu0 %v1539_v47 }
 0x54b   : > { %v4225_v51 = vpop.xlane.xlu1 %1671 }
 0x54c   : > { %vm1673_vm10 = vcmp.eq.f32.partialorder %v4003_v5, %v4225_v51  ;;  %v4229_v25 = vpop.xlane.xlu0 %1656  ;;  %v1682_v5 = vand.u32 65535, %v4040_v28  ;;  %v1592_v28 = vand.u32 65535, %v4070_v40 }
 0x54d   : > { %vm1658_vm11 = vcmp.eq.f32.partialorder %v4008_v49, %v4229_v25  ;;  %v1674_v30 = vsel %vm1673_vm10, %v1669_v58, inf  ;;  %v1697_v49 = vand.u32 65535, %v4051_v32 }
 0x54e   : > { %1675 = vmin.xlane.f32.xlu1 %v1674_v30  ;;  %v1659_v48 = vsel %vm1658_vm11, %v1654_v19, inf  ;;  %v1684_v0 = vcvt.s32.f32 %v1682_v5  ;;  %v1594_v46 = vcvt.s32.f32 %v1592_v28 }
 0x54f   : > { %1660 = vmin.xlane.f32.xlu0 %v1659_v48  ;;  %v1727_v48 = vand.u32 65535, %v4122_v34 }
 0x550   : > { %v4235_v6 = vpop.xlane.xlu0 %1566 }
 0x551   : > { %vm1568_vm12 = vcmp.eq.f32.partialorder %v4029_v21, %v4235_v6  ;;  %v4240_v39 = vpop.xlane.xlu1 %1581  ;;  %v1699_v21 = vcvt.s32.f32 %v1697_v49  ;;  %v1714_v49 = vcvt.s32.f32 %v1712_v24 }
 0x552   : > { %v1569_v62 = vsel %vm1568_vm12, %v1564_v36, inf  ;;  %vm1583_vm13 = vcmp.eq.f32.partialorder %v4043_v52, %v4240_v39  ;;  %v2516_v36 = vld [vmem:[%s4262_s25 + $0x8] sm:$0xff]   ;;  %v1588_v22 = vcvt.f32.s32 %v4240_v39 }
 0x553   : > { %1570 = vmin.xlane.f32.xlu0 %v1569_v62  ;;  %v1584_v11 = vsel %vm1583_vm13, %v1579_v59, inf  ;;  %v1729_v59 = vcvt.s32.f32 %v1727_v48 }
 0x554   : > { %1585 = vmin.xlane.f32.xlu1 %v1584_v11  ;;  %v4245_v58 = vpop.xlane.xlu0 %1686  ;;  %v2517_v11 = vld [vmem:[%s4262_s25 + $0x10] sm:$0xff]  }
 0x555   : > { %v4247_v47 = vpop.xlane.xlu1 %1701  ;;  %vm1688_vm14 = vcmp.eq.f32.partialorder %v4060_v50, %v4245_v58  ;;  %v1607_v50 = vand.u32 65535, %v4112_v61 }
 0x556   : > { %vm1703_vm2 = vcmp.eq.f32.partialorder %v4065_v60, %v4247_v47  ;;  %v1689_v32 = vsel %vm1688_vm14, %v1684_v0, inf  ;;  %v2515_v60 = vld [vmem:[%s4262_s25] sm:$0xff]   ;;  %v2518_v0 = vld [vmem:[%s4262_s25 + $0x18] sm:$0xff]  }
 0x557   : > { %v1704_v52 = vsel %vm1703_vm2, %v1699_v21, inf  ;;  %1690 = vmin.xlane.f32.xlu0 %v1689_v32  ;;  %2446 = vmatprep.subr.bf16.mxu0 %v2515_v60 }
 0x558   : > { %1705 = vmin.xlane.f32.xlu1 %v1704_v52  ;;  %2470 = vmatprep.subr.bf16.mxu1 %v2515_v60  ;;  %v1757_v52 = vand.u32 65535, %v4192_v1 }
 0x559   : > { %v4254_v19 = vpop.xlane.xlu0 %1596  ;;  %2447 = vmatpush3.bf16.msra.mxu0 %v2515_v60  ;;  %2474 = vmatpush3.bf16.msra.mxu1 %v2515_v60 }
 0x55a   : > { %vm1598_vm15 = vcmp.eq.f32.partialorder %v4085_v18, %v4254_v19  ;;  %v1609_v18 = vcvt.s32.f32 %v1607_v50  ;;  %2448 = vmatprep.subr.bf16.mxu0 %v2516_v36  ;;  %2471 = vmatprep.subr.bf16.mxu1 %v2516_v36  ;;  %v1759_v60 = vcvt.s32.f32 %v1757_v52 }
 0x55b   : > { %v1599_v30 = vsel %vm1598_vm15, %v1594_v46, inf  ;;  %v1742_v46 = vand.u32 65535, %v4195_v53 }
 0x55c   : > { %1600 = vmin.xlane.f32.xlu0 %v1599_v30 }
 0x55d   : > { %2449 = vmatpush3.bf16.msra.mxu0 %v2516_v36  ;;  %2475 = vmatpush3.bf16.msra.mxu1 %v2516_v36 }
 0x55e   : > { %2450 = vmatprep.subr.bf16.mxu0 %v2517_v11  ;;  %2472 = vmatprep.subr.bf16.mxu1 %v2517_v11 }
 0x561   : > { %2451 = vmatpush3.bf16.msra.mxu0 %v2517_v11  ;;  %2476 = vmatpush3.bf16.msra.mxu1 %v2517_v11 }
 0x562   : > { %2452 = vmatprep.subr.bf16.mxu0 %v2518_v0  ;;  %2473 = vmatprep.subr.bf16.mxu1 %v2518_v0 }
 0x565   : > { %2453 = vmatpush3.bf16.msra.mxu0 %v2518_v0  ;;  %2477 = vmatpush3.bf16.msra.mxu1 %v2518_v0 }
 0x566   : > { %v4266_v40 = vpop.xlane.xlu1 %1611 }
 0x567   : > { %vm1613_vm1 = vcmp.eq.f32.partialorder %v4119_v63, %v4266_v40  ;;  %v1622_v63 = vand.u32 65535, %v4137_v20 }
 0x568   : > { %v1614_v5 = vsel %vm1613_vm1, %v1609_v18, inf  ;;  %v1744_v18 = vcvt.s32.f32 %v1742_v46 }
 0x569   : > { %1615 = vmin.xlane.f32.xlu1 %v1614_v5  ;;  %v1624_v28 = vcvt.s32.f32 %v1622_v63  ;;  %v1678_v63 = vcvt.f32.s32 %v4225_v51 }
 0x56a   : > { %v4273_v61 = vpop.xlane.xlu1 %1731  ;;  %v4275_v62 = vpop.xlane.xlu0 %1716 }
 0x56b   : > { %vm1733_vm3 = vcmp.eq.f32.partialorder %v4131_v44, %v4273_v61  ;;  %vm1718_vm4 = vcmp.eq.f32.partialorder %v4133_v17, %v4275_v62  ;;  %v1637_v44 = vand.u32 65535, %v4176_v26 }
 0x56c   : > { %v1734_v34 = vsel %vm1733_vm3, %v1729_v59, inf  ;;  %v1719_v41 = vsel %vm1718_vm4, %v1714_v49, inf  ;;  %v2612_v49 = vpop.eup %2611 }
 0x56d   : > { %1735 = vmin.xlane.f32.xlu1 %v1734_v34  ;;  %1720 = vmin.xlane.f32.xlu0 %v1719_v41  ;;  %v1639_v32 = vcvt.s32.f32 %v1637_v44  ;;  %v1663_v41 = vcvt.f32.s32 %v4229_v25 }
 0x56f   : > { %v4284_v21 = vpop.xlane.xlu0 %1626 }
 0x570   : > { %vm1628_vm5 = vcmp.eq.f32.partialorder %v4149_v12, %v4284_v21 }
 0x571   : > { %v1629_v17 = vsel %vm1628_vm5, %v1624_v28, inf }
 0x572   : > { %1630 = vmin.xlane.f32.xlu0 %v1629_v17  ;;  %v1664_v17 = vshll.u32 %v1663_v41, 16 }
 0x57c   : > { %v4289_v20 = vpop.xlane.xlu1 %1641 }
 0x57d   : > { %vm1643_vm6 = vcmp.eq.f32.partialorder %v4189_v8, %v4289_v20  ;;  %v1558_v8 = vcvt.f32.s32 %v4214_v37 }
 0x57e   : > { %v1644_v30 = vsel %vm1643_vm6, %v1639_v32, inf }
 0x57f   : > { %1645 = vmin.xlane.f32.xlu1 %v1644_v30  ;;  %v1559_v48 = vshll.u32 %v1558_v8, 16 }
 0x580   : > { %v4295_v12 = vpop.xlane.xlu1 %1761  ;;  %v4297_v50 = vpop.xlane.xlu0 %1746 }
 0x581   : > { %vm1763_vm7 = vcmp.eq.f32.partialorder %v4200_v27, %v4295_v12  ;;  %vm1748_vm8 = vcmp.eq.f32.partialorder %v4202_v35, %v4297_v50  ;;  %v1543_v35 = vcvt.f32.s32 %v4219_v3  ;;  %v1679_v3 = vshll.u32 %v1678_v63, 16 }
 0x582   : > { %v1764_v26 = vsel %vm1763_vm7, %v1759_v60, inf  ;;  %v1749_v1 = vsel %vm1748_vm8, %v1744_v18, inf  ;;  %v2614_v60 = vpop.eup %2613  ;;  %v1708_v18 = vcvt.f32.s32 %v4247_v47 }
 0x583   : > { %1765 = vmin.xlane.f32.xlu1 %v1764_v26  ;;  %1750 = vmin.xlane.f32.xlu0 %v1749_v1  ;;  %v1544_v38 = vshll.u32 %v1543_v35, 16  ;;  %v1589_v1 = vshll.u32 %v1588_v22, 16 }
 0x584   : > { %v1709_v54 = vshll.u32 %v1708_v18, 16 }
 0x5ca   : > { %v1556_v53 = vpop.xlane.xlu1 %1555 }
 0x5cb   : > { %v1557_v24 = vcvt.f32.s32 %v1556_v53 }
 0x5cd   : > { %v1560_v36 = vadd.s32 %v1559_v48, %v1557_v24  ;;  %v2616_v48 = vpop.eup %2615 }
 0x5cf   : > { %vm1772_vm9 = vcmp.eq.s32.totalorder %v2847_v29, %v1560_v36  ;;  %v4611_v36 = vld [vmem:[#allocation2_spill] sm:$0xff] }
 0x5d0   : > { %v2323_v5 = vsel %vm1772_vm9, 1.0, %v4582_v15 }
 0x5d1   : > { %v1868_v27 = vmul.f32 %v3976_v7, %v2323_v5 }
 0x5d3   : > { %v1884_v59 = vadd.f32 %v1868_v27, %v3639_v2  ;;  %v1573_v2 = vcvt.f32.s32 %v4235_v6  ;;  %v1693_v6 = vcvt.f32.s32 %v4245_v58  ;;  %v2618_v27 = vpop.eup %2617 }
 0x5d5   : > { %v1932_v11 = vmul.f32 %v2612_v49, %v1884_v59  ;;  %v1574_v52 = vshll.u32 %v1573_v2, 16  ;;  %v1694_v47 = vshll.u32 %v1693_v6, 16  ;;  %v4612_v59 = vld [vmem:[#allocation3_spill] sm:$0xff] }
 0x5d7   : > { %v1541_v37 = vpop.xlane.xlu0 %1540 }
 0x5d8   : > { %v1542_v34 = vcvt.f32.s32 %v1541_v37  ;;  %v1603_v37 = vcvt.f32.s32 %v4254_v19 }
 0x5da   : > { %v1545_v0 = vadd.s32 %v1544_v38, %v1542_v34 }
 0x5db   : > { %v1676_v7 = vpop.xlane.xlu1 %1675 }
 0x5dc   : > { %vm1771_vm10 = vcmp.eq.s32.totalorder %v2847_v29, %v1545_v0  ;;  %v1677_v28 = vcvt.f32.s32 %v1676_v7  ;;  %v1661_v31 = vpop.xlane.xlu0 %1660  ;;  %v2620_v0 = vpop.eup %2619 }
 0x5dd   : > { %v2322_v44 = vsel %vm1771_vm10, 1.0, %v4582_v15  ;;  %v1662_v51 = vcvt.f32.s32 %v1661_v31  ;;  %v2622_v2 = vpop.eup %2621  ;;  %v4614_v31 = vld [vmem:[#allocation8_spill] sm:$0xff] }
 0x5de   : > { %v1867_v25 = vmul.f32 %v4015_v42, %v2322_v44  ;;  %v1680_v16 = vadd.s32 %v1679_v3, %v1677_v28  ;;  %v4613_v28 = vld [vmem:[#allocation4_spill] sm:$0xff]  ;;  %v2624_v6 = vpop.eup %2623 }
 0x5df   : > { %v1665_v32 = vadd.s32 %v1664_v17, %v1662_v51 }
 0x5e0   : > { %vm1780_vm11 = vcmp.eq.s32.totalorder %v2847_v29, %v1680_v16  ;;  %v1571_v46 = vpop.xlane.xlu0 %1570  ;;  %v1883_v30 = vadd.f32 %v1867_v25, %v3711_v4  ;;  %v1604_v25 = vshll.u32 %v1603_v37, 16  ;;  %v4615_v16 = vld [vmem:[#allocation5_spill] sm:$0xff] }
 0x5e1   : > { %v2331_v55 = vsel %vm1780_vm11, 1.0, %v4582_v15  ;;  %vm1779_vm12 = vcmp.eq.s32.totalorder %v2847_v29, %v1665_v32  ;;  %v1572_v42 = vcvt.f32.s32 %v1571_v46  ;;  %v1586_v58 = vpop.xlane.xlu1 %1585 }
 0x5e2   : > { %v1876_v45 = vmul.f32 %v4036_v23, %v2331_v55  ;;  %v2330_v39 = vsel %vm1779_vm12, 1.0, %v4582_v15  ;;  %v1931_v26 = vmul.f32 %v2614_v60, %v1883_v30  ;;  %v1587_v53 = vcvt.f32.s32 %v1586_v58  ;;  %v4616_v30 = vld [vmem:[#allocation39_spill] sm:$0xff]  ;;  %v4618_v58 = vld [vmem:[#allocation37_spill] sm:$0xff] }
 0x5e3   : > { %v1875_v8 = vmul.f32 %v4045_v57, %v2330_v39  ;;  %v1575_v4 = vadd.s32 %v1574_v52, %v1572_v42  ;;  %v2626_v39 = vpop.eup %2625 }
 0x5e4   : > { %v1947_v24 = vpack.c.bf16 %v1932_v11, %v1931_v26  ;;  %v1892_v5 = vadd.f32 %v1876_v45, %v4611_v36  ;;  %v1590_v23 = vadd.s32 %v1589_v1, %v1587_v53  ;;  %v1691_v35 = vpop.xlane.xlu0 %1690  ;;  %v4619_v1 = vld [vmem:[#allocation13_spill] sm:$0xff] }
 0x5e5   : > { %vm1773_vm13 = vcmp.eq.s32.totalorder %v2847_v29, %v1575_v4  ;;  %v1891_v49 = vadd.f32 %v1875_v8, %v4612_v59  ;;  %v1706_v38 = vpop.xlane.xlu1 %1705  ;;  %v1692_v63 = vcvt.f32.s32 %v1691_v35  ;;  %v1618_v35 = vcvt.f32.s32 %v4266_v40  ;;  %v4623_v40 = vld [vmem:[#allocation28_spill] sm:$0xff] }
 0x5e6   : > { %v2324_v57 = vsel %vm1773_vm13, 1.0, %v4582_v15  ;;  %2454 = vmatprep.mubr.msk.bf16.mxu0 %vm490_vm0, %v1947_v24  ;;  %v1940_v14 = vmul.f32 %v2616_v48, %v1892_v5  ;;  %vm1774_vm14 = vcmp.eq.s32.totalorder %v2847_v29, %v1590_v23  ;;  %v1707_v34 = vcvt.f32.s32 %v1706_v38  ;;  %v4621_v5 = vld [vmem:[#allocation14_spill] sm:$0xff]  ;;  %v2628_v23 = vpop.eup %2627 }
 0x5e7   : > { %v1869_v11 = vmul.f32 %v4067_v43, %v2324_v57  ;;  %v1939_v41 = vmul.f32 %v2618_v27, %v1891_v49  ;;  %v2325_v7 = vsel %vm1774_vm14, 1.0, %v4582_v15  ;;  %v1695_v3 = vadd.s32 %v1694_v47, %v1692_v63  ;;  %v4620_v47 = vld [vmem:[#allocation9_spill] sm:$0xff] }
 0x5e8   : > { %v1870_v17 = vmul.f32 %v4614_v31, %v2325_v7  ;;  %v1710_v44 = vadd.s32 %v1709_v54, %v1707_v34  ;;  %v1738_v49 = vcvt.f32.s32 %v4273_v61  ;;  %v1619_v57 = vshll.u32 %v1618_v35, 16  ;;  %v4634_v35 = vld [vmem:[#allocation6_spill] sm:$0xff] }
 0x5e9   : > { %v1885_v19 = vadd.f32 %v1869_v11, %v4613_v28  ;;  %v1951_v51 = vpack.c.bf16 %v1940_v14, %v1939_v41  ;;  %vm1781_vm2 = vcmp.eq.s32.totalorder %v2847_v29, %v1695_v3  ;;  %v1601_v43 = vpop.xlane.xlu0 %1600  ;;  %v1723_v38 = vcvt.f32.s32 %v4275_v62  ;;  %v4622_v11 = vld [vmem:[#allocation27_spill] sm:$0xff] }
 0x5ea   : > { %v1886_v22 = vadd.f32 %v1870_v17, %v4615_v16  ;;  %vm1782_vm15 = vcmp.eq.s32.totalorder %v2847_v29, %v1710_v44  ;;  %v2332_v32 = vsel %vm1781_vm2, 1.0, %v4582_v15  ;;  %v1602_v52 = vcvt.f32.s32 %v1601_v43  ;;  %v4626_v44 = vld [vmem:[#allocation15_spill] sm:$0xff]  ;;  %v2630_v43 = vpop.eup %2629 }
 0x5eb   : > { %2462 = vmatprep.mubr.msk.bf16.mxu1 %vm490_vm0, %v1951_v51  ;;  %v2333_v46 = vsel %vm1782_vm15, 1.0, %v4582_v15  ;;  %v1877_v60 = vmul.f32 %v4616_v30, %v2332_v32  ;;  %v1933_v18 = vmul.f32 %v2620_v0, %v1885_v19  ;;  %v1802_v34 = vmax.f32 %v4622_v11, 1e-16  ;;  %v4625_v19 = vld [vmem:[#allocation41_spill] sm:$0xff] }
 0x5ec   : > { %v1878_v55 = vmul.f32 %v4617_v33, %v2333_v46  ;;  %v1605_v42 = vadd.s32 %v1604_v25, %v1602_v52  ;;  %v1934_v45 = vmul.f32 %v2622_v2, %v1886_v22  ;;  %v1801_v41 = vmax.f32 %v4623_v40, 1e-16  ;;  %v4627_v52 = vld [vmem:[#allocation23_spill] sm:$0xff]  ;;  %v4628_v46 = vld [vmem:[#allocation25_spill] sm:$0xff]  ;;  %v2632_v33 = vpop.eup %2631 }
 0x5ed   : > { %v1893_v26 = vadd.f32 %v1877_v60, %v4618_v58  ;;  %v1739_v0 = vshll.u32 %v1738_v49, 16  ;;  %v1724_v9 = vshll.u32 %v1723_v38, 16  ;;  %v1633_v62 = vcvt.f32.s32 %v4284_v21 }
 0x5ee   : > { %v1894_v8 = vadd.f32 %v1878_v55, %v4619_v1  ;;  %vm1775_vm1 = vcmp.eq.s32.totalorder %v2847_v29, %v1605_v42  ;;  %v1948_v4 = vpack.c.bf16 %v1934_v45, %v1933_v18  ;;  %2637 = vrcp.f32 %v1802_v34  ;;  %v4629_v55 = vld [vmem:[#allocation17_spill] sm:$0xff]  ;;  %v4630_v45 = vld [vmem:[#allocation16_spill] sm:$0xff] }
 0x5ef   : > { %v2326_v53 = vsel %vm1775_vm1, 1.0, %v4582_v15  ;;  %v1941_v48 = vmul.f32 %v2624_v6, %v1893_v26  ;;  %2639 = vrcp.f32 %v1801_v41  ;;  %v1634_v16 = vshll.u32 %v1633_v62, 16  ;;  %v2634_v26 = vpop.eup %2633 }
 0x5f0   : > { %v1871_v24 = vmul.f32 %v4620_v47, %v2326_v53  ;;  %2455 = vmatmul.mubr.msk.bf16.vlgmr.msra.gmra.mrb[0].mxu0 %vm490_vm0, %v1948_v4  ;;  %v1942_v36 = vmul.f32 %v2626_v39, %v1894_v8  ;;  %v4631_v53 = vld [vmem:[#allocation24_spill] sm:$0xff]  ;;  %v2636_v47 = vpop.eup %2635  ;;  %v1648_v49 = vcvt.f32.s32 %v4289_v20  ;;  %2641 = vrcp.f32 %v4211_v56 }
 0x5f1   : > { %v1768_v34 = vcvt.f32.s32 %v4295_v12 }
 0x5f2   : > { %v1887_v27 = vadd.f32 %v1871_v24, %v4621_v5  ;;  %v1952_v54 = vpack.c.bf16 %v1942_v36, %v1941_v48  ;;  %v4632_v5 = vld [vmem:[#allocation18_spill] sm:$0xff]  ;;  %v1649_v41 = vshll.u32 %v1648_v49, 16 }
 0x5f3   : > { %v1769_v20 = vshll.u32 %v1768_v34, 16 }
 0x5f4   : > { %2463 = vmatmul.mubr.msk.bf16.vlgmr.msra.gmra.mrb[0].mxu1 %vm490_vm0, %v1952_v54  ;;  %v1935_v59 = vmul.f32 %v2628_v23, %v1887_v27  ;;  %v4633_v23 = vld [vmem:[#allocation20_spill] sm:$0xff] }
 0x5f6   : > { %v1616_v37 = vpop.xlane.xlu1 %1615 }
 0x5f7   : > { %v1617_v63 = vcvt.f32.s32 %v1616_v37  ;;  %v4635_v37 = vld [vmem:[#allocation19_spill] sm:$0xff] }
 0x5f8   : > { %v2638_v36 = vpop.eup %2637 }
 0x5f9   : > { %v1620_v14 = vadd.s32 %v1619_v57, %v1617_v63  ;;  %v2640_v54 = vpop.eup %2639  ;;  %v4636_v57 = vld [vmem:[#allocation38_spill] sm:$0xff] }
 0x5fa   : > { %v1736_v7 = vpop.xlane.xlu1 %1735  ;;  %v1721_v3 = vpop.xlane.xlu0 %1720  ;;  %v1433_v38 = vadd.f32 %v4636_v57, %v4635_v37 }
 0x5fb   : > { %vm1776_vm3 = vcmp.eq.s32.totalorder %v2847_v29, %v1620_v14  ;;  %v1737_v61 = vcvt.f32.s32 %v1736_v7  ;;  %v1722_v2 = vcvt.f32.s32 %v1721_v3 }
 0x5fc   : > { %v2327_v28 = vsel %vm1776_vm3, 1.0, %v4582_v15  ;;  %v1913_v11 = vadd.f32 %v2640_v54, %v1433_v38 }
 0x5fd   : > { %v1872_v13 = vmul.f32 %v4625_v19, %v2327_v28  ;;  %v1740_v31 = vadd.s32 %v1739_v0, %v1737_v61  ;;  %v1725_v17 = vadd.s32 %v1724_v9, %v1722_v2  ;;  %v1753_v0 = vcvt.f32.s32 %v4297_v50 }
 0x5ff   : > { %v1888_v51 = vadd.f32 %v1872_v13, %v4626_v44  ;;  %vm1784_vm4 = vcmp.eq.s32.totalorder %v2847_v29, %v1740_v31  ;;  %vm1783_vm5 = vcmp.eq.s32.totalorder %v2847_v29, %v1725_v17  ;;  %v1631_v25 = vpop.xlane.xlu0 %1630  ;;  %v1754_v2 = vshll.u32 %v1753_v0, 16  ;;  %v4638_v31 = vld [vmem:[#allocation21_spill] sm:$0xff]  ;;  %v2642_v17 = vpop.eup %2641 }
 0x600   : > { %v2335_v21 = vsel %vm1784_vm4, 1.0, %v4582_v15  ;;  %v2334_v22 = vsel %vm1783_vm5, 1.0, %v4582_v15  ;;  %v1632_v32 = vcvt.f32.s32 %v1631_v25 }
 0x601   : > { %v1880_v6 = vmul.f32 %v4627_v52, %v2335_v21  ;;  %v1879_v30 = vmul.f32 %v4628_v46, %v2334_v22  ;;  %v1936_v60 = vmul.f32 %v2630_v43, %v1888_v51  ;;  %v4639_v22 = vld [vmem:[#allocation7_spill] sm:$0xff]  ;;  %v4640_v52 = vld [vmem:[#allocation22_spill] sm:$0xff] }
 0x602   : > { %v1635_v18 = vadd.s32 %v1634_v16, %v1632_v32 }
 0x603   : > { %v1896_v42 = vadd.f32 %v1880_v6, %v4629_v55  ;;  %v1895_v39 = vadd.f32 %v1879_v30, %v4630_v45  ;;  %v1949_v58 = vpack.c.bf16 %v1936_v60, %v1935_v59  ;;  %v1434_v59 = vadd.f32 %v4634_v35, %v4633_v23 }
 0x604   : > { %vm1777_vm6 = vcmp.eq.s32.totalorder %v2847_v29, %v1635_v18 }
 0x605   : > { %v2328_v1 = vsel %vm1777_vm6, 1.0, %v4582_v15  ;;  %2458 = vmatprep.mubr.msk.bf16.mxu0 %vm490_vm0, %v1949_v58  ;;  %v1943_v8 = vmul.f32 %v2634_v26, %v1895_v39  ;;  %v1944_v4 = vmul.f32 %v2632_v33, %v1896_v42  ;;  %v1914_v14 = vadd.f32 %v2638_v36, %v1434_v59 }
 0x606   : > { %v1873_v48 = vmul.f32 %v4631_v53, %v2328_v1 }
 0x607   : > { %v1953_v24 = vpack.c.bf16 %v1944_v4, %v1943_v8  ;;  %2643 = vrcp.f32 %v1914_v14 }
 0x608   : > { %v1889_v27 = vadd.f32 %v1873_v48, %v4632_v5  ;;  %2645 = vrcp.f32 %v1913_v11 }
 0x609   : > { %2466 = vmatprep.mubr.msk.bf16.mxu1 %vm490_vm0, %v1953_v24 }
 0x60a   : > { %v1937_v63 = vmul.f32 %v2636_v47, %v1889_v27 }
 0x60c   : > { %v1646_v40 = vpop.xlane.xlu1 %1645 }
 0x60d   : > { %v1647_v7 = vcvt.f32.s32 %v1646_v40 }
 0x60f   : > { %v1650_v3 = vadd.s32 %v1649_v41, %v1647_v7 }
 0x610   : > { %v1766_v9 = vpop.xlane.xlu1 %1765  ;;  %v1751_v61 = vpop.xlane.xlu0 %1750 }
 0x611   : > { %vm1778_vm7 = vcmp.eq.s32.totalorder %v2847_v29, %v1650_v3  ;;  %v1767_v62 = vcvt.f32.s32 %v1766_v9  ;;  %v1752_v28 = vcvt.f32.s32 %v1751_v61  ;;  %v2644_v21 = vpop.eup %2643 }
 0x612   : > { %v2329_v56 = vsel %vm1778_vm7, 1.0, %v4582_v15  ;;  %v2646_v30 = vpop.eup %2645 }
 0x613   : > { %v1874_v12 = vmul.f32 %v4637_v10, %v2329_v56  ;;  %v1770_v19 = vadd.s32 %v1769_v20, %v1767_v62  ;;  %v1755_v13 = vadd.s32 %v1754_v2, %v1752_v28 }
 0x615   : > { %v1890_v50 = vadd.f32 %v1874_v12, %v4638_v31  ;;  %vm1786_vm8 = vcmp.eq.s32.totalorder %v2847_v29, %v1770_v19  ;;  %vm1785_vm9 = vcmp.eq.s32.totalorder %v2847_v29, %v1755_v13 }
 0x616   : > { %v2337_v44 = vsel %vm1786_vm8, 1.0, %v4582_v15  ;;  %v2336_v51 = vsel %vm1785_vm9, 1.0, %v4582_v15 }
 0x617   : > { %v1882_v25 = vmul.f32 %v2638_v36, %v2337_v44  ;;  %v1881_v43 = vmul.f32 %v2640_v54, %v2336_v51  ;;  %v1938_v16 = vmul.f32 %v2642_v17, %v1890_v50 }
 0x619   : > { %v1898_v32 = vadd.f32 %v1882_v25, %v4639_v22  ;;  %v1897_v6 = vadd.f32 %v1881_v43, %v4640_v52  ;;  %v1950_v46 = vpack.c.bf16 %v1938_v16, %v1937_v63 }
 0x61b   : > { %2459 = vmatmul.mubr.msk.bf16.gmra.mrb[4].mxu0 %vm490_vm0, %v1950_v46  ;;  %v1945_v60 = vmul.f32 %v2646_v30, %v1897_v6  ;;  %v1946_v29 = vmul.f32 %v2644_v21, %v1898_v32 }
 0x61d   : > { %v1954_v18 = vpack.c.bf16 %v1946_v29, %v1945_v60 }
 0x61f   : > { %2467 = vmatmul.mubr.msk.bf16.gmra.mrb[4].mxu1 %vm490_vm0, %v1954_v18 }
 0x6c3   : > { %v2456_v33 = vpop.f32.mrb[0].mxu0 }
 0x6c4   : > { %v2037_v15 = vpop.f32.mrb[1].mxu0 }
 0x6c5   : > { %v2457_v55 = vpop.f32.mrb[2].mxu0 }
 0x6c6   : > { %v2395_v42 = vpack.c.bf16 %v2457_v55, %v2456_v33  ;;  %v2040_v45 = vpop.f32.mrb[3].mxu0 }
 0x6c7   : > { %v2390_v39 = vpack.c.bf16 %v2040_v45, %v2037_v15  ;;  %v2464_v58 = vpop.f32.mrb[0].mxu1 }
 0x6c8   : > { %2427 = vst [vmem:[%s228_s29 + $0x8] sm:$0xff] %v2395_v42   ;;  %v2069_v26 = vpop.f32.mrb[1].mxu1 }
 0x6c9   : > { %2391 = vst [vmem:[%s228_s29] sm:$0xff] %v2390_v39   ;;  %v2465_v1 = vpop.f32.mrb[2].mxu1 }
 0x6ca   : > { %v2415_v8 = vpack.c.bf16 %v2465_v1, %v2464_v58  ;;  %v2072_v4 = vpop.f32.mrb[3].mxu1 }
 0x6cb   : > { %v2410_v53 = vpack.c.bf16 %v2072_v4, %v2069_v26 }
 0x6cc   : > { %2431 = vst [vmem:[%s228_s29 + $0x28] sm:$0xff] %v2415_v8  }
 0x6cd   : > { %2430 = vst [vmem:[%s228_s29 + $0x20] sm:$0xff] %v2410_v53  }
 0x6ee   : > { %v2460_v48 = vpop.f32.mrb[4].mxu0 }
 0x6ef   : > { %v2053_v47 = vpop.f32.mrb[5].mxu0 }
 0x6f0   : > { %v2461_v24 = vpop.f32.mrb[6].mxu0 }
 0x6f1   : > { %v2405_v36 = vpack.c.bf16 %v2461_v24, %v2460_v48  ;;  %v2056_v5 = vpop.f32.mrb[7].mxu0 }
 0x6f2   : > { %v2400_v27 = vpack.c.bf16 %v2056_v5, %v2053_v47  ;;  %v2468_v54 = vpop.f32.mrb[4].mxu1 }
 0x6f3   : > { %2429 = vst [vmem:[%s228_s29 + $0x18] sm:$0xff] %v2405_v36   ;;  %v2085_v23 = vpop.f32.mrb[5].mxu1 }
 0x6f4   : > { %2428 = vst [vmem:[%s228_s29 + $0x10] sm:$0xff] %v2400_v27   ;;  %v2469_v35 = vpop.f32.mrb[6].mxu1 }
 0x6f5   : > { %v2425_v59 = vpack.c.bf16 %v2469_v35, %v2468_v54  ;;  %v2088_v49 = vpop.f32.mrb[7].mxu1 }
 0x6f6   : > { %v2420_v37 = vpack.c.bf16 %v2088_v49, %v2085_v23 }
 0x6f7   : > { %2433 = vst [vmem:[%s228_s29 + $0x38] sm:$0xff] %v2425_v59  }
 0x6f8   : > { %2432 = vst [vmem:[%s228_s29 + $0x30] sm:$0xff] %v2420_v37  }
 0x6f9 PF: > { %s13_s14 = sadd.s32 1, %s2669_s14   ;;  %s4641_s12 = smov %s2665_s13 }
 0x6fa   : > { %p10_p5 = scmp.ge.s32.totalorder %s13_s14, 4   ;;  %s4642_s13 = smov %s4644_s15 }
 0x6fc   :  { %12 = sbr.rel (!%p10_p5) target bundleno = 2 (0x2), region = 65 }

</bundles_post_ra>
